<compile_context>
chip_gen: v7x
topology: tpu7x:2x2x1
jax: 0.10.0
libtpu: 0.0.40
codegen_flags: <defaults>
</compile_context>

<pallas_src>
import jax
import jax.numpy as jnp
from jax.experimental import pallas as pl
from jax.experimental.pallas import tpu as pltpu

EPS = 1e-5
EXPANSION = 4


def _make_kernel(H, W, has_proj):
    def body(x_ref, w1_ref, b1_ref, w2_ref, b2_ref, w3_ref, b3_ref,
             ws_ref, bs_ref, out_ref, pad_ref):
        # x_ref  : (H*W, Cin)   bf16     out_ref: (H*W, 4P) f32
        # w1_ref : (Cin, P)     bf16     b1_ref : (1, P)    f32
        # w2_ref : (3, 3P, P)   bf16     b2_ref : (1, P)    f32   (ky major; kx,cin in K)
        # w3_ref : (P, 4P)      bf16     b3_ref : (1, 4P)   f32
        # ws_ref : (Cin, 4P)    bf16     bs_ref : (1, 4P)   f32   (projection shortcut only)
        # pad_ref: (H+2, W+2, P) bf16 scratch (1-pixel halo for the 3x3 conv)
        P = pad_ref.shape[-1]

        x = x_ref[...]                                                    # (H*W, Cin)

        # ---- conv1 (1x1) -> bn1 -> relu : one (H*W, Cin) x (Cin, P) MXU matmul ----
        h1 = jnp.dot(x, w1_ref[...], preferred_element_type=jnp.float32)
        h1 = jnp.maximum(h1 + b1_ref[...], 0.0)                           # (H*W, P) f32
        h1 = h1.astype(jnp.bfloat16).reshape(H, W, P)

        # Interior rows + left/right zero halo in one contiguous, sublane-offset-0 store.
        zcol = jnp.zeros((H, 1, P), jnp.bfloat16)
        pad_ref[pl.ds(1, H)] = jnp.concatenate([zcol, h1, zcol], axis=1)  # (H, W+2, P)
        # Zero only the top/bottom halo rows (must happen every grid step).
        zrow = jnp.zeros((W + 2, P), jnp.bfloat16)
        pad_ref[0] = zrow
        pad_ref[H + 1] = zrow

        # ---- conv2 (3x3, pad 1) -> bn2 -> relu : 3 matmuls with K = 3P ------------
        acc = jnp.zeros((H * W, P), jnp.float32)
        for ky in range(3):
            rows = pad_ref[pl.ds(ky, H)]                                  # (H, W+2, P)
            slab = jnp.concatenate(
                [rows[:, kx:kx + W, :].reshape(H * W, P) for kx in range(3)],
                axis=-1)                                                  # (H*W, 3P)
            acc = acc + jnp.dot(slab, w2_ref[ky],
                                preferred_element_type=jnp.float32)
        h2 = jnp.maximum(acc + b2_ref[...], 0.0).astype(jnp.bfloat16)     # (H*W, P)

        # ---- conv3 (1x1) -> bn3, shortcut, residual add, relu ---------------------
        out = jnp.dot(h2, w3_ref[...], preferred_element_type=jnp.float32) + b3_ref[...]
        if has_proj:
            out = out + (jnp.dot(x, ws_ref[...], preferred_element_type=jnp.float32)
                         + bs_ref[...])
        else:
            out = out + x.astype(jnp.float32)      # identity shortcut (Cin == 4P)
        out_ref[...] = jnp.maximum(out, 0.0)

    if has_proj:
        def kernel(x_ref, w1, b1, w2, b2, w3, b3, ws, bs, out_ref, pad_ref):
            body(x_ref, w1, b1, w2, b2, w3, b3, ws, bs, out_ref, pad_ref)
    else:
        def kernel(x_ref, w1, b1, w2, b2, w3, b3, out_ref, pad_ref):
            body(x_ref, w1, b1, w2, b2, w3, b3, None, None, out_ref, pad_ref)
    return kernel


def _fold_bn(gamma, beta, mean, var):
    scale = gamma / jnp.sqrt(var + EPS)
    bias = beta - mean * scale
    return scale, bias


def bottleneck_pallas(x_nchw, p, stride=1):
    # TODO(synk): stride != 1 in the reference module strides BOTH conv1 and conv2 while
    # the shortcut strides once -> PyTorch itself raises a shape error; only stride==1.
    assert stride == 1
    N, Cin, H, W = x_nchw.shape
    planes = p["w1"].shape[0]
    cout = EXPANSION * planes
    has_proj = "ws" in p

    # NCHW -> (N, H*W, C) channels-last, bf16 activations (halves HBM traffic).
    x3d = jnp.transpose(x_nchw, (0, 2, 3, 1)).reshape(N, H * W, Cin).astype(jnp.bfloat16)

    s1, b1 = _fold_bn(*p["bn1"])
    s2, b2 = _fold_bn(*p["bn2"])
    s3, b3 = _fold_bn(*p["bn3"])

    # PyTorch OIHW conv weights -> (C_in, C_out) matrices, BN scale folded into columns.
    w1 = (p["w1"][:, :, 0, 0].T * s1[None, :]).astype(jnp.bfloat16)           # (Cin, P)
    w2 = jnp.transpose(p["w2"], (2, 3, 1, 0)).reshape(3, 3 * planes, planes)  # (3, 3P, P)
    w2 = (w2 * s2[None, None, :]).astype(jnp.bfloat16)
    w3 = (p["w3"][:, :, 0, 0].T * s3[None, :]).astype(jnp.bfloat16)           # (P, 4P)

    full = lambda a: pl.BlockSpec(a.shape, lambda *_: (0,) * a.ndim)

    operands = [x3d,
                w1, b1.reshape(1, -1).astype(jnp.float32),
                w2, b2.reshape(1, -1).astype(jnp.float32),
                w3, b3.reshape(1, -1).astype(jnp.float32)]
    in_specs = [pl.BlockSpec((None, H * W, Cin), lambda n: (n, 0, 0)),
                full(w1), full(operands[2]),
                full(w2), full(operands[4]),
                full(w3), full(operands[6])]

    if has_proj:  # projection shortcut (1x1 conv + bn)
        ss, bs = _fold_bn(*p["bns"])
        ws = (p["ws"][:, :, 0, 0].T * ss[None, :]).astype(jnp.bfloat16)       # (Cin, 4P)
        bsr = bs.reshape(1, -1).astype(jnp.float32)
        operands += [ws, bsr]
        in_specs += [full(ws), full(bsr)]
    else:
        assert Cin == cout  # identity shortcut only valid when channels already match

    out = pl.pallas_call(
        _make_kernel(H, W, has_proj),
        out_shape=jax.ShapeDtypeStruct((N, H * W, cout), jnp.float32),
        grid=(N,),
        in_specs=in_specs,
        out_specs=pl.BlockSpec((None, H * W, cout), lambda n: (n, 0, 0)),
        scratch_shapes=[pltpu.VMEM((H + 2, W + 2, planes), jnp.bfloat16)],
        compiler_params=pltpu.CompilerParams(
            dimension_semantics=("parallel",),
            vmem_limit_bytes=32 * 1024 * 1024),
    )(*operands)

    return out.reshape(N, H, W, cout).transpose(0, 3, 1, 2)  # back to NCHW


# ---------------- pure-JAX reference (mirrors the PyTorch forward, eval-mode BN) -----------
def bottleneck_ref(x, p):
    def conv(x, w, stride=1, padding=0):
        return jax.lax.conv_general_dilated(
            x, w, window_strides=(stride, stride),
            padding=[(padding, padding)] * 2,
            dimension_numbers=("NCHW", "OIHW", "NCHW"))

    def bn(x, stats):
        gamma, beta, mean, var = stats
        inv = gamma / jnp.sqrt(var + EPS)
        return x * inv[None, :, None, None] + (beta - mean * inv)[None, :, None, None]

    out = jax.nn.relu(bn(conv(x, p["w1"]), p["bn1"]))
    out = jax.nn.relu(bn(conv(out, p["w2"], padding=1), p["bn2"]))
    out = bn(conv(out, p["w3"]), p["bn3"])
    sc = bn(conv(x, p["ws"]), p["bns"]) if "ws" in p else x
    return jax.nn.relu(out + sc)


def init_params(key, in_planes, planes):
    cout = EXPANSION * planes
    ks = jax.random.split(key, 8)

    def bn_params(k, c):
        k1, k2, k3, k4 = jax.random.split(k, 4)
        gamma = jax.random.uniform(k1, (c,), jnp.float32, 0.5, 1.5)
        beta = 0.1 * jax.random.normal(k2, (c,), jnp.float32)
        mean = 0.1 * jax.random.normal(k3, (c,), jnp.float32)
        var = jax.random.uniform(k4, (c,), jnp.float32, 0.5, 1.5)
        return (gamma, beta, mean, var)

    p = {
        "w1": 0.3 * jax.random.normal(ks[0], (planes, in_planes, 1, 1), jnp.float32),
        "bn1": bn_params(ks[1], planes),
        "w2": 0.3 * jax.random.normal(ks[2], (planes, planes, 3, 3), jnp.float32),
        "bn2": bn_params(ks[3], planes),
        "w3": 0.3 * jax.random.normal(ks[4], (cout, planes, 1, 1), jnp.float32),
        "bn3": bn_params(ks[5], cout),
    }
    if in_planes != cout:  # stride fixed to 1 -> projection shortcut iff channels differ
        p["ws"] = 0.3 * jax.random.normal(ks[6], (cout, in_planes, 1, 1), jnp.float32)
        p["bns"] = bn_params(ks[7], cout)
    return p


if __name__ == "__main__":
    key = jax.random.PRNGKey(0)
    k1, k2 = jax.random.split(key)

    def run_case(name, N, Cin, H, W, planes, k):
        kx, kp = jax.random.split(k)
        x = jax.random.normal(kx, (N, Cin, H, W), jnp.float32)
        params = init_params(kp, Cin, planes)
        out = jax.block_until_ready(bottleneck_pallas(x, params, stride=1))
        ref = bottleneck_ref(x, params)
        assert out.shape == ref.shape == (N, EXPANSION * planes, H, W), (out.shape, ref.shape)
        err = float(jnp.max(jnp.abs(out - ref)))
        scale = float(jnp.max(jnp.abs(ref))) + 1e-6
        assert err / scale < 5e-2, f"{name}: rel err {err / scale:.4f} (abs {err:.4f})"

    # projection-shortcut path (Cin != 4*planes) and identity-shortcut path (Cin == 4*planes)
    run_case("projection", 2, 4, 16, 16, 4, k1)
    run_case("identity", 2, 16, 16, 16, 4, k2)

    print("KERNEL_OK")
</pallas_src>

<mosaic_0001>
module attributes {stable_mosaic.version = 11 : i64} {
  func.func @kernel(%arg0: i32, %arg1: memref<1x256x4xbf16, #tpu.memory_space<vmem>>, %arg2: memref<4x4xbf16, #tpu.memory_space<vmem>>, %arg3: memref<1x4xf32, #tpu.memory_space<vmem>>, %arg4: memref<3x12x4xbf16, #tpu.memory_space<vmem>>, %arg5: memref<1x4xf32, #tpu.memory_space<vmem>>, %arg6: memref<4x16xbf16, #tpu.memory_space<vmem>>, %arg7: memref<1x16xf32, #tpu.memory_space<vmem>>, %arg8: memref<4x16xbf16, #tpu.memory_space<vmem>>, %arg9: memref<1x16xf32, #tpu.memory_space<vmem>>, %arg10: memref<1x256x16xf32, #tpu.memory_space<vmem>>, %arg11: memref<18x18x4xbf16, #tpu.memory_space<vmem>>) attributes {dimension_semantics = [#tpu.dimension_semantics<parallel>], iteration_bounds = array<i64: 2>, scalar_prefetch = 0 : i64, scratch_operands = 1 : i64, tpu.core_type = #tpu.core_type<tc>, window_params = [{transform_indices = @transform_0, window_bounds = array<i64: 1, 256, 4>}, {pipeline_mode = #tpu.pipeline_mode<synchronous>, transform_indices = @transform_1, window_bounds = array<i64: 4, 4>}, {pipeline_mode = #tpu.pipeline_mode<synchronous>, transform_indices = @transform_2, window_bounds = array<i64: 1, 4>}, {pipeline_mode = #tpu.pipeline_mode<synchronous>, transform_indices = @transform_3, window_bounds = array<i64: 3, 12, 4>}, {pipeline_mode = #tpu.pipeline_mode<synchronous>, transform_indices = @transform_4, window_bounds = array<i64: 1, 4>}, {pipeline_mode = #tpu.pipeline_mode<synchronous>, transform_indices = @transform_5, window_bounds = array<i64: 4, 16>}, {pipeline_mode = #tpu.pipeline_mode<synchronous>, transform_indices = @transform_6, window_bounds = array<i64: 1, 16>}, {pipeline_mode = #tpu.pipeline_mode<synchronous>, transform_indices = @transform_7, window_bounds = array<i64: 4, 16>}, {pipeline_mode = #tpu.pipeline_mode<synchronous>, transform_indices = @transform_8, window_bounds = array<i64: 1, 16>}, {transform_indices = @transform_9, window_bounds = array<i64: 1, 256, 16>}]} {
    %c0 = arith.constant 0 : index
    %c0_0 = arith.constant 0 : index
    %c0_1 = arith.constant 0 : index
    %0 = vector.load %arg1[%c0, %c0_0, %c0_1] : memref<1x256x4xbf16, #tpu.memory_space<vmem>>, vector<1x256x4xbf16>
    %1 = vector.shape_cast %0 : vector<1x256x4xbf16> to vector<256x4xbf16>
    %c0_2 = arith.constant 0 : index
    %c0_3 = arith.constant 0 : index
    %2 = vector.load %arg2[%c0_2, %c0_3] : memref<4x4xbf16, #tpu.memory_space<vmem>>, vector<4x4xbf16>
    %cst = arith.constant dense<0.000000e+00> : vector<256x4xf32>
    %3 = tpu.matmul %1, %2, %cst {dimension_numbers = #tpu.dot_dimension_numbers<[1], [0], [0], [1], [0, 0, 1, 1], [], []>} : vector<256x4xbf16>, vector<4x4xbf16>, vector<256x4xf32> -> vector<256x4xf32>
    %c0_4 = arith.constant 0 : index
    %c0_5 = arith.constant 0 : index
    %4 = vector.load %arg3[%c0_4, %c0_5] : memref<1x4xf32, #tpu.memory_space<vmem>>, vector<1x4xf32>
    %5 = vector.broadcast %4 : vector<1x4xf32> to vector<256x4xf32>
    %6 = arith.addf %3, %5 : vector<256x4xf32>
    %cst_6 = arith.constant 0.000000e+00 : f32
    %7 = vector.broadcast %cst_6 : f32 to vector<256x4xf32>
    %8 = arith.maximumf %6, %7 : vector<256x4xf32>
    %9 = arith.truncf %8 : vector<256x4xf32> to vector<256x4xbf16>
    %10 = vector.shape_cast %9 : vector<256x4xbf16> to vector<16x16x4xbf16>
    %cst_7 = arith.constant 0.000000e+00 : bf16
    %11 = vector.broadcast %cst_7 : bf16 to vector<16x1x4xbf16>
    %12 = tpu.concatenate %11, %10, %11 in 1 : vector<16x1x4xbf16>, vector<16x16x4xbf16>, vector<16x1x4xbf16> -> vector<16x18x4xbf16>
    %c1 = arith.constant 1 : index
    %c0_8 = arith.constant 0 : index
    %c0_9 = arith.constant 0 : index
    %13 = vector.load %arg11[%c1, %c0_8, %c0_9] : memref<18x18x4xbf16, #tpu.memory_space<vmem>>, vector<16x18x4xbf16>
    tpu.vector_store %arg11[%c1, %c0_8, %c0_9], %12 {strides = array<i32>} : memref<18x18x4xbf16, #tpu.memory_space<vmem>>, vector<16x18x4xbf16>,
    %cst_10 = arith.constant 0.000000e+00 : bf16
    %14 = vector.broadcast %cst_10 : bf16 to vector<18x4xbf16>
    %c0_11 = arith.constant 0 : index
    %c0_12 = arith.constant 0 : index
    %c0_13 = arith.constant 0 : index
    %15 = vector.load %arg11[%c0_11, %c0_12, %c0_13] : memref<18x18x4xbf16, #tpu.memory_space<vmem>>, vector<1x18x4xbf16>
    %16 = vector.shape_cast %15 : vector<1x18x4xbf16> to vector<18x4xbf16>
    %17 = vector.shape_cast %14 : vector<18x4xbf16> to vector<1x18x4xbf16>
    tpu.vector_store %arg11[%c0_11, %c0_12, %c0_13], %17 {strides = array<i32>} : memref<18x18x4xbf16, #tpu.memory_space<vmem>>, vector<1x18x4xbf16>,
    %c17 = arith.constant 17 : index
    %c0_14 = arith.constant 0 : index
    %c0_15 = arith.constant 0 : index
    %18 = vector.load %arg11[%c17, %c0_14, %c0_15] : memref<18x18x4xbf16, #tpu.memory_space<vmem>>, vector<1x18x4xbf16>
    %19 = vector.shape_cast %18 : vector<1x18x4xbf16> to vector<18x4xbf16>
    %20 = vector.shape_cast %14 : vector<18x4xbf16> to vector<1x18x4xbf16>
    tpu.vector_store %arg11[%c17, %c0_14, %c0_15], %20 {strides = array<i32>} : memref<18x18x4xbf16, #tpu.memory_space<vmem>>, vector<1x18x4xbf16>,
    %cst_16 = arith.constant 0.000000e+00 : f32
    %21 = vector.broadcast %cst_16 : f32 to vector<256x4xf32>
    %c0_17 = arith.constant 0 : index
    %c0_18 = arith.constant 0 : index
    %c0_19 = arith.constant 0 : index
    %22 = vector.load %arg11[%c0_17, %c0_18, %c0_19] : memref<18x18x4xbf16, #tpu.memory_space<vmem>>, vector<16x18x4xbf16>
    %23 = vector.extract_strided_slice %22 {offsets = [0, 0, 0], sizes = [16, 16, 4], strides = [1, 1, 1]} : vector<16x18x4xbf16> to vector<16x16x4xbf16>
    %24 = vector.shape_cast %23 : vector<16x16x4xbf16> to vector<256x4xbf16>
    %25 = vector.extract_strided_slice %22 {offsets = [0, 1, 0], sizes = [16, 16, 4], strides = [1, 1, 1]} : vector<16x18x4xbf16> to vector<16x16x4xbf16>
    %26 = vector.shape_cast %25 : vector<16x16x4xbf16> to vector<256x4xbf16>
    %27 = vector.extract_strided_slice %22 {offsets = [0, 2, 0], sizes = [16, 16, 4], strides = [1, 1, 1]} : vector<16x18x4xbf16> to vector<16x16x4xbf16>
    %28 = vector.shape_cast %27 : vector<16x16x4xbf16> to vector<256x4xbf16>
    %29 = tpu.concatenate %24, %26, %28 in 1 : vector<256x4xbf16>, vector<256x4xbf16>, vector<256x4xbf16> -> vector<256x12xbf16>
    %c0_20 = arith.constant 0 : index
    %c0_21 = arith.constant 0 : index
    %c0_22 = arith.constant 0 : index
    %30 = vector.load %arg4[%c0_20, %c0_21, %c0_22] : memref<3x12x4xbf16, #tpu.memory_space<vmem>>, vector<1x12x4xbf16>
    %31 = vector.shape_cast %30 : vector<1x12x4xbf16> to vector<12x4xbf16>
    %cst_23 = arith.constant dense<0.000000e+00> : vector<256x4xf32>
    %32 = tpu.matmul %29, %31, %cst_23 {dimension_numbers = #tpu.dot_dimension_numbers<[1], [0], [0], [1], [0, 0, 1, 1], [], []>} : vector<256x12xbf16>, vector<12x4xbf16>, vector<256x4xf32> -> vector<256x4xf32>
    %33 = arith.addf %21, %32 : vector<256x4xf32>
    %c1_24 = arith.constant 1 : index
    %c0_25 = arith.constant 0 : index
    %c0_26 = arith.constant 0 : index
    %34 = vector.load %arg11[%c1_24, %c0_25, %c0_26] : memref<18x18x4xbf16, #tpu.memory_space<vmem>>, vector<16x18x4xbf16>
    %35 = vector.extract_strided_slice %34 {offsets = [0, 0, 0], sizes = [16, 16, 4], strides = [1, 1, 1]} : vector<16x18x4xbf16> to vector<16x16x4xbf16>
    %36 = vector.shape_cast %35 : vector<16x16x4xbf16> to vector<256x4xbf16>
    %37 = vector.extract_strided_slice %34 {offsets = [0, 1, 0], sizes = [16, 16, 4], strides = [1, 1, 1]} : vector<16x18x4xbf16> to vector<16x16x4xbf16>
    %38 = vector.shape_cast %37 : vector<16x16x4xbf16> to vector<256x4xbf16>
    %39 = vector.extract_strided_slice %34 {offsets = [0, 2, 0], sizes = [16, 16, 4], strides = [1, 1, 1]} : vector<16x18x4xbf16> to vector<16x16x4xbf16>
    %40 = vector.shape_cast %39 : vector<16x16x4xbf16> to vector<256x4xbf16>
    %41 = tpu.concatenate %36, %38, %40 in 1 : vector<256x4xbf16>, vector<256x4xbf16>, vector<256x4xbf16> -> vector<256x12xbf16>
    %c1_27 = arith.constant 1 : index
    %c0_28 = arith.constant 0 : index
    %c0_29 = arith.constant 0 : index
    %42 = vector.load %arg4[%c1_27, %c0_28, %c0_29] : memref<3x12x4xbf16, #tpu.memory_space<vmem>>, vector<1x12x4xbf16>
    %43 = vector.shape_cast %42 : vector<1x12x4xbf16> to vector<12x4xbf16>
    %cst_30 = arith.constant dense<0.000000e+00> : vector<256x4xf32>
    %44 = tpu.matmul %41, %43, %cst_30 {dimension_numbers = #tpu.dot_dimension_numbers<[1], [0], [0], [1], [0, 0, 1, 1], [], []>} : vector<256x12xbf16>, vector<12x4xbf16>, vector<256x4xf32> -> vector<256x4xf32>
    %45 = arith.addf %33, %44 : vector<256x4xf32>
    %c2 = arith.constant 2 : index
    %c0_31 = arith.constant 0 : index
    %c0_32 = arith.constant 0 : index
    %46 = vector.load %arg11[%c2, %c0_31, %c0_32] : memref<18x18x4xbf16, #tpu.memory_space<vmem>>, vector<16x18x4xbf16>
    %47 = vector.extract_strided_slice %46 {offsets = [0, 0, 0], sizes = [16, 16, 4], strides = [1, 1, 1]} : vector<16x18x4xbf16> to vector<16x16x4xbf16>
    %48 = vector.shape_cast %47 : vector<16x16x4xbf16> to vector<256x4xbf16>
    %49 = vector.extract_strided_slice %46 {offsets = [0, 1, 0], sizes = [16, 16, 4], strides = [1, 1, 1]} : vector<16x18x4xbf16> to vector<16x16x4xbf16>
    %50 = vector.shape_cast %49 : vector<16x16x4xbf16> to vector<256x4xbf16>
    %51 = vector.extract_strided_slice %46 {offsets = [0, 2, 0], sizes = [16, 16, 4], strides = [1, 1, 1]} : vector<16x18x4xbf16> to vector<16x16x4xbf16>
    %52 = vector.shape_cast %51 : vector<16x16x4xbf16> to vector<256x4xbf16>
    %53 = tpu.concatenate %48, %50, %52 in 1 : vector<256x4xbf16>, vector<256x4xbf16>, vector<256x4xbf16> -> vector<256x12xbf16>
    %c2_33 = arith.constant 2 : index
    %c0_34 = arith.constant 0 : index
    %c0_35 = arith.constant 0 : index
    %54 = vector.load %arg4[%c2_33, %c0_34, %c0_35] : memref<3x12x4xbf16, #tpu.memory_space<vmem>>, vector<1x12x4xbf16>
    %55 = vector.shape_cast %54 : vector<1x12x4xbf16> to vector<12x4xbf16>
    %cst_36 = arith.constant dense<0.000000e+00> : vector<256x4xf32>
    %56 = tpu.matmul %53, %55, %cst_36 {dimension_numbers = #tpu.dot_dimension_numbers<[1], [0], [0], [1], [0, 0, 1, 1], [], []>} : vector<256x12xbf16>, vector<12x4xbf16>, vector<256x4xf32> -> vector<256x4xf32>
    %57 = arith.addf %45, %56 : vector<256x4xf32>
    %c0_37 = arith.constant 0 : index
    %c0_38 = arith.constant 0 : index
    %58 = vector.load %arg5[%c0_37, %c0_38] : memref<1x4xf32, #tpu.memory_space<vmem>>, vector<1x4xf32>
    %59 = vector.broadcast %58 : vector<1x4xf32> to vector<256x4xf32>
    %60 = arith.addf %57, %59 : vector<256x4xf32>
    %cst_39 = arith.constant 0.000000e+00 : f32
    %61 = vector.broadcast %cst_39 : f32 to vector<256x4xf32>
    %62 = arith.maximumf %60, %61 : vector<256x4xf32>
    %63 = arith.truncf %62 : vector<256x4xf32> to vector<256x4xbf16>
    %c0_40 = arith.constant 0 : index
    %c0_41 = arith.constant 0 : index
    %64 = vector.load %arg6[%c0_40, %c0_41] : memref<4x16xbf16, #tpu.memory_space<vmem>>, vector<4x16xbf16>
    %cst_42 = arith.constant dense<0.000000e+00> : vector<256x16xf32>
    %65 = tpu.matmul %63, %64, %cst_42 {dimension_numbers = #tpu.dot_dimension_numbers<[1], [0], [0], [1], [0, 0, 1, 1], [], []>} : vector<256x4xbf16>, vector<4x16xbf16>, vector<256x16xf32> -> vector<256x16xf32>
    %c0_43 = arith.constant 0 : index
    %c0_44 = arith.constant 0 : index
    %66 = vector.load %arg7[%c0_43, %c0_44] : memref<1x16xf32, #tpu.memory_space<vmem>>, vector<1x16xf32>
    %67 = vector.broadcast %66 : vector<1x16xf32> to vector<256x16xf32>
    %68 = arith.addf %65, %67 : vector<256x16xf32>
    %c0_45 = arith.constant 0 : index
    %c0_46 = arith.constant 0 : index
    %69 = vector.load %arg8[%c0_45, %c0_46] : memref<4x16xbf16, #tpu.memory_space<vmem>>, vector<4x16xbf16>
    %cst_47 = arith.constant dense<0.000000e+00> : vector<256x16xf32>
    %70 = tpu.matmul %1, %69, %cst_47 {dimension_numbers = #tpu.dot_dimension_numbers<[1], [0], [0], [1], [0, 0, 1, 1], [], []>} : vector<256x4xbf16>, vector<4x16xbf16>, vector<256x16xf32> -> vector<256x16xf32>
    %c0_48 = arith.constant 0 : index
    %c0_49 = arith.constant 0 : index
    %71 = vector.load %arg9[%c0_48, %c0_49] : memref<1x16xf32, #tpu.memory_space<vmem>>, vector<1x16xf32>
    %72 = vector.broadcast %71 : vector<1x16xf32> to vector<256x16xf32>
    %73 = arith.addf %70, %72 : vector<256x16xf32>
    %74 = arith.addf %68, %73 : vector<256x16xf32>
    %cst_50 = arith.constant 0.000000e+00 : f32
    %75 = vector.broadcast %cst_50 : f32 to vector<256x16xf32>
    %76 = arith.maximumf %74, %75 : vector<256x16xf32>
    %c0_51 = arith.constant 0 : index
    %c0_52 = arith.constant 0 : index
    %c0_53 = arith.constant 0 : index
    %77 = vector.load %arg10[%c0_51, %c0_52, %c0_53] : memref<1x256x16xf32, #tpu.memory_space<vmem>>, vector<1x256x16xf32>
    %78 = vector.shape_cast %77 : vector<1x256x16xf32> to vector<256x16xf32>
    %79 = vector.shape_cast %76 : vector<256x16xf32> to vector<1x256x16xf32>
    tpu.vector_store %arg10[%c0_51, %c0_52, %c0_53], %79 {strides = array<i32>} : memref<1x256x16xf32, #tpu.memory_space<vmem>>, vector<1x256x16xf32>,
    return
  }
  func.func @transform_0(%arg0: i32) -> (i32, i32, i32) {
    %c0_i32 = arith.constant 0 : i32
    %c0_i32_0 = arith.constant 0 : i32
    %c0_i32_1 = arith.constant 0 : i32
    return %arg0, %c0_i32, %c0_i32_0 : i32, i32, i32
  }
  func.func @transform_1(%arg0: i32) -> (i32, i32) {
    %c0_i32 = arith.constant 0 : i32
    %c0_i32_0 = arith.constant 0 : i32
    %c0_i32_1 = arith.constant 0 : i32
    return %c0_i32, %c0_i32_0 : i32, i32
  }
  func.func @transform_2(%arg0: i32) -> (i32, i32) {
    %c0_i32 = arith.constant 0 : i32
    %c0_i32_0 = arith.constant 0 : i32
    %c0_i32_1 = arith.constant 0 : i32
    return %c0_i32, %c0_i32_0 : i32, i32
  }
  func.func @transform_3(%arg0: i32) -> (i32, i32, i32) {
    %c0_i32 = arith.constant 0 : i32
    %c0_i32_0 = arith.constant 0 : i32
    %c0_i32_1 = arith.constant 0 : i32
    %c0_i32_2 = arith.constant 0 : i32
    return %c0_i32, %c0_i32_0, %c0_i32_1 : i32, i32, i32
  }
  func.func @transform_4(%arg0: i32) -> (i32, i32) {
    %c0_i32 = arith.constant 0 : i32
    %c0_i32_0 = arith.constant 0 : i32
    %c0_i32_1 = arith.constant 0 : i32
    return %c0_i32, %c0_i32_0 : i32, i32
  }
  func.func @transform_5(%arg0: i32) -> (i32, i32) {
    %c0_i32 = arith.constant 0 : i32
    %c0_i32_0 = arith.constant 0 : i32
    %c0_i32_1 = arith.constant 0 : i32
    return %c0_i32, %c0_i32_0 : i32, i32
  }
  func.func @transform_6(%arg0: i32) -> (i32, i32) {
    %c0_i32 = arith.constant 0 : i32
    %c0_i32_0 = arith.constant 0 : i32
    %c0_i32_1 = arith.constant 0 : i32
    return %c0_i32, %c0_i32_0 : i32, i32
  }
  func.func @transform_7(%arg0: i32) -> (i32, i32) {
    %c0_i32 = arith.constant 0 : i32
    %c0_i32_0 = arith.constant 0 : i32
    %c0_i32_1 = arith.constant 0 : i32
    return %c0_i32, %c0_i32_0 : i32, i32
  }
  func.func @transform_8(%arg0: i32) -> (i32, i32) {
    %c0_i32 = arith.constant 0 : i32
    %c0_i32_0 = arith.constant 0 : i32
    %c0_i32_1 = arith.constant 0 : i32
    return %c0_i32, %c0_i32_0 : i32, i32
  }
  func.func @transform_9(%arg0: i32) -> (i32, i32, i32) {
    %c0_i32 = arith.constant 0 : i32
    %c0_i32_0 = arith.constant 0 : i32
    %c0_i32_1 = arith.constant 0 : i32
    return %arg0, %c0_i32, %c0_i32_0 : i32, i32, i32
  }
}

</mosaic_0001>

<bundles_post_ra>
// kernel: tpu_custom_call.1
= control target key start
LH: loop header
LB: loop body
LE: loop exit
PB: predicated region body
PF: predicated region fallthrough
CT: control target
= control target key end

     0   :  { %s6115_s30 = smov 0   ;;  %s7865_s0 = inlined_call_operand.vmem [shape: bf16[2,256,4], index: 0, kind: input, shape index: {}]   ;;  %s7866_s1 = inlined_call_operand.vmem [shape: bf16[4,4], index: 1, kind: input, shape index: {}]   ;;  %s7867_s2 = inlined_call_operand.vmem [shape: f32[1,4], index: 2, kind: input, shape index: {}]   ;;  %s7868_s3 = inlined_call_operand.vmem [shape: bf16[3,12,4], index: 3, kind: input, shape index: {}]   ;;  %s7869_s4 = inlined_call_operand.vmem [shape: f32[1,4], index: 4, kind: input, shape index: {}]   ;;  %s7870_s5 = inlined_call_operand.vmem [shape: bf16[4,16], index: 5, kind: input, shape index: {}]   ;;  %s7871_s6 = inlined_call_operand.vmem [shape: f32[1,16], index: 6, kind: input, shape index: {}]   ;;  %s7872_s7 = inlined_call_operand.vmem [shape: bf16[4,16], index: 7, kind: input, shape index: {}]   ;;  %s7873_s8 = inlined_call_operand.vmem [shape: f32[1,16], index: 8, kind: input, shape index: {}]   ;;  %s7874_s9 = inlined_call_operand.vmem [shape: f32[2,256,16], index: 9, kind: output, shape index: {}]  }
   0x1 LB: > { %s5053_s10 = sadd.s32 4294967295, %s6060_s30   ;;  %p5057_p0 = scmp.ge.s32.totalorder %s6060_s30, 1  ;;  %s6060_s30 = sphi %s6115_s30, %s19_s30  }
   0x2   : > { %p287_p1 = scmp.lt.s32.totalorder %s6060_s30, 3 }
   0x4   : > { %p288_p2 = pnand %p5057_p0, %p287_p1 }
   0x6   : > { %291 = sbr.rel (%p288_p2) target bundleno = 1231 (0x4cf), region = 56 }
   0xd   : > { %v366_v0 = vld [vmem:[%s7866_s1] sm:$0x3]  ;;  %vm503_vm0 = vcmask 1041408   ;;  %p323_p3 = scmp.lt.s32.totalorder %s5053_s10, 1  ;;  %vm454_vm1 = vcmask 31744   ;;  %vm860_vm2 = vcmask 1040384  }
   0xe   : > { %5895 = vmatprep.subr.msk.bf16.mxu0 %vm503_vm0, %v366_v0  ;;  %v505_v1 = vsel %vm503_vm0, %v366_v0, 0  ;;  %v6171_v18 = vld [vmem:[%s7867_s2] ss:$0 sm:$0xff]  ;;  %vm861_vm3 = vsmask.f32 256  ;;  %vm1075_vm5 = vcmask 24576  }
   0xf   : > { %5532 = vmatpush3.bf16.msra.mxu0 %v505_v1  ;;  %s7891_s10 = smov (!%p323_p3, %s5053_s10), 1  ;;  %vm6178_vm4 = vmand %vm860_vm2, %vm861_vm3  ;;  %vm1072_vm6 = vcmask 27648   ;;  %vm1612_vm7 = vcmask 1042432   ;;  %vm1613_vm8 = vcmask 1046532   ;;  %vm1177_vm10 = vsmask.f32 3328 }
  0x10   : > { %s5427_s13 = sshll.u32 %s7891_s10, 7  ;;  %vm6231_vm9 = vmor %vm1612_vm7, %vm1613_vm8  ;;  %vm1178_vm11 = vsmask.f32 7440  ;;  %s6062_s19 = smov 8   ;;  %vm2939_vm13 = vcmask 1045504   ;;  %vm1983_vm14 = vcmask 64512  }
  0x11   : > { %s6134_s16 = scalar_lea.vmem %s7865_s0, %s5427_s13  ;;  %vm6310_vm12 = vmor %vm1177_vm10, %vm1178_vm11  ;;  %s6063_s20 = smov 4   ;;  %vm2906_vm15 = vcmask 97280  }
  0x12   : > { %v5912_v2 = vld [vmem:[%s6134_s16] sm:$0xff]   ;;  %v5913_v3 = vld [vmem:[%s6134_s16 + $0x8] sm:$0xff]   ;;  %v5914_v4 = vld [vmem:[%s6134_s16 + $0x10] sm:$0xff]   ;;  %s5428_s21 = sshll.u32 %s7891_s10, 8 }
  0x13   : > { %5533 = vmatprep.mubr.msk.bf16.mxu0 %vm454_vm1, %v5912_v2  ;;  %v5915_v5 = vld [vmem:[%s6134_s16 + $0x18] sm:$0xff]   ;;  %v5916_v6 = vld [vmem:[%s6134_s16 + $0x20] sm:$0xff]   ;;  %v5917_v7 = vld [vmem:[%s6134_s16 + $0x28] sm:$0xff]   ;;  %s7767_s23 = scalar_lea.vmem %s7874_s9, %s5428_s21 }
  0x14   : > { %5534 = vmatmul.mubr.msk.bf16.vlgmr.msra.gmra.mrb[0].mxu0 %vm454_vm1, %v5913_v3  ;;  %v5918_v8 = vld [vmem:[%s6134_s16 + $0x30] sm:$0xff]   ;;  %v5919_v9 = vld [vmem:[%s6134_s16 + $0x38] sm:$0xff]   ;;  %v5920_v10 = vld [vmem:[%s6134_s16 + $0x40] sm:$0xff]  }
  0x15   : > { %5537 = vmatprep.mubr.msk.bf16.mxu0 %vm454_vm1, %v5914_v4  ;;  %v5921_v11 = vld [vmem:[%s6134_s16 + $0x48] sm:$0xff]   ;;  %v5922_v12 = vld [vmem:[%s6134_s16 + $0x50] sm:$0xff]   ;;  %v5923_v13 = vld [vmem:[%s6134_s16 + $0x58] sm:$0xff]  }
  0x16   : > { %v5924_v14 = vld [vmem:[%s6134_s16 + $0x60] sm:$0xff]   ;;  %v5925_v15 = vld [vmem:[%s6134_s16 + $0x68] sm:$0xff]   ;;  %v5926_v16 = vld [vmem:[%s6134_s16 + $0x70] sm:$0xff]  }
  0x17   : > { %v5927_v17 = vld [vmem:[%s6134_s16 + $0x78] sm:$0xff]  }
  0x1c   : > { %5538 = vmatmul.mubr.msk.bf16.gmra.mrb[4].mxu0 %vm454_vm1, %v5915_v5 }
  0x1d   : > { %5541 = vmatprep.mubr.msk.bf16.mxu0 %vm454_vm1, %v5916_v6 }
  0x24   : > { %5542 = vmatmul.mubr.msk.bf16.gmra.mrb[8].mxu0 %vm454_vm1, %v5917_v7 }
  0x25   : > { %5545 = vmatprep.mubr.msk.bf16.mxu0 %vm454_vm1, %v5918_v8 }
  0x2c   : > { %5546 = vmatmul.mubr.msk.bf16.gmra.mrb[12].mxu0 %vm454_vm1, %v5919_v9 }
  0x2d   : > { %5549 = vmatprep.mubr.msk.bf16.mxu0 %vm454_vm1, %v5920_v10 }
  0x34   : > { %5550 = vmatmul.mubr.msk.bf16.gmra.mrb[16].mxu0 %vm454_vm1, %v5921_v11 }
  0x35   : > { %5553 = vmatprep.mubr.msk.bf16.mxu0 %vm454_vm1, %v5922_v12 }
  0x3c   : > { %5554 = vmatmul.mubr.msk.bf16.gmra.mrb[20].mxu0 %vm454_vm1, %v5923_v13 }
  0x3d   : > { %5557 = vmatprep.mubr.msk.bf16.mxu0 %vm454_vm1, %v5924_v14 }
  0x44   : > { %5558 = vmatmul.mubr.msk.bf16.gmra.mrb[24].mxu0 %vm454_vm1, %v5925_v15 }
  0x45   : > { %5561 = vmatprep.mubr.msk.bf16.mxu0 %vm454_vm1, %v5926_v16 }
  0x4c   : > { %5562 = vmatmul.mubr.msk.bf16.gmra.mrb[28].mxu0 %vm454_vm1, %v5927_v17 }
  0xe7   : > { %v5535_v19 = vpop.f32.mrb[0].mxu0 }
  0xe8   : > { %v550_v20 = vadd.f32 %v5535_v19, %v6171_v18  ;;  %v541_v21 = vpop.f32.mrb[1].mxu0 }
  0xe9   : > { %v542_v22 = vadd.f32 %v6171_v18, %v541_v21  ;;  %v5536_v23 = vpop.f32.mrb[2].mxu0 }
  0xea   : > { %v553_v24 = vadd.f32 %v5536_v23, %v6171_v18  ;;  %v544_v25 = vpop.f32.mrb[3].mxu0  ;;  %v670_v27 = vmax.f32 %v550_v20, 0.0 }
  0xeb   : > { %v545_v26 = vadd.f32 %v6171_v18, %v544_v25  ;;  %v668_v29 = vmax.f32 %v542_v22, 0.0 }
  0xec   : > { %v671_v28 = vmax.f32 %v553_v24, 0.0 }
  0xed   : > { %v669_v30 = vmax.f32 %v545_v26, 0.0 }
  0xee   : > { %v701_v31 = vpack.c.bf16 %v671_v28, %v670_v27 }
  0xef   : > { %v700_v32 = vpack.c.bf16 %v669_v30, %v668_v29  ;;  %v5539_v33 = vpop.f32.mrb[4].mxu0 }
  0xf0   : > { %v724_v34 = vshrl.u32 %v701_v31, 16  ;;  %v566_v35 = vadd.f32 %v5539_v33, %v6171_v18  ;;  %v557_v36 = vpop.f32.mrb[5].mxu0  ;;  %v727_v42 = vshll.u32 %v701_v31, 16 }
  0xf1   : > { %v717_v38 = vshrl.u32 %v700_v32, 16  ;;  %v558_v39 = vadd.f32 %v6171_v18, %v557_v36  ;;  %v5540_v40 = vpop.f32.mrb[6].mxu0  ;;  %v720_v46 = vshll.u32 %v700_v32, 16 }
  0xf2   : > { %v726_v41 = vrot.slane %v724_v34, 7  ;;  %v569_v43 = vadd.f32 %v5540_v40, %v6171_v18  ;;  %v560_v44 = vpop.f32.mrb[7].mxu0  ;;  %v674_v47 = vmax.f32 %v566_v35, 0.0 }
  0xf3   : > { %v719_v45 = vrot.slane %v717_v38, 7  ;;  %v561_v48 = vadd.f32 %v6171_v18, %v560_v44  ;;  %v672_v51 = vmax.f32 %v558_v39, 0.0 }
  0xf4   : > { %v729_v49 = vor.u32 %v727_v42, %v726_v41  ;;  %v880_v50 = vsel %vm6178_vm4, %v726_v41, 0  ;;  %v675_v52 = vmax.f32 %v569_v43, 0.0 }
  0xf5   : > { %v5100_v53 = vcombine.low %v880_v50, %v880_v50  ;;  %v722_v54 = vor.u32 %v720_v46, %v719_v45  ;;  %v879_v55 = vsel %vm6178_vm4, %v719_v45, 0  ;;  %v673_v56 = vmax.f32 %v561_v48, 0.0 }
  0xf6   : > { %v864_v57 = vsel %vm6178_vm4, 0, %v729_v49  ;;  %v5097_v58 = vcombine.low %v879_v55, %v879_v55  ;;  %v703_v59 = vpack.c.bf16 %v675_v52, %v674_v47 }
  0xf7   : > { %v5098_v60 = vcombine.low %v864_v57, %v864_v57  ;;  %v5099_v61 = vcombine.high %v864_v57, %v864_v57  ;;  %1079 = vst.msk [vmem:[#allocation2 + $0x20] sm:$0x1] %vm1075_vm5, %v5100_v53  ;;  %v863_v62 = vsel %vm6178_vm4, 0, %v722_v54  ;;  %v702_v63 = vpack.c.bf16 %v673_v56, %v672_v51  ;;  %v5543_v0 = vpop.f32.mrb[8].mxu0 }
  0xf8   : > { %v5095_v1 = vcombine.low %v863_v62, %v863_v62  ;;  %v5096_v2 = vcombine.high %v863_v62, %v863_v62  ;;  %1076 = vst.msk [vmem:[#allocation2 + $0x14] sm:$0x1] %vm1075_vm5, %v5097_v58  ;;  %v738_v3 = vshrl.u32 %v703_v59, 16  ;;  %v573_v4 = vpop.f32.mrb[9].mxu0  ;;  %v582_v6 = vadd.f32 %v5543_v0, %v6171_v18 }
  0xf9   : > { %1077 = vst.msk [vmem:[#allocation2 + $0x18] sm:$0xf] %vm1072_vm6, %v5098_v60  ;;  %1078 = vst.msk [vmem:[#allocation2 + $0x1c] sm:$0xf] %vm1072_vm6, %v5099_v61  ;;  %v731_v5 = vshrl.u32 %v702_v63, 16  ;;  %v574_v7 = vadd.f32 %v6171_v18, %v573_v4  ;;  %v5544_v8 = vpop.f32.mrb[10].mxu0 }
  0xfa   : > { %1073 = vst.msk [vmem:[#allocation2 + $0xc] sm:$0xf] %vm1072_vm6, %v5095_v1  ;;  %1074 = vst.msk [vmem:[#allocation2 + $0x10] sm:$0xf] %vm1072_vm6, %v5096_v2  ;;  %v740_v9 = vrot.slane %v738_v3, 7  ;;  %v741_v10 = vshll.u32 %v703_v59, 16  ;;  %v585_v11 = vadd.f32 %v5544_v8, %v6171_v18 }
  0xfb   : > { %v576_v12 = vpop.f32.mrb[11].mxu0  ;;  %v733_v13 = vrot.slane %v731_v5, 7  ;;  %v734_v14 = vshll.u32 %v702_v63, 16  ;;  %v678_v15 = vmax.f32 %v582_v6, 0.0  ;;  %v676_v20 = vmax.f32 %v574_v7, 0.0 }
  0xfc   : > { %v577_v16 = vadd.f32 %v6171_v18, %v576_v12  ;;  %v743_v17 = vor.u32 %v741_v10, %v740_v9  ;;  %v882_v19 = vsel %vm6178_vm4, %v740_v9, 0  ;;  %v679_v21 = vmax.f32 %v585_v11, 0.0 }
  0xfd   : > { %v5106_v22 = vcombine.low %v882_v19, %v882_v19  ;;  %v736_v23 = vor.u32 %v734_v14, %v733_v13  ;;  %v881_v24 = vsel %vm6178_vm4, %v733_v13, 0 }
  0xfe   : > { %v677_v25 = vmax.f32 %v577_v16, 0.0  ;;  %v866_v26 = vsel %vm6178_vm4, 0, %v743_v17  ;;  %v5103_v27 = vcombine.low %v881_v24, %v881_v24  ;;  %v705_v28 = vpack.c.bf16 %v679_v21, %v678_v15 }
  0xff   : > { %v5104_v29 = vcombine.low %v866_v26, %v866_v26  ;;  %v5105_v30 = vcombine.high %v866_v26, %v866_v26  ;;  %1085 = vst.msk [vmem:[#allocation2 + $0x38] sm:$0x1] %vm1075_vm5, %v5106_v22  ;;  %v865_v31 = vsel %vm6178_vm4, 0, %v736_v23  ;;  %v5547_v33 = vpop.f32.mrb[12].mxu0  ;;  %v6212_v34 = vld [vmem:[#allocation2 + $0x14] sm:$0x1] }
 0x100   : > { %v704_v32 = vpack.c.bf16 %v677_v25, %v676_v20  ;;  %v5101_v35 = vcombine.low %v865_v31, %v865_v31  ;;  %v5102_v36 = vcombine.high %v865_v31, %v865_v31  ;;  %1082 = vst.msk [vmem:[#allocation2 + $0x2c] sm:$0x1] %vm1075_vm5, %v5103_v27  ;;  %v752_v38 = vshrl.u32 %v705_v28, 16  ;;  %v589_v40 = vpop.f32.mrb[13].mxu0  ;;  %v6247_v11 = vld [vmem:[#allocation2 + $0x18] sm:$0xf] }
 0x101   : > { %v755_v39 = vshll.u32 %v705_v28, 16  ;;  %1083 = vst.msk [vmem:[#allocation2 + $0x30] sm:$0xf] %vm1072_vm6, %v5104_v29  ;;  %1084 = vst.msk [vmem:[#allocation2 + $0x34] sm:$0xf] %vm1072_vm6, %v5105_v30  ;;  %v598_v43 = vadd.f32 %v5547_v33, %v6171_v18  ;;  %v590_v44 = vadd.f32 %v6171_v18, %v589_v40  ;;  %v5548_v45 = vpop.f32.mrb[14].mxu0 }
 0x102   : > { %v745_v41 = vshrl.u32 %v704_v32, 16  ;;  %v748_v42 = vshll.u32 %v704_v32, 16  ;;  %v6219_v46 = vld [vmem:[#allocation2 + $0xc] sm:$0xf]  ;;  %1080 = vst.msk [vmem:[#allocation2 + $0x24] sm:$0xf] %vm1072_vm6, %v5101_v35  ;;  %v601_v48 = vadd.f32 %v5548_v45, %v6171_v18 }
 0x103   : > { %1081 = vst.msk [vmem:[#allocation2 + $0x28] sm:$0xf] %vm1072_vm6, %v5102_v36  ;;  %v754_v47 = vrot.slane %v752_v38, 7  ;;  %v592_v49 = vpop.f32.mrb[15].mxu0  ;;  %v6224_v50 = vld [vmem:[#allocation2 + $0x10] sm:$0xf] }
 0x104   : > { %v5207_v51 = vrot.slane %v6219_v46, 9  ;;  %v2503_v52 = vrot.slane %v6212_v34, 5  ;;  %v747_v53 = vrot.slane %v745_v41, 7  ;;  %v682_v54 = vmax.f32 %v598_v43, 0.0  ;;  %v6263_v38 = vld [vmem:[#allocation2 + $0x1c] sm:$0xf] }
 0x105   : > { %v680_v55 = vmax.f32 %v590_v44, 0.0  ;;  %v593_v56 = vadd.f32 %v6171_v18, %v592_v49  ;;  %v757_v58 = vor.u32 %v755_v39, %v754_v47  ;;  %v884_v59 = vsel %vm6178_vm4, %v754_v47, 0 }
 0x106   : > { %v683_v60 = vmax.f32 %v601_v48, 0.0  ;;  %v2500_v61 = vrot.slane %v6224_v50, 5  ;;  %v5112_v62 = vcombine.low %v884_v59, %v884_v59  ;;  %v750_v63 = vor.u32 %v748_v42, %v747_v53  ;;  %v6269_v48 = vld [vmem:[#allocation2 + $0x20] sm:$0x1] }
 0x107   : > { %v883_v0 = vsel %vm6178_vm4, %v747_v53, 0  ;;  %v681_v1 = vmax.f32 %v593_v56, 0.0  ;;  %v868_v2 = vsel %vm6178_vm4, 0, %v757_v58  ;;  %v5551_v10 = vpop.f32.mrb[16].mxu0  ;;  %v5208_v27 = vrot.slane %v6247_v11, 9 }
 0x108   : > { %v5109_v3 = vcombine.low %v883_v0, %v883_v0  ;;  %v707_v4 = vpack.c.bf16 %v683_v60, %v682_v54  ;;  %v2501_v5 = vsel %vm6231_vm9, %v5207_v51, %v2500_v61  ;;  %v5110_v6 = vcombine.low %v868_v2, %v868_v2  ;;  %1091 = vst.msk [vmem:[#allocation2 + $0x50] sm:$0x1] %vm1075_vm5, %v5112_v62  ;;  %v605_v16 = vpop.f32.mrb[17].mxu0 }
 0x109   : > { %v5111_v7 = vcombine.high %v868_v2, %v868_v2  ;;  %v867_v8 = vsel %vm6178_vm4, 0, %v750_v63  ;;  %v706_v9 = vpack.c.bf16 %v681_v1, %v680_v55  ;;  %v614_v20 = vadd.f32 %v5551_v10, %v6171_v18  ;;  %v5552_v22 = vpop.f32.mrb[18].mxu0 }
 0x10a   : > { %v5107_v12 = vcombine.low %v867_v8, %v867_v8  ;;  %v5108_v13 = vcombine.high %v867_v8, %v867_v8  ;;  %1088 = vst.msk [vmem:[#allocation2 + $0x44] sm:$0x1] %vm1075_vm5, %v5109_v3  ;;  %v766_v14 = vshrl.u32 %v707_v4, 16  ;;  %v769_v15 = vshll.u32 %v707_v4, 16  ;;  %v608_v26 = vpop.f32.mrb[19].mxu0 }
 0x10b   : > { %1089 = vst.msk [vmem:[#allocation2 + $0x48] sm:$0xf] %vm1072_vm6, %v5110_v6  ;;  %1090 = vst.msk [vmem:[#allocation2 + $0x4c] sm:$0xf] %vm1072_vm6, %v5111_v7  ;;  %v759_v17 = vshrl.u32 %v706_v9, 16  ;;  %v762_v19 = vshll.u32 %v706_v9, 16  ;;  %v606_v21 = vadd.f32 %v6171_v18, %v605_v16  ;;  %v617_v24 = vadd.f32 %v5552_v22, %v6171_v18 }
 0x10c   : > { %1086 = vst.msk [vmem:[#allocation2 + $0x3c] sm:$0xf] %vm1072_vm6, %v5107_v12  ;;  %1087 = vst.msk [vmem:[#allocation2 + $0x40] sm:$0xf] %vm1072_vm6, %v5108_v13  ;;  %v768_v23 = vrot.slane %v766_v14, 7  ;;  %v2502_v25 = vrot.slane %v2500_v61, 4  ;;  %v609_v31 = vadd.f32 %v6171_v18, %v608_v26 }
 0x10d   : > { %v761_v28 = vrot.slane %v759_v17, 7  ;;  %v686_v29 = vmax.f32 %v614_v20, 0.0  ;;  %v684_v30 = vmax.f32 %v606_v21, 0.0  ;;  %v687_v35 = vmax.f32 %v617_v24, 0.0 }
 0x10e   : > { %v771_v32 = vor.u32 %v769_v15, %v768_v23  ;;  %v886_v33 = vsel %vm6178_vm4, %v768_v23, 0  ;;  %v2504_v36 = vsel %vm6231_vm9, %v2502_v25, %v2503_v52  ;;  %v685_v47 = vmax.f32 %v609_v31, 0.0 }
 0x10f   : > { %v5118_v39 = vcombine.low %v886_v33, %v886_v33  ;;  %v764_v40 = vor.u32 %v762_v19, %v761_v28  ;;  %v885_v41 = vsel %vm6178_vm4, %v761_v28, 0  ;;  %v5255_v42 = vcombine.low %v2501_v5, %v2504_v36  ;;  %v5555_v54 = vpop.f32.mrb[20].mxu0 }
 0x110   : > { %v870_v43 = vsel %vm6178_vm4, 0, %v771_v32  ;;  %v5115_v44 = vcombine.low %v885_v41, %v885_v41  ;;  %v709_v45 = vpack.c.bf16 %v687_v35, %v686_v29  ;;  %v2507_v53 = vrot.slane %v6263_v38, 5  ;;  %v621_v60 = vpop.f32.mrb[21].mxu0 }
 0x111   : > { %v5116_v49 = vcombine.low %v870_v43, %v870_v43  ;;  %v5117_v51 = vcombine.high %v870_v43, %v870_v43  ;;  %1097 = vst.msk [vmem:[#allocation2 + $0x68] sm:$0x1] %vm1075_vm5, %v5118_v39  ;;  %v869_v52 = vsel %vm6178_vm4, 0, %v764_v40  ;;  %2786 = vrot.lane.b32.xlu1 %v5255_v42, %s6062_s19  ;;  %v708_v61 = vpack.c.bf16 %v685_v47, %v684_v30  ;;  %v5556_v1 = vpop.f32.mrb[22].mxu0 }
 0x112   : > { %v5113_v55 = vcombine.low %v869_v52, %v869_v52  ;;  %v5114_v56 = vcombine.high %v869_v52, %v869_v52  ;;  %1094 = vst.msk [vmem:[#allocation2 + $0x5c] sm:$0x1] %vm1075_vm5, %v5115_v44  ;;  %v780_v58 = vshrl.u32 %v709_v45, 16  ;;  %v783_v59 = vshll.u32 %v709_v45, 16  ;;  %v624_v6 = vpop.f32.mrb[23].mxu0 }
 0x113   : > { %1095 = vst.msk [vmem:[#allocation2 + $0x60] sm:$0xf] %vm1072_vm6, %v5116_v49  ;;  %1096 = vst.msk [vmem:[#allocation2 + $0x64] sm:$0xf] %vm1072_vm6, %v5117_v51  ;;  %v2508_v62 = vsel %vm6231_vm9, %v5208_v27, %v2507_v53  ;;  %v2509_v63 = vrot.slane %v2507_v53, 4  ;;  %v2510_v0 = vrot.slane %v6269_v48, 5  ;;  %v622_v36 = vadd.f32 %v6171_v18, %v621_v60 }
 0x114   : > { %1092 = vst.msk [vmem:[#allocation2 + $0x54] sm:$0xf] %vm1072_vm6, %v5113_v55  ;;  %1093 = vst.msk [vmem:[#allocation2 + $0x58] sm:$0xf] %vm1072_vm6, %v5114_v56  ;;  %v782_v2 = vrot.slane %v780_v58, 7  ;;  %v2067_v3 = vshrl.u32 %v6219_v46, 16  ;;  %v633_v39 = vadd.f32 %v5556_v1, %v6171_v18  ;;  %v625_v1 = vadd.f32 %v6171_v18, %v624_v6 }
 0x115   : > { %v2070_v4 = vshll.u32 %v6219_v46, 16  ;;  %v2076_v5 = vshll.u32 %v6224_v50, 16  ;;  %v773_v7 = vshrl.u32 %v708_v61, 16  ;;  %v776_v8 = vshll.u32 %v708_v61, 16  ;;  %v6331_v58 = vld [vmem:[#allocation2 + $0x30] sm:$0xf] }
 0x116   : > { %v2511_v9 = vsel %vm6231_vm9, %v2509_v63, %v2510_v0  ;;  %v2080_v10 = vshrl.u32 %v6224_v50, 16  ;;  %v785_v12 = vor.u32 %v783_v59, %v782_v2  ;;  %v888_v13 = vsel %vm6178_vm4, %v782_v2, 0  ;;  %v6335_v2 = vld [vmem:[#allocation2 + $0x34] sm:$0xf] }
 0x117   : > { %v5256_v14 = vcombine.low %v2508_v62, %v2511_v9  ;;  %v2069_v15 = vrot.slane %v2067_v3, 4  ;;  %v5124_v16 = vcombine.low %v888_v13, %v888_v13  ;;  %v775_v17 = vrot.slane %v773_v7, 7  ;;  %v6300_v27 = vpop.f32.mrb[24].mxu0 }
 0x118   : > { %v2072_v19 = vrot.slane %v2070_v4, 5  ;;  %v2078_v46 = vrot.slane %v2076_v5, 5  ;;  %v872_v20 = vsel %vm6178_vm4, 0, %v785_v12  ;;  %v2082_v21 = vrot.slane %v2080_v10, 4  ;;  %v6302_v32 = vpop.f32.mrb[25].mxu0 }
 0x119   : > { %2788 = vrot.lane.b32.xlu1 %v5256_v14, %s6062_s19  ;;  %v2086_v22 = vshll.u32 %v6212_v34, 16  ;;  %v630_v50 = vadd.f32 %v5555_v54, %v6171_v18  ;;  %v5122_v23 = vcombine.low %v872_v20, %v872_v20  ;;  %v5123_v24 = vcombine.high %v872_v20, %v872_v20  ;;  %1103 = vst.msk [vmem:[#allocation2 + $0x80] sm:$0x1] %vm1075_vm5, %v5124_v16  ;;  %v6316_v40 = vpop.f32.mrb[26].mxu0 }
 0x11a   : > { %v778_v25 = vor.u32 %v776_v8, %v775_v17  ;;  %v887_v26 = vsel %vm6178_vm4, %v775_v17, 0  ;;  %v2073_v29 = vor.u32 %v2072_v19, %v2069_v15  ;;  %v2083_v30 = vor.u32 %v2082_v21, %v2078_v46  ;;  %v6319_v45 = vpop.f32.mrb[27].mxu0 }
 0x11b   : > { %v5121_v28 = vcombine.low %v887_v26, %v887_v26  ;;  %v2088_v31 = vrot.slane %v2086_v22, 5  ;;  %1101 = vst.msk [vmem:[#allocation2 + $0x78] sm:$0xf] %vm1072_vm6, %v5122_v23  ;;  %1102 = vst.msk [vmem:[#allocation2 + $0x7c] sm:$0xf] %vm1072_vm6, %v5123_v24  ;;  %v690_v35 = vmax.f32 %v630_v50, 0.0 }
 0x11c   : > { %v871_v34 = vsel %vm6178_vm4, 0, %v778_v25  ;;  %v2074_v43 = vrot.slane %v2073_v29, 4  ;;  %v2084_v44 = vrot.slane %v2083_v30, 4  ;;  %v688_v47 = vmax.f32 %v622_v36, 0.0  ;;  %v6354_v24 = vld [vmem:[#allocation2 + $0x38] sm:$0x1] }
 0x11d   : > { %v5119_v41 = vcombine.low %v871_v34, %v871_v34  ;;  %v5120_v42 = vcombine.high %v871_v34, %v871_v34  ;;  %1100 = vst.msk [vmem:[#allocation2 + $0x74] sm:$0x1] %vm1075_vm5, %v5121_v28  ;;  %v691_v49 = vmax.f32 %v633_v39, 0.0  ;;  %v2091_v51 = vshrl.u32 %v6247_v11, 16 }
 0x11e   : > { %v2094_v52 = vshll.u32 %v6247_v11, 16  ;;  %v2079_v53 = vsel %vm6310_vm12, %v2074_v43, %v2078_v46  ;;  %v2089_v54 = vsel %vm6310_vm12, %v2084_v44, %v2088_v31  ;;  %v2100_v55 = vshll.u32 %v6263_v38, 16  ;;  %v6358_v31 = vld [vmem:[#allocation2 + $0x24] sm:$0xf] }
 0x11f   : > { %1098 = vst.msk [vmem:[#allocation2 + $0x6c] sm:$0xf] %vm1072_vm6, %v5119_v41  ;;  %1099 = vst.msk [vmem:[#allocation2 + $0x70] sm:$0xf] %vm1072_vm6, %v5120_v42  ;;  %v2104_v56 = vshrl.u32 %v6263_v38, 16  ;;  %v5239_v59 = vcombine.low %v2079_v53, %v2089_v54  ;;  %v711_v60 = vpack.c.bf16 %v691_v49, %v690_v35  ;;  %v2093_v61 = vrot.slane %v2091_v51, 4 }
 0x120   : > { %v2096_v11 = vrot.slane %v2094_v52, 5  ;;  %v2102_v62 = vrot.slane %v2100_v55, 5  ;;  %v2110_v0 = vshll.u32 %v6269_v48, 16  ;;  %v2139_v5 = vshrl.u32 %v6331_v58, 16  ;;  %v6339_v7 = vpop.f32.mrb[28].mxu0 }
 0x121   : > { %v2106_v63 = vrot.slane %v2104_v56, 4  ;;  %2706 = vrot.lane.b32.xlu0 %v5239_v59, %s6063_s20  ;;  %v794_v3 = vshrl.u32 %v711_v60, 16  ;;  %v797_v4 = vshll.u32 %v711_v60, 16  ;;  %v689_v10 = vmax.f32 %v625_v1, 0.0  ;;  %v6342_v48 = vpop.f32.mrb[29].mxu0 }
 0x122   : > { %v2097_v38 = vor.u32 %v2096_v11, %v2093_v61  ;;  %v2112_v9 = vrot.slane %v2110_v0, 5  ;;  %v2142_v12 = vshll.u32 %v6331_v58, 16  ;;  %v2141_v14 = vrot.slane %v2139_v5, 4  ;;  %v6345_v16 = vpop.f32.mrb[30].mxu0  ;;  %v6362_v41 = vld [vmem:[#allocation2 + $0x28] sm:$0xf] }
 0x123   : > { %v2107_v8 = vor.u32 %v2106_v63, %v2102_v62  ;;  %v796_v6 = vrot.slane %v794_v3, 7  ;;  %v2148_v15 = vshll.u32 %v6335_v2, 16  ;;  %v710_v19 = vpack.c.bf16 %v689_v10, %v688_v47  ;;  %v6348_v21 = vpop.f32.mrb[31].mxu0  ;;  %v2026_v59 = vld [vmem:[#allocation2 + $0x2c] sm:$0x1] }
 0x124   : > { %v2098_v13 = vrot.slane %v2097_v38, 4  ;;  %v2144_v46 = vrot.slane %v2142_v12, 5  ;;  %v2152_v20 = vshrl.u32 %v6335_v2, 16  ;;  %v2158_v47 = vshll.u32 %v6354_v24, 16 }
 0x125   : > { %v2108_v17 = vrot.slane %v2107_v8, 4  ;;  %v799_v22 = vor.u32 %v797_v4, %v796_v6  ;;  %v890_v50 = vsel %vm6178_vm4, %v796_v6, 0  ;;  %v2150_v25 = vrot.slane %v2148_v15, 5 }
 0x126   : > { %v2103_v23 = vsel %vm6310_vm12, %v2098_v13, %v2102_v62  ;;  %v5130_v26 = vcombine.low %v890_v50, %v890_v50  ;;  %v787_v29 = vshrl.u32 %v710_v19, 16  ;;  %v790_v30 = vshll.u32 %v710_v19, 16 }
 0x127   : > { %v2113_v28 = vsel %vm6310_vm12, %v2108_v17, %v2112_v9  ;;  %v874_v34 = vsel %vm6178_vm4, 0, %v799_v22  ;;  %v2145_v36 = vor.u32 %v2144_v46, %v2141_v14  ;;  %v2154_v39 = vrot.slane %v2152_v20, 4 }
 0x128   : > { %v5240_v35 = vcombine.low %v2103_v23, %v2113_v28  ;;  %v5128_v42 = vcombine.low %v874_v34, %v874_v34  ;;  %v5129_v43 = vcombine.high %v874_v34, %v874_v34  ;;  %1109 = vst.msk [vmem:[#allocation2 + $0x98] sm:$0x1] %vm1075_vm5, %v5130_v26  ;;  %v789_v44 = vrot.slane %v787_v29, 7  ;;  %v6400_v29 = vld [vmem:[#allocation2 + $0x48] sm:$0xf] }
 0x129   : > { %v2146_v49 = vrot.slane %v2145_v36, 4  ;;  %v2155_v51 = vor.u32 %v2154_v39, %v2150_v25  ;;  %v2115_v52 = vshrl.u32 %v6358_v31, 16  ;;  %v2118_v53 = vshll.u32 %v6358_v31, 16  ;;  %v6406_v36 = vld [vmem:[#allocation2 + $0x4c] sm:$0xf] }
 0x12a   : > { %2708 = vrot.lane.b32.xlu0 %v5240_v35, %s6063_s20  ;;  %1107 = vst.msk [vmem:[#allocation2 + $0x90] sm:$0xf] %vm1072_vm6, %v5128_v42  ;;  %1108 = vst.msk [vmem:[#allocation2 + $0x94] sm:$0xf] %vm1072_vm6, %v5129_v43  ;;  %v792_v54 = vor.u32 %v790_v30, %v789_v44  ;;  %v889_v55 = vsel %vm6178_vm4, %v789_v44, 0  ;;  %v2160_v56 = vrot.slane %v2158_v47, 5  ;;  %v646_v13 = vadd.f32 %v6300_v27, %v6171_v18 }
 0x12b   : > { %v2124_v60 = vshll.u32 %v6362_v41, 16  ;;  %v5127_v61 = vcombine.low %v889_v55, %v889_v55  ;;  %v2151_v11 = vsel %vm6310_vm12, %v2146_v49, %v2150_v25  ;;  %v2156_v62 = vrot.slane %v2155_v51, 4  ;;  %v6416_v49 = vld [vmem:[#allocation2 + $0x50] sm:$0x1] }
 0x12c   : > { %v2117_v63 = vrot.slane %v2115_v52, 4  ;;  %v873_v0 = vsel %vm6178_vm4, 0, %v792_v54  ;;  %v2120_v1 = vrot.slane %v2118_v53, 5  ;;  %v2128_v4 = vshrl.u32 %v6362_v41, 16 }
 0x12d   : > { %v2126_v3 = vrot.slane %v2124_v60, 5  ;;  %v5125_v38 = vcombine.low %v873_v0, %v873_v0  ;;  %v5126_v5 = vcombine.high %v873_v0, %v873_v0  ;;  %1106 = vst.msk [vmem:[#allocation2 + $0x8c] sm:$0x1] %vm1075_vm5, %v5127_v61  ;;  %v2161_v8 = vsel %vm6310_vm12, %v2156_v62, %v2160_v56  ;;  %v6422_v60 = vld [vmem:[#allocation2 + $0x3c] sm:$0xf] }
 0x12e   : > { %v2134_v9 = vshll.u32 %v2026_v59, 16  ;;  %v5242_v10 = vcombine.low %v2151_v11, %v2161_v8  ;;  %v2121_v12 = vor.u32 %v2120_v1, %v2117_v63  ;;  %v2130_v6 = vrot.slane %v2128_v4, 4 }
 0x12f   : > { %1104 = vst.msk [vmem:[#allocation2 + $0x84] sm:$0xf] %vm1072_vm6, %v5125_v38  ;;  %1105 = vst.msk [vmem:[#allocation2 + $0x88] sm:$0xf] %vm1072_vm6, %v5126_v5  ;;  %v638_v15 = vadd.f32 %v6171_v18, %v6302_v32  ;;  %v5210_v17 = vrot.slane %v6331_v58, 9  ;;  %v2521_v19 = vrot.slane %v6335_v2, 5  ;;  %v649_v26 = vadd.f32 %v6316_v40, %v6171_v18 }
 0x130   : > { %v2136_v14 = vrot.slane %v2134_v9, 5  ;;  %2712 = vrot.lane.b32.xlu1 %v5242_v10, %s6063_s20  ;;  %v2122_v46 = vrot.slane %v2121_v12, 4  ;;  %v2131_v20 = vor.u32 %v2130_v6, %v2126_v3  ;;  %v694_v22 = vmax.f32 %v646_v13, 0.0 }
 0x131   : > { %v2524_v50 = vrot.slane %v6354_v24, 5  ;;  %v692_v27 = vmax.f32 %v638_v15, 0.0  ;;  %v2522_v23 = vsel %vm6231_vm9, %v5210_v17, %v2521_v19  ;;  %v2523_v25 = vrot.slane %v2521_v19, 4  ;;  %v2031_v19 = vld [vmem:[#allocation2 + $0x40] sm:$0xf] }
 0x132   : > { %v2127_v32 = vsel %vm6310_vm12, %v2122_v46, %v2126_v3  ;;  %v2132_v58 = vrot.slane %v2131_v20, 4  ;;  %v5209_v2 = vrot.slane %v6358_v31, 9  ;;  %v2514_v28 = vrot.slane %v6362_v41, 5 }
 0x133   : > { %v2525_v24 = vsel %vm6231_vm9, %v2523_v25, %v2524_v50  ;;  %v695_v30 = vmax.f32 %v649_v26, 0.0  ;;  %v2517_v34 = vrot.slane %v2026_v59, 5  ;;  %v641_v35 = vadd.f32 %v6171_v18, %v6319_v45 }
 0x134   : > { %v2137_v40 = vsel %vm6310_vm12, %v2132_v58, %v2136_v14  ;;  %v5258_v39 = vcombine.low %v2522_v23, %v2525_v24  ;;  %v2515_v31 = vsel %vm6231_vm9, %v5209_v2, %v2514_v28  ;;  %v2516_v41 = vrot.slane %v2514_v28, 4  ;;  %v2032_v58 = vld [vmem:[#allocation2 + $0x44] sm:$0x1] }
 0x135   : > { %v5241_v42 = vcombine.low %v2127_v32, %v2137_v40  ;;  %v713_v43 = vpack.c.bf16 %v695_v30, %v694_v22  ;;  %v693_v44 = vmax.f32 %v641_v35, 0.0  ;;  %v2187_v47 = vshrl.u32 %v6400_v29, 16 }
 0x136   : > { %2792 = vrot.lane.b32.xlu1 %v5258_v39, %s6062_s19  ;;  %v2518_v45 = vsel %vm6231_vm9, %v2516_v41, %v2517_v34  ;;  %v2190_v51 = vshll.u32 %v6400_v29, 16  ;;  %v2196_v52 = vshll.u32 %v6406_v36, 16  ;;  %v2200_v53 = vshrl.u32 %v6406_v36, 16 }
 0x137   : > { %2710 = vrot.lane.b32.xlu0 %v5241_v42, %s6063_s20  ;;  %v808_v54 = vshrl.u32 %v713_v43, 16  ;;  %v811_v55 = vshll.u32 %v713_v43, 16  ;;  %v5257_v56 = vcombine.low %v2515_v31, %v2518_v45  ;;  %v712_v59 = vpack.c.bf16 %v693_v44, %v692_v27 }
 0x138   : > { %v2189_v61 = vrot.slane %v2187_v47, 4  ;;  %v2192_v11 = vrot.slane %v2190_v51, 5  ;;  %v2198_v62 = vrot.slane %v2196_v52, 5  ;;  %v2202_v63 = vrot.slane %v2200_v53, 4 }
 0x139   : > { %v810_v0 = vrot.slane %v808_v54, 7  ;;  %v801_v1 = vshrl.u32 %v712_v59, 16  ;;  %v804_v3 = vshll.u32 %v712_v59, 16  ;;  %v2206_v4 = vshll.u32 %v6416_v49, 16 }
 0x13a   : > { %v2193_v38 = vor.u32 %v2192_v11, %v2189_v61  ;;  %v2203_v5 = vor.u32 %v2202_v63, %v2198_v62  ;;  %v2163_v8 = vshrl.u32 %v6422_v60, 16  ;;  %v2166_v9 = vshll.u32 %v6422_v60, 16 }
 0x13b   : > { %v813_v10 = vor.u32 %v811_v55, %v810_v0  ;;  %v892_v12 = vsel %vm6178_vm4, %v810_v0, 0  ;;  %2790 = vrot.lane.b32.xlu0 %v5257_v56, %s6062_s19  ;;  %v803_v6 = vrot.slane %v801_v1, 7  ;;  %v2208_v13 = vrot.slane %v2206_v4, 5  ;;  %v6456_v55 = vld [vmem:[#allocation2 + $0x60] sm:$0xf] }
 0x13c   : > { %v5136_v14 = vcombine.low %v892_v12, %v892_v12  ;;  %v2194_v15 = vrot.slane %v2193_v38, 4  ;;  %v2204_v17 = vrot.slane %v2203_v5, 4  ;;  %v2165_v46 = vrot.slane %v2163_v8, 4  ;;  %v6467_v1 = vld [vmem:[#allocation2 + $0x64] sm:$0xf] }
 0x13d   : > { %v876_v20 = vsel %vm6178_vm4, 0, %v813_v10  ;;  %v806_v22 = vor.u32 %v804_v3, %v803_v6  ;;  %v891_v50 = vsel %vm6178_vm4, %v803_v6, 0  ;;  %v2168_v27 = vrot.slane %v2166_v9, 5  ;;  %v6474_v9 = vld [vmem:[#allocation2 + $0x68] sm:$0x1] }
 0x13e   : > { %v5134_v23 = vcombine.low %v876_v20, %v876_v20  ;;  %v5135_v25 = vcombine.high %v876_v20, %v876_v20  ;;  %1115 = vst.msk [vmem:[#allocation2 + $0xb0] sm:$0x1] %vm1075_vm5, %v5136_v14  ;;  %v5133_v26 = vcombine.low %v891_v50, %v891_v50  ;;  %v2199_v32 = vsel %vm6310_vm12, %v2194_v15, %v2198_v62 }
 0x13f   : > { %v875_v2 = vsel %vm6178_vm4, 0, %v806_v22  ;;  %v2209_v28 = vsel %vm6310_vm12, %v2204_v17, %v2208_v13  ;;  %v2169_v24 = vor.u32 %v2168_v27, %v2165_v46  ;;  %v2172_v30 = vshll.u32 %v2031_v19, 16  ;;  %v6482_v46 = vld [vmem:[#allocation2 + $0x54] sm:$0xf] }
 0x140   : > { %1113 = vst.msk [vmem:[#allocation2 + $0xa8] sm:$0xf] %vm1072_vm6, %v5134_v23  ;;  %1114 = vst.msk [vmem:[#allocation2 + $0xac] sm:$0xf] %vm1072_vm6, %v5135_v25  ;;  %v5131_v34 = vcombine.low %v875_v2, %v875_v2  ;;  %v5132_v35 = vcombine.high %v875_v2, %v875_v2  ;;  %v5244_v40 = vcombine.low %v2199_v32, %v2209_v28  ;;  %v2176_v39 = vshrl.u32 %v2031_v19, 16 }
 0x141   : > { %1112 = vst.msk [vmem:[#allocation2 + $0xa4] sm:$0x1] %vm1075_vm5, %v5133_v26  ;;  %v2170_v31 = vrot.slane %v2169_v24, 4  ;;  %v2174_v41 = vrot.slane %v2172_v30, 5  ;;  %v2182_v42 = vshll.u32 %v2032_v58, 16  ;;  %v662_v43 = vadd.f32 %v6339_v7, %v6171_v18 }
 0x142   : > { %1110 = vst.msk [vmem:[#allocation2 + $0x9c] sm:$0xf] %vm1072_vm6, %v5131_v34  ;;  %1111 = vst.msk [vmem:[#allocation2 + $0xa0] sm:$0xf] %vm1072_vm6, %v5132_v35  ;;  %2716 = vrot.lane.b32.xlu1 %v5244_v40, %s6063_s20  ;;  %v2178_v44 = vrot.slane %v2176_v39, 4  ;;  %v654_v47 = vadd.f32 %v6171_v18, %v6342_v48  ;;  %v5212_v45 = vrot.slane %v6400_v29, 9  ;;  %v665_v48 = vadd.f32 %v6345_v16, %v6171_v18 }
 0x143   : > { %v2535_v51 = vrot.slane %v6406_v36, 5  ;;  %v2175_v52 = vsel %vm6310_vm12, %v2170_v31, %v2174_v41  ;;  %v2184_v53 = vrot.slane %v2182_v42, 5  ;;  %v698_v54 = vmax.f32 %v662_v43, 0.0  ;;  %v6486_v23 = vld [vmem:[#allocation2 + $0x58] sm:$0xf] }
 0x144   : > { %v2538_v7 = vrot.slane %v6416_v49, 5  ;;  %v2179_v56 = vor.u32 %v2178_v44, %v2174_v41  ;;  %v696_v59 = vmax.f32 %v654_v47, 0.0  ;;  %v5211_v29 = vrot.slane %v6422_v60, 9 }
 0x145   : > { %v2536_v61 = vsel %vm6231_vm9, %v5212_v45, %v2535_v51  ;;  %v2537_v11 = vrot.slane %v2535_v51, 4  ;;  %v2528_v36 = vrot.slane %v2031_v19, 5  ;;  %v2531_v62 = vrot.slane %v2032_v58, 5 }
 0x146   : > { %v2180_v63 = vrot.slane %v2179_v56, 4  ;;  %v657_v49 = vadd.f32 %v6171_v18, %v6348_v21  ;;  %v2235_v3 = vshrl.u32 %v6456_v55, 16  ;;  %v699_v38 = vmax.f32 %v665_v48, 0.0 }
 0x147   : > { %v2539_v0 = vsel %vm6231_vm9, %v2537_v11, %v2538_v7  ;;  %v2529_v16 = vsel %vm6231_vm9, %v5211_v29, %v2528_v36  ;;  %v2530_v5 = vrot.slane %v2528_v36, 4  ;;  %v2238_v12 = vshll.u32 %v6456_v55, 16  ;;  %v2038_v7 = vld [vmem:[#allocation2 + $0x5c] sm:$0x1] }
 0x148   : > { %v5260_v4 = vcombine.low %v2536_v61, %v2539_v0  ;;  %v2185_v60 = vsel %vm6310_vm12, %v2180_v63, %v2184_v53  ;;  %v697_v8 = vmax.f32 %v657_v49, 0.0  ;;  %v2237_v10 = vrot.slane %v2235_v3, 4 }
 0x149   : > { %v5243_v18 = vcombine.low %v2175_v52, %v2185_v60  ;;  %v715_v21 = vpack.c.bf16 %v699_v38, %v698_v54  ;;  %v2532_v6 = vsel %vm6231_vm9, %v2530_v5, %v2531_v62  ;;  %v2244_v13 = vshll.u32 %v6467_v1, 16 }
 0x14a   : > { %2796 = vrot.lane.b32.xlu1 %v5260_v4, %s6062_s19  ;;  %v5259_v14 = vcombine.low %v2529_v16, %v2532_v6  ;;  %v714_v15 = vpack.c.bf16 %v697_v8, %v696_v59  ;;  %v2240_v17 = vrot.slane %v2238_v12, 5  ;;  %v2248_v19 = vshrl.u32 %v6467_v1, 16  ;;  %v6510_v4 = vld [vmem:[#allocation2 + $0x78] sm:$0xf]  ;;  %v6519_v8 = vld [vmem:[#allocation2 + $0x7c] sm:$0xf] }
 0x14b   : > { %2714 = vrot.lane.b32.xlu0 %v5243_v18, %s6063_s20  ;;  %v822_v20 = vshrl.u32 %v715_v21, 16  ;;  %v825_v22 = vshll.u32 %v715_v21, 16  ;;  %v2246_v50 = vrot.slane %v2244_v13, 5  ;;  %v2254_v27 = vshll.u32 %v6474_v9, 16 }
 0x14c   : > { %v815_v25 = vshrl.u32 %v714_v15, 16  ;;  %v818_v26 = vshll.u32 %v714_v15, 16  ;;  %v2241_v32 = vor.u32 %v2240_v17, %v2237_v10  ;;  %v2250_v58 = vrot.slane %v2248_v19, 4  ;;  %v2047_v17 = vld [vmem:[#allocation2 + $0x80] sm:$0x1] }
 0x14d   : > { %v824_v2 = vrot.slane %v822_v20, 7  ;;  %v2256_v28 = vrot.slane %v2254_v27, 5  ;;  %v2211_v24 = vshrl.u32 %v6482_v46, 16  ;;  %v2214_v30 = vshll.u32 %v6482_v46, 16 }
 0x14e   : > { %v817_v34 = vrot.slane %v815_v25, 7  ;;  %v2242_v35 = vrot.slane %v2241_v32, 4  ;;  %v2251_v40 = vor.u32 %v2250_v58, %v2246_v50  ;;  %v2220_v39 = vshll.u32 %v6486_v23, 16 }
 0x14f   : > { %v827_v31 = vor.u32 %v825_v22, %v824_v2  ;;  %v894_v41 = vsel %vm6178_vm4, %v824_v2, 0  ;;  %2794 = vrot.lane.b32.xlu0 %v5259_v14, %s6062_s19  ;;  %v2213_v42 = vrot.slane %v2211_v24, 4  ;;  %v2216_v43 = vrot.slane %v2214_v30, 5 }
 0x150   : > { %v5142_v44 = vcombine.low %v894_v41, %v894_v41  ;;  %v820_v47 = vor.u32 %v818_v26, %v817_v34  ;;  %v893_v45 = vsel %vm6178_vm4, %v817_v34, 0  ;;  %v2247_v51 = vsel %vm6310_vm12, %v2242_v35, %v2246_v50  ;;  %v2044_v35 = vld [vmem:[#allocation2 + $0x74] sm:$0x1] }
 0x151   : > { %v878_v52 = vsel %vm6178_vm4, 0, %v827_v31  ;;  %v5139_v53 = vcombine.low %v893_v45, %v893_v45  ;;  %v2252_v54 = vrot.slane %v2251_v40, 4  ;;  %v2217_v56 = vor.u32 %v2216_v43, %v2213_v42 }
 0x152   : > { %v5140_v59 = vcombine.low %v878_v52, %v878_v52  ;;  %v5141_v61 = vcombine.high %v878_v52, %v878_v52  ;;  %1121 = vst.msk [vmem:[#allocation2 + $0xc8] sm:$0x1] %vm1075_vm5, %v5142_v44  ;;  %v877_v11 = vsel %vm6178_vm4, 0, %v820_v47  ;;  %v2222_v48 = vrot.slane %v2220_v39, 5 }
 0x153   : > { %v5137_v29 = vcombine.low %v877_v11, %v877_v11  ;;  %v5138_v36 = vcombine.high %v877_v11, %v877_v11  ;;  %1118 = vst.msk [vmem:[#allocation2 + $0xbc] sm:$0x1] %vm1075_vm5, %v5139_v53  ;;  %v2257_v62 = vsel %vm6310_vm12, %v2252_v54, %v2256_v28  ;;  %v2218_v63 = vrot.slane %v2217_v56, 4 }
 0x154   : > { %1119 = vst.msk [vmem:[#allocation2 + $0xc0] sm:$0xf] %vm1072_vm6, %v5140_v59  ;;  %1120 = vst.msk [vmem:[#allocation2 + $0xc4] sm:$0xf] %vm1072_vm6, %v5141_v61  ;;  %v5246_v0 = vcombine.low %v2247_v51, %v2257_v62  ;;  %v2224_v49 = vshrl.u32 %v6486_v23, 16  ;;  %v2230_v3 = vshll.u32 %v2038_v7, 16 }
 0x155   : > { %v5214_v37 = vrot.slane %v6456_v55, 9  ;;  %1116 = vst.msk [vmem:[#allocation2 + $0xb4] sm:$0xf] %vm1072_vm6, %v5137_v29  ;;  %1117 = vst.msk [vmem:[#allocation2 + $0xb8] sm:$0xf] %vm1072_vm6, %v5138_v36  ;;  %v2223_v38 = vsel %vm6310_vm12, %v2218_v63, %v2222_v48  ;;  %v2549_v16 = vrot.slane %v6467_v1, 5 }
 0x156   : > { %v2552_v5 = vrot.slane %v6474_v9, 5  ;;  %v5213_v60 = vrot.slane %v6482_v46, 9  ;;  %2720 = vrot.lane.b32.xlu1 %v5246_v0, %s6063_s20  ;;  %v2226_v55 = vrot.slane %v2224_v49, 4  ;;  %v2232_v10 = vrot.slane %v2230_v3, 5  ;;  %v2042_v46 = vld [vmem:[#allocation2 + $0x6c] sm:$0xf] }
 0x157   : > { %v2542_v12 = vrot.slane %v6486_v23, 5  ;;  %v2545_v18 = vrot.slane %v2038_v7, 5  ;;  %v2550_v21 = vsel %vm6231_vm9, %v5214_v37, %v2549_v16  ;;  %v2551_v6 = vrot.slane %v2549_v16, 4  ;;  %v2043_v23 = vld [vmem:[#allocation2 + $0x70] sm:$0xf] }
 0x158   : > { %v2283_v13 = vshrl.u32 %v6510_v4, 16  ;;  %v2286_v1 = vshll.u32 %v6510_v4, 16  ;;  %v2227_v9 = vor.u32 %v2226_v55, %v2222_v48  ;;  %v2292_v19 = vshll.u32 %v6519_v8, 16  ;;  %v6545_v0 = vld [vmem:[#allocation2 + $0x90] sm:$0xf] }
 0x159   : > { %v2543_v14 = vsel %vm6231_vm9, %v5213_v60, %v2542_v12  ;;  %v2544_v15 = vrot.slane %v2542_v12, 4  ;;  %v2553_v20 = vsel %vm6231_vm9, %v2551_v6, %v2552_v5  ;;  %v2296_v27 = vshrl.u32 %v6519_v8, 16  ;;  %v2053_v12 = vld [vmem:[#allocation2 + $0x98] sm:$0x1] }
 0x15a   : > { %v2285_v22 = vrot.slane %v2283_v13, 4  ;;  %v2288_v50 = vrot.slane %v2286_v1, 5  ;;  %v2228_v25 = vrot.slane %v2227_v9, 4  ;;  %v5262_v26 = vcombine.low %v2550_v21, %v2553_v20 }
 0x15b   : > { %v2546_v32 = vsel %vm6231_vm9, %v2544_v15, %v2545_v18  ;;  %v2294_v58 = vrot.slane %v2292_v19, 5  ;;  %v2298_v24 = vrot.slane %v2296_v27, 4  ;;  %v2302_v30 = vshll.u32 %v2047_v17, 16  ;;  %v2049_v15 = vld [vmem:[#allocation2 + $0x88] sm:$0xf] }
 0x15c   : > { %v5261_v2 = vcombine.low %v2543_v14, %v2546_v32  ;;  %v2289_v28 = vor.u32 %v2288_v50, %v2285_v22  ;;  %v2233_v34 = vsel %vm6310_vm12, %v2228_v25, %v2232_v10  ;;  %2800 = vrot.lane.b32.xlu1 %v5262_v26, %s6062_s19  ;;  %v2259_v40 = vshrl.u32 %v2042_v46, 16  ;;  %v2048_v14 = vld [vmem:[#allocation2 + $0x84] sm:$0xf]  ;;  %v2050_v22 = vld [vmem:[#allocation2 + $0x8c] sm:$0x1] }
 0x15d   : > { %v2262_v39 = vshll.u32 %v2042_v46, 16  ;;  %v2268_v31 = vshll.u32 %v2043_v23, 16  ;;  %v5245_v41 = vcombine.low %v2223_v38, %v2233_v34  ;;  %v2299_v43 = vor.u32 %v2298_v24, %v2294_v58 }
 0x15e   : > { %v2290_v42 = vrot.slane %v2289_v28, 4  ;;  %v2304_v44 = vrot.slane %v2302_v30, 5  ;;  %v2261_v47 = vrot.slane %v2259_v40, 4  ;;  %v2272_v52 = vshrl.u32 %v2043_v23, 16 }
 0x15f   : > { %v2264_v45 = vrot.slane %v2262_v39, 5  ;;  %v2270_v51 = vrot.slane %v2268_v31, 5  ;;  %2718 = vrot.lane.b32.xlu0 %v5245_v41, %s6063_s20  ;;  %v2300_v54 = vrot.slane %v2299_v43, 4  ;;  %v2278_v7 = vshll.u32 %v2044_v35, 16 }
 0x160   : > { %v2295_v53 = vsel %vm6310_vm12, %v2290_v42, %v2294_v58  ;;  %v5216_v56 = vrot.slane %v6510_v4, 9  ;;  %v2274_v61 = vrot.slane %v2272_v52, 4  ;;  %v2563_v11 = vrot.slane %v6519_v8, 5  ;;  %v2052_v4 = vld [vmem:[#allocation2 + $0x94] sm:$0xf] }
 0x161   : > { %v2265_v59 = vor.u32 %v2264_v45, %v2261_v47  ;;  %v2566_v48 = vrot.slane %v2047_v17, 5  ;;  %v2305_v29 = vsel %vm6310_vm12, %v2300_v54, %v2304_v44  ;;  %v2280_v36 = vrot.slane %v2278_v7, 5 }
 0x162   : > { %v5215_v62 = vrot.slane %v2042_v46, 9  ;;  %v2556_v63 = vrot.slane %v2043_v23, 5  ;;  %v5248_v49 = vcombine.low %v2295_v53, %v2305_v29  ;;  %v2275_v37 = vor.u32 %v2274_v61, %v2270_v51  ;;  %v6566_v53 = vld [vmem:[#allocation2 + $0xa8] sm:$0xf]  ;;  %v2058_v61 = vld [vmem:[#allocation2 + $0xac] sm:$0xf] }
 0x163   : > { %v2266_v3 = vrot.slane %v2265_v59, 4  ;;  %v2564_v38 = vsel %vm6231_vm9, %v5216_v56, %v2563_v11  ;;  %2798 = vrot.lane.b32.xlu0 %v5261_v2, %s6062_s19  ;;  %v2565_v16 = vrot.slane %v2563_v11, 4  ;;  %v2559_v8 = vrot.slane %v2044_v35, 5 }
 0x164   : > { %v2557_v5 = vsel %vm6231_vm9, %v5215_v62, %v2556_v63  ;;  %v2558_v60 = vrot.slane %v2556_v63, 4  ;;  %2724 = vrot.lane.b32.xlu1 %v5248_v49, %s6063_s20  ;;  %v2276_v10 = vrot.slane %v2275_v37, 4  ;;  %v2331_v18 = vshrl.u32 %v6545_v0, 16 }
 0x165   : > { %v2271_v55 = vsel %vm6310_vm12, %v2266_v3, %v2270_v51  ;;  %v2334_v21 = vshll.u32 %v6545_v0, 16  ;;  %v2567_v6 = vsel %vm6231_vm9, %v2565_v16, %v2566_v48  ;;  %v2340_v1 = vshll.u32 %v2052_v4, 16 }
 0x166   : > { %v2560_v13 = vsel %vm6231_vm9, %v2558_v60, %v2559_v8  ;;  %v2344_v9 = vshrl.u32 %v2052_v4, 16  ;;  %v2281_v17 = vsel %vm6310_vm12, %v2276_v10, %v2280_v36  ;;  %v5264_v19 = vcombine.low %v2564_v38, %v2567_v6  ;;  %v2059_v38 = vld [vmem:[#allocation2 + $0xb0] sm:$0x1] }
 0x167   : > { %v5263_v46 = vcombine.low %v2557_v5, %v2560_v13  ;;  %v2333_v20 = vrot.slane %v2331_v18, 4  ;;  %v5247_v50 = vcombine.low %v2271_v55, %v2281_v17  ;;  %v2336_v27 = vrot.slane %v2334_v21, 5  ;;  %v2054_v5 = vld [vmem:[#allocation2 + $0x9c] sm:$0xf] }
 0x168   : > { %v2342_v23 = vrot.slane %v2340_v1, 5  ;;  %v2346_v25 = vrot.slane %v2344_v9, 4  ;;  %2804 = vrot.lane.b32.xlu1 %v5264_v19, %s6062_s19  ;;  %v2350_v26 = vshll.u32 %v2053_v12, 16  ;;  %v2307_v32 = vshrl.u32 %v2048_v14, 16 }
 0x169   : > { %v2310_v58 = vshll.u32 %v2048_v14, 16  ;;  %v2316_v2 = vshll.u32 %v2049_v15, 16  ;;  %2722 = vrot.lane.b32.xlu0 %v5247_v50, %s6063_s20  ;;  %v2337_v28 = vor.u32 %v2336_v27, %v2333_v20  ;;  %v2320_v30 = vshrl.u32 %v2049_v15, 16 }
 0x16a   : > { %v2347_v24 = vor.u32 %v2346_v25, %v2342_v23  ;;  %v2326_v34 = vshll.u32 %v2050_v22, 16  ;;  %v2352_v35 = vrot.slane %v2350_v26, 5  ;;  %v2309_v40 = vrot.slane %v2307_v32, 4 }
 0x16b   : > { %v2312_v39 = vrot.slane %v2310_v58, 5  ;;  %v2318_v31 = vrot.slane %v2316_v2, 5  ;;  %v2338_v41 = vrot.slane %v2337_v28, 4  ;;  %v2322_v43 = vrot.slane %v2320_v30, 4 }
 0x16c   : > { %v2348_v42 = vrot.slane %v2347_v24, 4  ;;  %v2328_v44 = vrot.slane %v2326_v34, 5  ;;  %v5218_v45 = vrot.slane %v6545_v0, 9  ;;  %v2577_v51 = vrot.slane %v2052_v4, 5 }
 0x16d   : > { %v2313_v47 = vor.u32 %v2312_v39, %v2309_v40  ;;  %v2580_v52 = vrot.slane %v2053_v12, 5  ;;  %2802 = vrot.lane.b32.xlu0 %v5263_v46, %s6062_s19  ;;  %v2343_v54 = vsel %vm6310_vm12, %v2338_v41, %v2342_v23  ;;  %v2323_v56 = vor.u32 %v2322_v43, %v2318_v31  ;;  %v2055_v12 = vld [vmem:[#allocation2 + $0xa0] sm:$0xf] }
 0x16e   : > { %v2353_v7 = vsel %vm6310_vm12, %v2348_v42, %v2352_v35  ;;  %v5217_v59 = vrot.slane %v2048_v14, 9  ;;  %v2578_v29 = vsel %vm6231_vm9, %v5218_v45, %v2577_v51  ;;  %v2579_v36 = vrot.slane %v2577_v51, 4  ;;  %v2063_v41 = vld [vmem:[#allocation2 + $0xc0] sm:$0xf] }
 0x16f   : > { %v5250_v11 = vcombine.low %v2343_v54, %v2353_v7  ;;  %v2314_v48 = vrot.slane %v2313_v47, 4  ;;  %v2324_v62 = vrot.slane %v2323_v56, 4  ;;  %v2570_v63 = vrot.slane %v2049_v15, 5  ;;  %v2056_v15 = vld [vmem:[#allocation2 + $0xa4] sm:$0x1] }
 0x170   : > { %v2573_v0 = vrot.slane %v2050_v22, 5  ;;  %v2379_v49 = vshrl.u32 %v6566_v53, 16  ;;  %v2581_v37 = vsel %vm6231_vm9, %v2579_v36, %v2580_v52  ;;  %v2382_v4 = vshll.u32 %v6566_v53, 16 }
 0x171   : > { %2728 = vrot.lane.b32.xlu1 %v5250_v11, %s6063_s20  ;;  %v2319_v3 = vsel %vm6310_vm12, %v2314_v48, %v2318_v31  ;;  %v2388_v16 = vshll.u32 %v2058_v61, 16  ;;  %v2329_v60 = vsel %vm6310_vm12, %v2324_v62, %v2328_v44  ;;  %v5266_v8 = vcombine.low %v2578_v29, %v2581_v37 }
 0x172   : > { %v2571_v55 = vsel %vm6231_vm9, %v5217_v59, %v2570_v63  ;;  %v2572_v10 = vrot.slane %v2570_v63, 4  ;;  %v5249_v18 = vcombine.low %v2319_v3, %v2329_v60  ;;  %v2381_v21 = vrot.slane %v2379_v49, 4  ;;  %v2064_v59 = vld [vmem:[#allocation2 + $0xc4] sm:$0xf]  ;;  %v2060_v63 = vld [vmem:[#allocation2 + $0xb4] sm:$0xf] }
 0x173   : > { %v2384_v6 = vrot.slane %v2382_v4, 5  ;;  %v2390_v13 = vrot.slane %v2388_v16, 5  ;;  %v2392_v9 = vshrl.u32 %v2058_v61, 16  ;;  %v2398_v14 = vshll.u32 %v2059_v38, 16  ;;  %v2061_v60 = vld [vmem:[#allocation2 + $0xb8] sm:$0xf] }
 0x174   : > { %v2574_v1 = vsel %vm6231_vm9, %v2572_v10, %v2573_v0  ;;  %v2355_v17 = vshrl.u32 %v2054_v5, 16  ;;  %2726 = vrot.lane.b32.xlu0 %v5249_v18, %s6063_s20  ;;  %v2358_v20 = vshll.u32 %v2054_v5, 16  ;;  %v2364_v22 = vshll.u32 %v2055_v12, 16  ;;  %v2062_v10 = vld [vmem:[#allocation2 + $0xbc] sm:$0x1] }
 0x175   : > { %2808 = vrot.lane.b32.xlu1 %v5266_v8, %s6062_s19  ;;  %v5265_v19 = vcombine.low %v2571_v55, %v2574_v1  ;;  %v2385_v46 = vor.u32 %v2384_v6, %v2381_v21  ;;  %v2394_v50 = vrot.slane %v2392_v9, 4  ;;  %v2400_v27 = vrot.slane %v2398_v14, 5 }
 0x176   : > { %v2357_v23 = vrot.slane %v2355_v17, 4  ;;  %v2368_v25 = vshrl.u32 %v2055_v12, 16  ;;  %v2360_v32 = vrot.slane %v2358_v20, 5  ;;  %v2366_v58 = vrot.slane %v2364_v22, 5 }
 0x177   : > { %v2386_v26 = vrot.slane %v2385_v46, 4  ;;  %v2374_v2 = vshll.u32 %v2056_v15, 16  ;;  %v2395_v28 = vor.u32 %v2394_v50, %v2390_v13  ;;  %v5220_v30 = vrot.slane %v6566_v53, 9 }
 0x178   : > { %v2370_v24 = vrot.slane %v2368_v25, 4  ;;  %v2591_v34 = vrot.slane %v2058_v61, 5  ;;  %2806 = vrot.lane.b32.xlu0 %v5265_v19, %s6062_s19  ;;  %v2361_v40 = vor.u32 %v2360_v32, %v2357_v23  ;;  %v2594_v31 = vrot.slane %v2059_v38, 5  ;;  %v2065_v61 = vld [vmem:[#allocation2 + $0xc8] sm:$0x1] }
 0x179   : > { %v2391_v35 = vsel %vm6310_vm12, %v2386_v26, %v2390_v13  ;;  %v2376_v39 = vrot.slane %v2374_v2, 5  ;;  %v2396_v42 = vrot.slane %v2395_v28, 4  ;;  %v5219_v51 = vrot.slane %v2054_v5, 9 }
 0x17a   : > { %v2371_v43 = vor.u32 %v2370_v24, %v2366_v58  ;;  %v2592_v44 = vsel %vm6231_vm9, %v5220_v30, %v2591_v34  ;;  %v2593_v47 = vrot.slane %v2591_v34, 4  ;;  %v2362_v45 = vrot.slane %v2361_v40, 4 }
 0x17b   : > { %v2584_v52 = vrot.slane %v2055_v12, 5  ;;  %v2587_v53 = vrot.slane %v2056_v15, 5  ;;  %v2401_v54 = vsel %vm6310_vm12, %v2396_v42, %v2400_v27  ;;  %v2427_v11 = vshrl.u32 %v2063_v41, 16  ;;  %v1133_v42 = vld [vmem:[#allocation2 + $0x10] sm:$0xf] }
 0x17c   : > { %v2372_v7 = vrot.slane %v2371_v43, 4  ;;  %v2595_v56 = vsel %vm6231_vm9, %v2593_v47, %v2594_v31  ;;  %v5252_v48 = vcombine.low %v2391_v35, %v2401_v54  ;;  %v2367_v29 = vsel %vm6310_vm12, %v2362_v45, %v2366_v58 }
 0x17d   : > { %v5268_v36 = vcombine.low %v2592_v44, %v2595_v56  ;;  %v2585_v62 = vsel %vm6231_vm9, %v5219_v51, %v2584_v52  ;;  %v2586_v49 = vrot.slane %v2584_v52, 4  ;;  %v2429_v3 = vrot.slane %v2427_v11, 4  ;;  %v1134_v51 = vld [vmem:[#allocation2 + $0x14] sm:$0x1] }
 0x17e   : > { %v2377_v0 = vsel %vm6310_vm12, %v2372_v7, %v2376_v39  ;;  %v2430_v37 = vshll.u32 %v2063_v41, 16  ;;  %2732 = vrot.lane.b32.xlu1 %v5252_v48, %s6063_s20  ;;  %v2436_v4 = vshll.u32 %v2064_v59, 16  ;;  %v2440_v16 = vshrl.u32 %v2064_v59, 16 }
 0x17f   : > { %v5251_v38 = vcombine.low %v2367_v29, %v2377_v0  ;;  %v2446_v5 = vshll.u32 %v2065_v61, 16  ;;  %v2588_v8 = vsel %vm6231_vm9, %v2586_v49, %v2587_v53  ;;  %v2403_v12 = vshrl.u32 %v2060_v63, 16 }
 0x180   : > { %v2432_v55 = vrot.slane %v2430_v37, 5  ;;  %v2406_v18 = vshll.u32 %v2060_v63, 16  ;;  %v5267_v21 = vcombine.low %v2585_v62, %v2588_v8  ;;  %v2438_v6 = vrot.slane %v2436_v4, 5  ;;  %v6629_v62 = vld [vmem:[#allocation2 + $0x24] sm:$0xf] }
 0x181   : > { %2730 = vrot.lane.b32.xlu0 %v5251_v38, %s6063_s20  ;;  %v2442_v13 = vrot.slane %v2440_v16, 4  ;;  %v2448_v1 = vrot.slane %v2446_v5, 5  ;;  %v2405_v14 = vrot.slane %v2403_v12, 4  ;;  %v2412_v17 = vshll.u32 %v2061_v60, 16  ;;  %v6637_v38 = vld [vmem:[#allocation2 + $0x28] sm:$0xf] }
 0x182   : > { %v2433_v9 = vor.u32 %v2432_v55, %v2429_v3  ;;  %v2408_v15 = vrot.slane %v2406_v18, 5  ;;  %2812 = vrot.lane.b32.xlu1 %v5268_v36, %s6062_s19  ;;  %v2416_v46 = vshrl.u32 %v2061_v60, 16  ;;  %v2422_v20 = vshll.u32 %v2062_v10, 16  ;;  %v6642_v18 = vld [vmem:[#allocation2 + $0x18] sm:$0xf] }
 0x183   : > { %v2443_v19 = vor.u32 %v2442_v13, %v2438_v6  ;;  %v5222_v22 = vrot.slane %v2063_v41, 9  ;;  %v2414_v23 = vrot.slane %v2412_v17, 5  ;;  %v2605_v25 = vrot.slane %v2064_v59, 5  ;;  %v1132_v41 = vld [vmem:[#allocation2 + $0xc] sm:$0xf] }
 0x184   : > { %v2434_v50 = vrot.slane %v2433_v9, 4  ;;  %v2409_v27 = vor.u32 %v2408_v15, %v2405_v14  ;;  %v2418_v32 = vrot.slane %v2416_v46, 4  ;;  %v2424_v58 = vrot.slane %v2422_v20, 5 }
 0x185   : > { %2810 = vrot.lane.b32.xlu0 %v5267_v21, %s6062_s19  ;;  %v2444_v26 = vrot.slane %v2443_v19, 4  ;;  %v2608_v2 = vrot.slane %v2065_v61, 5  ;;  %v2606_v30 = vsel %vm6231_vm9, %v5222_v22, %v2605_v25  ;;  %v2607_v34 = vrot.slane %v2605_v25, 4 }
 0x186   : > { %v2439_v28 = vsel %vm6310_vm12, %v2434_v50, %v2438_v6  ;;  %v2410_v24 = vrot.slane %v2409_v27, 4  ;;  %v2419_v40 = vor.u32 %v2418_v32, %v2414_v23  ;;  %v5221_v39 = vrot.slane %v2060_v63, 9  ;;  %v6644_v6 = vld [vmem:[#allocation2 + $0x2c] sm:$0x1] }
 0x187   : > { %v2449_v35 = vsel %vm6310_vm12, %v2444_v26, %v2448_v1  ;;  %v2598_v31 = vrot.slane %v2061_v60, 5  ;;  %v2609_v47 = vsel %vm6231_vm9, %v2607_v34, %v2608_v2  ;;  %v2601_v45 = vrot.slane %v2062_v10, 5 }
 0x188   : > { %v5254_v43 = vcombine.low %v2439_v28, %v2449_v35  ;;  %v2415_v44 = vsel %vm6310_vm12, %v2410_v24, %v2414_v23  ;;  %v2420_v52 = vrot.slane %v2419_v40, 4  ;;  %v5270_v53 = vcombine.low %v2606_v30, %v2609_v47 }
 0x189   : > { %v2599_v54 = vsel %vm6231_vm9, %v5221_v39, %v2598_v31  ;;  %v2600_v7 = vrot.slane %v2598_v31, 4  ;;  %v1205_v56 = vshrl.u32 %v1132_v41, 16  ;;  %v1208_v59 = vshll.u32 %v1132_v41, 16 }
 0x18a   : > { %2736 = vrot.lane.b32.xlu1 %v5254_v43, %s6063_s20  ;;  %v1214_v61 = vshll.u32 %v1133_v42, 16  ;;  %v1218_v11 = vshrl.u32 %v1133_v42, 16  ;;  %v2425_v48 = vsel %vm6310_vm12, %v2420_v52, %v2424_v58  ;;  %v1224_v36 = vshll.u32 %v1134_v51, 16 }
 0x18b   : > { %v2602_v29 = vsel %vm6231_vm9, %v2600_v7, %v2601_v45  ;;  %v5253_v63 = vcombine.low %v2415_v44, %v2425_v48  ;;  %v1207_v49 = vrot.slane %v1205_v56, 4  ;;  %v1210_v3 = vrot.slane %v1208_v59, 5 }
 0x18c   : > { %v5269_v0 = vcombine.low %v2599_v54, %v2602_v29  ;;  %v6064_v37 = vmov 0   ;;  %v1216_v4 = vrot.slane %v1214_v61, 5  ;;  %v1220_v16 = vrot.slane %v1218_v11, 4  ;;  %v1136_v29 = vld [vmem:[#allocation2 + $0x1c] sm:$0xf] }
 0x18d   : > { %1122 = vst.msk [vmem:[#allocation2] sm:$0xf] %vm1072_vm6, %v6064_v37  ;;  %1123 = vst.msk [vmem:[#allocation2 + $0x4] sm:$0xf] %vm1072_vm6, %v6064_v37  ;;  %v1226_v5 = vrot.slane %v1224_v36, 5  ;;  %v5144_v60 = vrot.slane %v1132_v41, 9  ;;  %2734 = vrot.lane.b32.xlu0 %v5253_v63, %s6063_s20  ;;  %v1211_v8 = vor.u32 %v1210_v3, %v1207_v49 }
 0x18e   : > { %1124 = vst.msk [vmem:[#allocation2 + $0x8] sm:$0x1] %vm1075_vm5, %v6064_v37  ;;  %1128 = vst.msk [vmem:[#allocation2 + $0xd4] sm:$0x1] %vm1075_vm5, %v6064_v37  ;;  %2816 = vrot.lane.b32.xlu1 %v5270_v53, %s6062_s19  ;;  %v1624_v55 = vrot.slane %v1133_v42, 5  ;;  %v1627_v10 = vrot.slane %v1134_v51, 5  ;;  %v1221_v21 = vor.u32 %v1220_v16, %v1216_v4 }
 0x18f   : > { %1126 = vst.msk [vmem:[#allocation2 + $0xcc] sm:$0xf] %vm1072_vm6, %v6064_v37  ;;  %1127 = vst.msk [vmem:[#allocation2 + $0xd0] sm:$0xf] %vm1072_vm6, %v6064_v37  ;;  %v1253_v12 = vshrl.u32 %v6629_v62, 16  ;;  %v1256_v13 = vshll.u32 %v6629_v62, 16 }
 0x190   : > { %v1262_v1 = vshll.u32 %v6637_v38, 16  ;;  %v1266_v9 = vshrl.u32 %v6637_v38, 16  ;;  %v1212_v14 = vrot.slane %v1211_v8, 4  ;;  %v1625_v15 = vsel %vm6231_vm9, %v5144_v60, %v1624_v55 }
 0x191   : > { %v1626_v17 = vrot.slane %v1624_v55, 4  ;;  %v1255_v19 = vrot.slane %v1253_v12, 4  ;;  %v1222_v46 = vrot.slane %v1221_v21, 4  ;;  %v1258_v20 = vrot.slane %v1256_v13, 5  ;;  %2814 = vrot.lane.b32.xlu0 %v5269_v0, %s6062_s19  ;;  %v1137_v0 = vld [vmem:[#allocation2 + $0x20] sm:$0x1] }
 0x192   : > { %v1264_v22 = vrot.slane %v1262_v1, 5  ;;  %v1268_v50 = vrot.slane %v1266_v9, 4  ;;  %v1217_v27 = vsel %vm6310_vm12, %v1212_v14, %v1216_v4  ;;  %v1272_v25 = vshll.u32 %v6644_v6, 16 }
 0x193   : > { %v1628_v23 = vsel %vm6231_vm9, %v1626_v17, %v1627_v10  ;;  %v1229_v26 = vshrl.u32 %v6642_v18, 16  ;;  %v1227_v32 = vsel %vm6310_vm12, %v1222_v46, %v1226_v5  ;;  %v1259_v30 = vor.u32 %v1258_v20, %v1255_v19  ;;  %v1144_v19 = vld [vmem:[#allocation2 + $0x3c] sm:$0xf] }
 0x194   : > { %v1129_v58 = vld [vmem:[#allocation2] sm:$0xf]  ;;  %v1130_v2 = vld [vmem:[#allocation2 + $0x4] sm:$0xf]  ;;  %v5192_v24 = vcombine.low %v1625_v15, %v1628_v23  ;;  %v1269_v34 = vor.u32 %v1268_v50, %v1264_v22  ;;  %v5176_v35 = vcombine.low %v1217_v27, %v1227_v32  ;;  %v1274_v48 = vrot.slane %v1272_v25, 5 }
 0x195   : > { %v1131_v28 = vld [vmem:[#allocation2 + $0x8] sm:$0x1]  ;;  %v1181_v40 = vshrl.u32 %v1129_v58, 16  ;;  %v1184_v39 = vshll.u32 %v1129_v58, 16  ;;  %v1190_v31 = vshll.u32 %v1130_v2, 16  ;;  %v1194_v41 = vshrl.u32 %v1130_v2, 16 }
 0x196   : > { %v1200_v42 = vshll.u32 %v1131_v28, 16  ;;  %v5143_v43 = vrot.slane %v1129_v58, 9  ;;  %v1617_v44 = vrot.slane %v1130_v2, 5  ;;  %1825 = vrot.lane.b32.xlu1 %v5176_v35, %s6063_s20  ;;  %v1620_v52 = vrot.slane %v1131_v28, 5  ;;  %v1145_v27 = vld [vmem:[#allocation2 + $0x40] sm:$0xf] }
 0x197   : > { %v1183_v47 = vrot.slane %v1181_v40, 4  ;;  %v1186_v45 = vrot.slane %v1184_v39, 5  ;;  %v1192_v51 = vrot.slane %v1190_v31, 5  ;;  %v1196_v53 = vrot.slane %v1194_v41, 4  ;;  %v1141_v35 = vld [vmem:[#allocation2 + $0x30] sm:$0xf] }
 0x198   : > { %v1202_v54 = vrot.slane %v1200_v42, 5  ;;  %v1618_v7 = vsel %vm6231_vm9, %v5143_v43, %v1617_v44  ;;  %v1619_v56 = vrot.slane %v1617_v44, 4  ;;  %v1260_v61 = vrot.slane %v1259_v30, 4 }
 0x199   : > { %v1187_v59 = vor.u32 %v1186_v45, %v1183_v47  ;;  %v1270_v11 = vrot.slane %v1269_v34, 4  ;;  %v1197_v36 = vor.u32 %v1196_v53, %v1192_v51  ;;  %v1231_v49 = vrot.slane %v1229_v26, 4  ;;  %v1142_v47 = vld [vmem:[#allocation2 + $0x34] sm:$0xf]  ;;  %v1143_v53 = vld [vmem:[#allocation2 + $0x38] sm:$0x1] }
 0x19a   : > { %v1621_v63 = vsel %vm6231_vm9, %v1619_v56, %v1620_v52  ;;  %v1232_v3 = vshll.u32 %v6642_v18, 16  ;;  %1905 = vrot.lane.b32.xlu1 %v5192_v24, %s6062_s19  ;;  %v1265_v16 = vsel %vm6310_vm12, %v1260_v61, %v1264_v22  ;;  %v1238_v10 = vshll.u32 %v1136_v29, 16  ;;  %v1146_v24 = vld [vmem:[#allocation2 + $0x44] sm:$0x1] }
 0x19b   : > { %v1188_v37 = vrot.slane %v1187_v59, 4  ;;  %v5191_v4 = vcombine.low %v1618_v7, %v1621_v63  ;;  %v1275_v5 = vsel %vm6310_vm12, %v1270_v11, %v1274_v48  ;;  %v1198_v60 = vrot.slane %v1197_v36, 4 }
 0x19c   : > { %v5178_v8 = vcombine.low %v1265_v16, %v1275_v5  ;;  %v1234_v55 = vrot.slane %v1232_v3, 5  ;;  %v1242_v21 = vshrl.u32 %v1136_v29, 16  ;;  %v1248_v13 = vshll.u32 %v1137_v0, 16 }
 0x19d   : > { %v1193_v12 = vsel %vm6310_vm12, %v1188_v37, %v1192_v51  ;;  %v5146_v1 = vrot.slane %v6629_v62, 9  ;;  %v1203_v9 = vsel %vm6310_vm12, %v1198_v60, %v1202_v54  ;;  %v1240_v15 = vrot.slane %v1238_v10, 5 }
 0x19e   : > { %v1235_v14 = vor.u32 %v1234_v55, %v1231_v49  ;;  %v1638_v17 = vrot.slane %v6637_v38, 5  ;;  %v5175_v46 = vcombine.low %v1193_v12, %v1203_v9  ;;  %1829 = vrot.lane.b32.xlu1 %v5178_v8, %s6063_s20  ;;  %v1244_v20 = vrot.slane %v1242_v21, 4 }
 0x19f   : > { %v1250_v22 = vrot.slane %v1248_v13, 5  ;;  %v1641_v50 = vrot.slane %v6644_v6, 5  ;;  %v5145_v26 = vrot.slane %v6642_v18, 9  ;;  %v1631_v38 = vrot.slane %v1136_v29, 5 }
 0x1a0   : > { %v1236_v23 = vrot.slane %v1235_v14, 4  ;;  %v1639_v62 = vsel %vm6231_vm9, %v5146_v1, %v1638_v17  ;;  %v1640_v25 = vrot.slane %v1638_v17, 4  ;;  %1823 = vrot.lane.b32.xlu0 %v5175_v46, %s6063_s20  ;;  %v1245_v32 = vor.u32 %v1244_v20, %v1240_v15  ;;  %v1151_v46 = vld [vmem:[#allocation2 + $0x58] sm:$0xf] }
 0x1a1   : > { %v1634_v58 = vrot.slane %v1137_v0, 5  ;;  %v1301_v2 = vshrl.u32 %v1144_v19, 16  ;;  %v1304_v30 = vshll.u32 %v1144_v19, 16  ;;  %v1310_v34 = vshll.u32 %v1145_v27, 16 }
 0x1a2   : > { %v1241_v28 = vsel %vm6310_vm12, %v1236_v23, %v1240_v15  ;;  %v1642_v6 = vsel %vm6231_vm9, %v1640_v25, %v1641_v50  ;;  %v1246_v40 = vrot.slane %v1245_v32, 4  ;;  %v1632_v18 = vsel %vm6231_vm9, %v5145_v26, %v1631_v38  ;;  %v1152_v23 = vld [vmem:[#allocation2 + $0x5c] sm:$0x1] }
 0x1a3   : > { %v5194_v39 = vcombine.low %v1639_v62, %v1642_v6  ;;  %v1633_v31 = vrot.slane %v1631_v38, 4  ;;  %v1303_v41 = vrot.slane %v1301_v2, 4  ;;  %v1306_v42 = vrot.slane %v1304_v30, 5  ;;  %v1147_v6 = vld [vmem:[#allocation2 + $0x48] sm:$0xf] }
 0x1a4   : > { %v1312_v43 = vrot.slane %v1310_v34, 5  ;;  %v1314_v44 = vshrl.u32 %v1145_v27, 16  ;;  %1903 = vrot.lane.b32.xlu0 %v5191_v4, %s6062_s19  ;;  %v1251_v45 = vsel %vm6310_vm12, %v1246_v40, %v1250_v22  ;;  %v1320_v52 = vshll.u32 %v1146_v24, 16  ;;  %v1148_v40 = vld [vmem:[#allocation2 + $0x4c] sm:$0xf] }
 0x1a5   : > { %1909 = vrot.lane.b32.xlu1 %v5194_v39, %s6062_s19  ;;  %v1635_v51 = vsel %vm6231_vm9, %v1633_v31, %v1634_v58  ;;  %v1277_v54 = vshrl.u32 %v1141_v35, 16  ;;  %v5177_v7 = vcombine.low %v1241_v28, %v1251_v45  ;;  %v1307_v59 = vor.u32 %v1306_v42, %v1303_v41  ;;  %v1149_v42 = vld [vmem:[#allocation2 + $0x50] sm:$0x1] }
 0x1a6   : > { %v5193_v56 = vcombine.low %v1632_v18, %v1635_v51  ;;  %v1316_v61 = vrot.slane %v1314_v44, 4  ;;  %v1322_v11 = vrot.slane %v1320_v52, 5  ;;  %v1280_v29 = vshll.u32 %v1141_v35, 16 }
 0x1a7   : > { %v1279_v48 = vrot.slane %v1277_v54, 4  ;;  %v1286_v36 = vshll.u32 %v1142_v47, 16  ;;  %v1308_v63 = vrot.slane %v1307_v59, 4  ;;  %v1290_v49 = vshrl.u32 %v1142_v47, 16 }
 0x1a8   : > { %v1317_v0 = vor.u32 %v1316_v61, %v1312_v43  ;;  %v1296_v3 = vshll.u32 %v1143_v53, 16  ;;  %1827 = vrot.lane.b32.xlu0 %v5177_v7, %s6063_s20  ;;  %v1282_v37 = vrot.slane %v1280_v29, 5  ;;  %v5148_v16 = vrot.slane %v1144_v19, 9  ;;  %v1150_v19 = vld [vmem:[#allocation2 + $0x54] sm:$0xf] }
 0x1a9   : > { %v1288_v4 = vrot.slane %v1286_v36, 5  ;;  %v1652_v5 = vrot.slane %v1145_v27, 5  ;;  %v1313_v60 = vsel %vm6310_vm12, %v1308_v63, %v1312_v43  ;;  %v1292_v55 = vrot.slane %v1290_v49, 4 }
 0x1aa   : > { %v1318_v8 = vrot.slane %v1317_v0, 4  ;;  %v1298_v10 = vrot.slane %v1296_v3, 5  ;;  %v1283_v12 = vor.u32 %v1282_v37, %v1279_v48  ;;  %v1655_v1 = vrot.slane %v1146_v24, 5  ;;  %v6716_v37 = vpop.permute.xlu0 %2706 }
 0x1ab   : > { %v1653_v21 = vsel %vm6231_vm9, %v5148_v16, %v1652_v5  ;;  %v1654_v13 = vrot.slane %v1652_v5, 4  ;;  %v1293_v14 = vor.u32 %v1292_v55, %v1288_v4  ;;  %v5147_v15 = vrot.slane %v1141_v35, 9 }
 0x1ac   : > { %v1323_v9 = vsel %vm6310_vm12, %v1318_v8, %v1322_v11  ;;  %v1645_v17 = vrot.slane %v1142_v47, 5  ;;  %1907 = vrot.lane.b32.xlu0 %v5193_v56, %s6062_s19  ;;  %v1284_v22 = vrot.slane %v1283_v12, 4  ;;  %v1648_v27 = vrot.slane %v1143_v53, 5  ;;  %v6721_v8 = vld [vmem:[#allocation2 + $0x6c] sm:$0xf] }
 0x1ad   : > { %v5180_v20 = vcombine.low %v1313_v60, %v1323_v9  ;;  %v1656_v50 = vsel %vm6231_vm9, %v1654_v13, %v1655_v1  ;;  %v1294_v62 = vrot.slane %v1293_v14, 4  ;;  %v1349_v58 = vshrl.u32 %v1150_v19, 16  ;;  %v6727_v13 = vpop.permute.xlu1 %2786 }
 0x1ae   : > { %v5196_v25 = vcombine.low %v1653_v21, %v1656_v50  ;;  %v1646_v26 = vsel %vm6231_vm9, %v5147_v15, %v1645_v17  ;;  %v1647_v32 = vrot.slane %v1645_v17, 4  ;;  %v1289_v38 = vsel %vm6310_vm12, %v1284_v22, %v1288_v4  ;;  %v1157_v17 = vld [vmem:[#allocation2 + $0x70] sm:$0xf]  ;;  %v6733_v22 = vld [vmem:[#allocation2 + $0x74] sm:$0x1] }
 0x1af   : > { %1833 = vrot.lane.b32.xlu1 %v5180_v20, %s6063_s20  ;;  %v1352_v2 = vshll.u32 %v1150_v19, 16  ;;  %v1358_v28 = vshll.u32 %v1151_v46, 16  ;;  %v1299_v24 = vsel %vm6310_vm12, %v1294_v62, %v1298_v10  ;;  %v1362_v34 = vshrl.u32 %v1151_v46, 16 }
 0x1b0   : > { %v1649_v30 = vsel %vm6231_vm9, %v1647_v32, %v1648_v27  ;;  %v1368_v35 = vshll.u32 %v1152_v23, 16  ;;  %v5179_v39 = vcombine.low %v1289_v38, %v1299_v24  ;;  %v1351_v31 = vrot.slane %v1349_v58, 4  ;;  %v1154_v32 = vld [vmem:[#allocation2 + $0x64] sm:$0xf] }
 0x1b1   : > { %v5195_v18 = vcombine.low %v1646_v26, %v1649_v30  ;;  %v1354_v41 = vrot.slane %v1352_v2, 5  ;;  %v1360_v43 = vrot.slane %v1358_v28, 5  ;;  %v1364_v44 = vrot.slane %v1362_v34, 4  ;;  %v1153_v26 = vld [vmem:[#allocation2 + $0x60] sm:$0xf] }
 0x1b2   : > { %v1370_v47 = vrot.slane %v1368_v35, 5  ;;  %v1325_v45 = vshrl.u32 %v1147_v6, 16  ;;  %1831 = vrot.lane.b32.xlu0 %v5179_v39, %s6063_s20  ;;  %v1328_v52 = vshll.u32 %v1147_v6, 16  ;;  %v1334_v53 = vshll.u32 %v1148_v40, 16 }
 0x1b3   : > { %1913 = vrot.lane.b32.xlu1 %v5196_v25, %s6062_s19  ;;  %v1355_v51 = vor.u32 %v1354_v41, %v1351_v31  ;;  %v1338_v54 = vshrl.u32 %v1148_v40, 16  ;;  %v1365_v7 = vor.u32 %v1364_v44, %v1360_v43  ;;  %v1344_v59 = vshll.u32 %v1149_v42, 16 }
 0x1b4   : > { %v1327_v56 = vrot.slane %v1325_v45, 4  ;;  %v5150_v61 = vrot.slane %v1150_v19, 9  ;;  %v1330_v48 = vrot.slane %v1328_v52, 5  ;;  %v1336_v29 = vrot.slane %v1334_v53, 5 }
 0x1b5   : > { %v1356_v11 = vrot.slane %v1355_v51, 4  ;;  %v1340_v36 = vrot.slane %v1338_v54, 4  ;;  %v1366_v63 = vrot.slane %v1365_v7, 4  ;;  %v1346_v0 = vrot.slane %v1344_v59, 5 }
 0x1b6   : > { %v1666_v49 = vrot.slane %v1151_v46, 5  ;;  %v1669_v3 = vrot.slane %v1152_v23, 5  ;;  %1911 = vrot.lane.b32.xlu0 %v5195_v18, %s6062_s19  ;;  %v1331_v16 = vor.u32 %v1330_v48, %v1327_v56  ;;  %v5149_v60 = vrot.slane %v1147_v6, 9  ;;  %v6744_v6 = vpop.permute.xlu0 %2708 }
 0x1b7   : > { %v1361_v4 = vsel %vm6310_vm12, %v1356_v11, %v1360_v43  ;;  %v1341_v5 = vor.u32 %v1340_v36, %v1336_v29  ;;  %v1371_v55 = vsel %vm6310_vm12, %v1366_v63, %v1370_v47  ;;  %v1659_v21 = vrot.slane %v1148_v40, 5  ;;  %v1155_v40 = vld [vmem:[#allocation2 + $0x68] sm:$0x1]  ;;  %v6754_v63 = vld [vmem:[#allocation2 + $0x84] sm:$0xf] }
 0x1b8   : > { %v1667_v10 = vsel %vm6231_vm9, %v5150_v61, %v1666_v49  ;;  %v1668_v12 = vrot.slane %v1666_v49, 4  ;;  %v5182_v1 = vcombine.low %v1361_v4, %v1371_v55  ;;  %v1332_v9 = vrot.slane %v1331_v16, 4 }
 0x1b9   : > { %v1342_v14 = vrot.slane %v1341_v5, 4  ;;  %v1662_v15 = vrot.slane %v1149_v42, 5  ;;  %v1660_v46 = vsel %vm6231_vm9, %v5149_v60, %v1659_v21  ;;  %v1661_v20 = vrot.slane %v1659_v21, 4  ;;  %v6748_v42 = vpop.permute.xlu1 %2788 }
 0x1ba   : > { %v1670_v19 = vsel %vm6231_vm9, %v1668_v12, %v1669_v3  ;;  %v1397_v50 = vshrl.u32 %v6721_v8, 16  ;;  %1837 = vrot.lane.b32.xlu1 %v5182_v1, %s6063_s20  ;;  %v1337_v27 = vsel %vm6310_vm12, %v1332_v9, %v1336_v29  ;;  %v1400_v25 = vshll.u32 %v6721_v8, 16  ;;  %v6758_v49 = vpop.permute.xlu0 %2710  ;;  %v1163_v9 = vld [vmem:[#allocation2 + $0x88] sm:$0xf] }
 0x1bb   : > { %v1347_v23 = vsel %vm6310_vm12, %v1342_v14, %v1346_v0  ;;  %v5198_v62 = vcombine.low %v1667_v10, %v1670_v19  ;;  %v1663_v58 = vsel %vm6231_vm9, %v1661_v20, %v1662_v15  ;;  %v1406_v28 = vshll.u32 %v1157_v17, 16  ;;  %v1164_v20 = vld [vmem:[#allocation2 + $0x8c] sm:$0x1] }
 0x1bc   : > { %v5181_v38 = vcombine.low %v1337_v27, %v1347_v23  ;;  %v1399_v2 = vrot.slane %v1397_v50, 4  ;;  %v5197_v24 = vcombine.low %v1660_v46, %v1663_v58  ;;  %v1402_v30 = vrot.slane %v1400_v25, 5  ;;  %v1160_v58 = vld [vmem:[#allocation2 + $0x7c] sm:$0xf] }
 0x1bd   : > { %v1410_v34 = vshrl.u32 %v1157_v17, 16  ;;  %v1416_v35 = vshll.u32 %v6733_v22, 16  ;;  %v1408_v39 = vrot.slane %v1406_v28, 5  ;;  %v1373_v18 = vshrl.u32 %v1153_v26, 16  ;;  %v6756_v0 = vpop.permute.xlu1 %2712 }
 0x1be   : > { %1835 = vrot.lane.b32.xlu0 %v5181_v38, %s6063_s20  ;;  %v1376_v31 = vshll.u32 %v1153_v26, 16  ;;  %v1382_v41 = vshll.u32 %v1154_v32, 16  ;;  %1917 = vrot.lane.b32.xlu1 %v5198_v62, %s6062_s19  ;;  %v1403_v43 = vor.u32 %v1402_v30, %v1399_v2  ;;  %v1386_v45 = vshrl.u32 %v1154_v32, 16  ;;  %v6781_v28 = vpop.permute.xlu0 %2790 }
 0x1bf   : > { %v1412_v44 = vrot.slane %v1410_v34, 4  ;;  %v1418_v47 = vrot.slane %v1416_v35, 5  ;;  %v1375_v51 = vrot.slane %v1373_v18, 4  ;;  %v1392_v54 = vshll.u32 %v1155_v40, 16  ;;  %v6785_v34 = vld [vmem:[#allocation2 + $0x80] sm:$0x1] }
 0x1c0   : > { %v1378_v52 = vrot.slane %v1376_v31, 5  ;;  %v1384_v53 = vrot.slane %v1382_v41, 5  ;;  %v1404_v7 = vrot.slane %v1403_v43, 4  ;;  %v1388_v59 = vrot.slane %v1386_v45, 4 }
 0x1c1   : > { %v1413_v56 = vor.u32 %v1412_v44, %v1408_v39  ;;  %v5152_v61 = vrot.slane %v6721_v8, 9  ;;  %v1394_v48 = vrot.slane %v1392_v54, 5  ;;  %v1680_v29 = vrot.slane %v1157_v17, 5  ;;  %v6779_v2 = vpop.permute.xlu1 %2792 }
 0x1c2   : > { %1915 = vrot.lane.b32.xlu0 %v5197_v24, %s6062_s19  ;;  %v1379_v11 = vor.u32 %v1378_v52, %v1375_v51  ;;  %v1683_v36 = vrot.slane %v6733_v22, 5  ;;  %v1409_v3 = vsel %vm6310_vm12, %v1404_v7, %v1408_v39  ;;  %v1389_v16 = vor.u32 %v1388_v59, %v1384_v53  ;;  %v6773_v22 = vld [vmem:[#allocation2 + $0x78] sm:$0xf] }
 0x1c3   : > { %v1414_v4 = vrot.slane %v1413_v56, 4  ;;  %v5151_v5 = vrot.slane %v1153_v26, 9  ;;  %v1681_v8 = vsel %vm6231_vm9, %v5152_v61, %v1680_v29  ;;  %v1682_v55 = vrot.slane %v1680_v29, 4 }
 0x1c4   : > { %v1380_v60 = vrot.slane %v1379_v11, 4  ;;  %v1673_v10 = vrot.slane %v1154_v32, 5  ;;  %v1390_v21 = vrot.slane %v1389_v16, 4  ;;  %v1676_v1 = vrot.slane %v1155_v40, 5 }
 0x1c5   : > { %v1419_v12 = vsel %vm6310_vm12, %v1414_v4, %v1418_v47  ;;  %v1445_v14 = vshrl.u32 %v6754_v63, 16  ;;  %v1684_v19 = vsel %vm6231_vm9, %v1682_v55, %v1683_v36  ;;  %v1448_v26 = vshll.u32 %v6754_v63, 16  ;;  %v6796_v4 = vpop.permute.xlu0 %2714  ;;  %v6800_v55 = vld [vmem:[#allocation2 + $0x9c] sm:$0xf] }
 0x1c6   : > { %v5184_v15 = vcombine.low %v1409_v3, %v1419_v12  ;;  %v1385_v17 = vsel %vm6310_vm12, %v1380_v60, %v1384_v53  ;;  %v1674_v46 = vsel %vm6231_vm9, %v5151_v5, %v1673_v10  ;;  %v1395_v50 = vsel %vm6310_vm12, %v1390_v21, %v1394_v48  ;;  %v6794_v3 = vpop.permute.xlu1 %2716 }
 0x1c7   : > { %v5200_v27 = vcombine.low %v1681_v8, %v1684_v19  ;;  %v1675_v23 = vrot.slane %v1673_v10, 4  ;;  %v1447_v62 = vrot.slane %v1445_v14, 4  ;;  %v5183_v25 = vcombine.low %v1385_v17, %v1395_v50  ;;  %v6813_v19 = vld [vmem:[#allocation2 + $0xa4] sm:$0x1] }
 0x1c8   : > { %1841 = vrot.lane.b32.xlu1 %v5184_v15, %s6063_s20  ;;  %v1454_v32 = vshll.u32 %v1163_v9, 16  ;;  %v1458_v38 = vshrl.u32 %v1163_v9, 16  ;;  %v1464_v30 = vshll.u32 %v1164_v20, 16  ;;  %v1421_v35 = vshrl.u32 %v6773_v22, 16 }
 0x1c9   : > { %v1677_v24 = vsel %vm6231_vm9, %v1675_v23, %v1676_v1  ;;  %v1424_v40 = vshll.u32 %v6773_v22, 16  ;;  %1839 = vrot.lane.b32.xlu0 %v5183_v25, %s6063_s20  ;;  %v1450_v18 = vrot.slane %v1448_v26, 5  ;;  %v1430_v45 = vshll.u32 %v1160_v58, 16  ;;  %v6807_v1 = vld [vmem:[#allocation2 + $0xa0] sm:$0xf] }
 0x1ca   : > { %v5199_v39 = vcombine.low %v1674_v46, %v1677_v24  ;;  %v1456_v31 = vrot.slane %v1454_v32, 5  ;;  %v1460_v41 = vrot.slane %v1458_v38, 4  ;;  %v1466_v43 = vrot.slane %v1464_v30, 5  ;;  %v6822_v26 = vld [vmem:[#allocation2 + $0x90] sm:$0xf] }
 0x1cb   : > { %v1423_v44 = vrot.slane %v1421_v35, 4  ;;  %v1426_v47 = vrot.slane %v1424_v40, 5  ;;  %v1451_v51 = vor.u32 %v1450_v18, %v1447_v62  ;;  %v1434_v53 = vshrl.u32 %v1160_v58, 16  ;;  %v6828_v30 = vld [vmem:[#allocation2 + $0x94] sm:$0xf]  ;;  %v6832_v35 = vpop.permute.xlu0 %2794 }
 0x1cc   : > { %1921 = vrot.lane.b32.xlu1 %v5200_v27, %s6062_s19  ;;  %v1461_v52 = vor.u32 %v1460_v41, %v1456_v31  ;;  %v1440_v54 = vshll.u32 %v6785_v34, 16  ;;  %v1432_v56 = vrot.slane %v1430_v45, 5  ;;  %v5154_v59 = vrot.slane %v6754_v63, 9  ;;  %v6836_v41 = vld [vmem:[#allocation2 + $0x98] sm:$0x1] }
 0x1cd   : > { %v1427_v7 = vor.u32 %v1426_v47, %v1423_v44  ;;  %v1694_v61 = vrot.slane %v1163_v9, 5  ;;  %1919 = vrot.lane.b32.xlu0 %v5199_v39, %s6062_s19  ;;  %v1452_v11 = vrot.slane %v1451_v51, 4  ;;  %v1436_v29 = vrot.slane %v1434_v53, 4 }
 0x1ce   : > { %v1462_v48 = vrot.slane %v1461_v52, 4  ;;  %v1442_v36 = vrot.slane %v1440_v54, 5  ;;  %v1697_v8 = vrot.slane %v1164_v20, 5  ;;  %v5153_v21 = vrot.slane %v6773_v22, 9 }
 0x1cf   : > { %v1428_v16 = vrot.slane %v1427_v7, 4  ;;  %v1695_v5 = vsel %vm6231_vm9, %v5154_v59, %v1694_v61  ;;  %v1696_v60 = vrot.slane %v1694_v61, 4  ;;  %v1457_v63 = vsel %vm6310_vm12, %v1452_v11, %v1456_v31  ;;  %v5961_v61 = vld [vmem:[#allocation2 + $0xc] sm:$0xf]  ;;  %v5962_v11 = vld [vmem:[#allocation2 + $0x10] sm:$0xf] }
 0x1d0   : > { %v1467_v10 = vsel %vm6310_vm12, %v1462_v48, %v1466_v43  ;;  %v1437_v12 = vor.u32 %v1436_v29, %v1432_v56  ;;  %v1687_v17 = vrot.slane %v1160_v58, 5  ;;  %v1690_v50 = vrot.slane %v6785_v34, 5  ;;  %v6830_v34 = vpop.permute.xlu1 %2796 }
 0x1d1   : > { %v5186_v9 = vcombine.low %v1457_v63, %v1467_v10  ;;  %v1433_v14 = vsel %vm6310_vm12, %v1428_v16, %v1432_v56  ;;  %v1698_v15 = vsel %vm6231_vm9, %v1696_v60, %v1697_v8  ;;  %v1493_v27 = vshrl.u32 %v6800_v55, 16  ;;  %v5928_v60 = vld [vmem:[%s7868_s3 + $0x8] sm:$0x3f]  }
 0x1d2   : > { %v1438_v46 = vrot.slane %v1437_v12, 4  ;;  %v5202_v20 = vcombine.low %v1695_v5, %v1698_v15  ;;  %v1688_v22 = vsel %vm6231_vm9, %v5153_v21, %v1687_v17  ;;  %v1689_v23 = vrot.slane %v1687_v17, 4  ;;  %5896 = vmatprep.subr.msk.bf16.mxu1 %vm2939_vm13, %v5928_v60 }
 0x1d3   : > { %1845 = vrot.lane.b32.xlu1 %v5186_v9, %s6063_s20  ;;  %v1496_v62 = vshll.u32 %v6800_v55, 16  ;;  %v1502_v25 = vshll.u32 %v6807_v1, 16  ;;  %v1495_v38 = vrot.slane %v1493_v27, 4  ;;  %v1506_v58 = vshrl.u32 %v6807_v1, 16  ;;  %v6853_v9 = vpop.permute.xlu0 %2718 }
 0x1d4   : > { %v1443_v32 = vsel %vm6310_vm12, %v1438_v46, %v1442_v36  ;;  %v1512_v24 = vshll.u32 %v6813_v19, 16  ;;  %v1691_v39 = vsel %vm6231_vm9, %v1689_v23, %v1690_v50  ;;  %v1469_v45 = vshrl.u32 %v6822_v26, 16  ;;  %v6851_v21 = vpop.permute.xlu1 %2720  ;;  %v6866_v50 = vld [vmem:[%s7868_s3] sm:$0x3f]  }
 0x1d5   : > { %v5185_v40 = vcombine.low %v1433_v14, %v1443_v32  ;;  %v1498_v18 = vrot.slane %v1496_v62, 5  ;;  %v1504_v31 = vrot.slane %v1502_v25, 5  ;;  %v5201_v43 = vcombine.low %v1688_v22, %v1691_v39  ;;  %v6874_v32 = vld [vmem:[#allocation2 + $0xb4] sm:$0xf] }
 0x1d6   : > { %v1508_v44 = vrot.slane %v1506_v58, 4  ;;  %v1514_v47 = vrot.slane %v1512_v24, 5  ;;  %v1472_v52 = vshll.u32 %v6822_v26, 16  ;;  %v1478_v53 = vshll.u32 %v6828_v30, 16  ;;  %v6881_v24 = vld [vmem:[#allocation2 + $0xb8] sm:$0xf] }
 0x1d7   : > { %1843 = vrot.lane.b32.xlu0 %v5185_v40, %s6063_s20  ;;  %1925 = vrot.lane.b32.xlu1 %v5202_v20, %s6062_s19  ;;  %v1499_v51 = vor.u32 %v1498_v18, %v1495_v38  ;;  %v1482_v54 = vshrl.u32 %v6828_v30, 16  ;;  %v1471_v56 = vrot.slane %v1469_v45, 4  ;;  %v1488_v59 = vshll.u32 %v6836_v41, 16  ;;  %v5963_v45 = vld [vmem:[#allocation2 + $0x18] sm:$0xf] }
 0x1d8   : > { %v1509_v7 = vor.u32 %v1508_v44, %v1504_v31  ;;  %v5223_v48 = vcombine.low %v5961_v61, %v5962_v11  ;;  %v1474_v36 = vrot.slane %v1472_v52, 5  ;;  %v1480_v16 = vrot.slane %v1478_v53, 5  ;;  %v6907_v61 = vld [vmem:[#allocation2 + $0xac] sm:$0xf] }
 0x1d9   : > { %v1500_v29 = vrot.slane %v1499_v51, 4  ;;  %v1484_v5 = vrot.slane %v1482_v54, 4  ;;  %v1490_v63 = vrot.slane %v1488_v59, 5  ;;  %v5156_v12 = vrot.slane %v6800_v55, 9  ;;  %v5964_v51 = vld [vmem:[#allocation2 + $0x1c] sm:$0xf] }
 0x1da   : > { %v1510_v8 = vrot.slane %v1509_v7, 4  ;;  %v2820_v10 = vsel %vm454_vm1, %v5223_v48, %v6716_v37  ;;  %v1475_v15 = vor.u32 %v1474_v36, %v1471_v56  ;;  %v1708_v46 = vrot.slane %v6807_v1, 5  ;;  %v6898_v54 = vld [vmem:[#allocation2 + $0xa8] sm:$0xf] }
 0x1db   : > { %1923 = vrot.lane.b32.xlu0 %v5201_v43, %s6062_s19  ;;  %v1505_v14 = vsel %vm6310_vm12, %v1500_v29, %v1504_v31  ;;  %v1485_v17 = vor.u32 %v1484_v5, %v1480_v16  ;;  %v1711_v37 = vrot.slane %v6813_v19, 5  ;;  %v5155_v55 = vrot.slane %v6822_v26, 9  ;;  %v6887_v31 = vld [vmem:[#allocation2 + $0xbc] sm:$0x1]  ;;  %v6893_v43 = vpop.permute.xlu0 %2798 }
 0x1dc   : > { %v1515_v20 = vsel %vm6310_vm12, %v1510_v8, %v1514_v47  ;;  %v1476_v22 = vrot.slane %v1475_v15, 4  ;;  %v1709_v62 = vsel %vm6231_vm9, %v5156_v12, %v1708_v46  ;;  %v1710_v1 = vrot.slane %v1708_v46, 4 }
 0x1dd   : > { %v5188_v27 = vcombine.low %v1505_v14, %v1515_v20  ;;  %v1486_v23 = vrot.slane %v1485_v17, 4  ;;  %v1701_v25 = vrot.slane %v6828_v30, 5  ;;  %v1704_v19 = vrot.slane %v6836_v41, 5  ;;  %v6891_v41 = vpop.permute.xlu1 %2800 }
 0x1de   : > { %v2941_v26 = vsel %vm2939_vm13, %v5928_v60, 0  ;;  %v1481_v38 = vsel %vm6310_vm12, %v1476_v22, %v1480_v16  ;;  %v1712_v40 = vsel %vm6231_vm9, %v1710_v1, %v1711_v37  ;;  %v2867_v47 = vsel %vm1983_vm14, %v2820_v10, %v6727_v13  ;;  %v6913_v16 = vld [vmem:[#allocation2 + $0xb0] sm:$0x1]  ;;  %v5966_v1 = vld [vmem:[#allocation2 + $0x34] sm:$0xf] }
 0x1df   : > { %1849 = vrot.lane.b32.xlu1 %v5188_v27, %s6063_s20  ;;  %v1491_v58 = vsel %vm6310_vm12, %v1486_v23, %v1490_v63  ;;  %5566 = vmatpush3.bf16.msra.mxu1 %v2941_v26  ;;  %v1702_v39 = vsel %vm6231_vm9, %v5155_v55, %v1701_v25  ;;  %v1703_v18 = vrot.slane %v1701_v25, 4  ;;  %v5204_v44 = vcombine.low %v1709_v62, %v1712_v40  ;;  %v6923_v55 = vpop.permute.xlu0 %2722  ;;  %v5965_v62 = vld [vmem:[#allocation2 + $0x30] sm:$0xf] }
 0x1e0   : > { %v5187_v30 = vcombine.low %v1481_v38, %v1491_v58  ;;  %5897 = vmatprep.subr.msk.bf16.mxu1 %vm2939_vm13, %v6866_v50  ;;  %v5224_v52 = vcombine.low %v5963_v45, %v5964_v51  ;;  %v1541_v53 = vshrl.u32 %v6874_v32, 16  ;;  %5567 = vmatprep.mubr.msk.bf16.mxu1 %vm2906_vm15, %v2867_v47  ;;  %v1544_v56 = vshll.u32 %v6874_v32, 16  ;;  %v5967_v51 = vld [vmem:[#allocation2 + $0x24] sm:$0xf] }
 0x1e1   : > { %v1705_v7 = vsel %vm6231_vm9, %v1703_v18, %v1704_v19  ;;  %v1550_v59 = vshll.u32 %v6881_v24, 16  ;;  %v1554_v13 = vshrl.u32 %v6881_v24, 16  ;;  %v1560_v36 = vshll.u32 %v6887_v31, 16  ;;  %v6921_v37 = vpop.permute.xlu1 %2724  ;;  %v5930_v19 = vld [vmem:[%s7868_s3 + $0x10] sm:$0x3f]  }
 0x1e2   : > { %1847 = vrot.lane.b32.xlu0 %v5187_v30, %s6063_s20  ;;  %v5203_v11 = vcombine.low %v1702_v39, %v1705_v7  ;;  %v2823_v48 = vsel %vm454_vm1, %v5224_v52, %v6744_v6  ;;  %v1543_v29 = vrot.slane %v1541_v53, 4  ;;  %v1546_v5 = vrot.slane %v1544_v56, 5  ;;  %v5968_v52 = vld [vmem:[#allocation2 + $0x28] sm:$0xf] }
 0x1e3   : > { %1929 = vrot.lane.b32.xlu1 %v5204_v44, %s6062_s19  ;;  %v1552_v60 = vrot.slane %v1550_v59, 5  ;;  %v1556_v8 = vrot.slane %v1554_v13, 4  ;;  %v1517_v63 = vshrl.u32 %v6898_v54, 16  ;;  %v1562_v10 = vrot.slane %v1560_v36, 5 }
 0x1e4   : > { %v1520_v12 = vshll.u32 %v6898_v54, 16  ;;  %v1526_v14 = vshll.u32 %v6907_v61, 16  ;;  %v1530_v15 = vshrl.u32 %v6907_v61, 16  ;;  %v1547_v6 = vor.u32 %v1546_v5, %v1543_v29  ;;  %v6947_v29 = vld [vmem:[#allocation2 + $0x24] sm:$0xf] }
 0x1e5   : > { %v1557_v17 = vor.u32 %v1556_v8, %v1552_v60  ;;  %v1519_v46 = vrot.slane %v1517_v63, 4  ;;  %v1536_v20 = vshll.u32 %v6913_v16, 16  ;;  %v5226_v25 = vcombine.low %v5965_v62, %v5966_v1  ;;  %v6949_v36 = vpop.permute.xlu1 %2804  ;;  %v6960_v5 = vld [vmem:[#allocation2 + $0x28] sm:$0xf]  ;;  %v6986_v1 = vld [vmem:[#allocation2 + $0x20] sm:$0x1] }
 0x1e6   : > { %1927 = vrot.lane.b32.xlu0 %v5203_v11, %s6062_s19  ;;  %v1522_v27 = vrot.slane %v1520_v12, 5  ;;  %v1528_v22 = vrot.slane %v1526_v14, 5  ;;  %v1532_v23 = vrot.slane %v1530_v15, 4  ;;  %v1548_v26 = vrot.slane %v1547_v6, 4 }
 0x1e7   : > { %v1558_v38 = vrot.slane %v1557_v17, 4  ;;  %v1538_v58 = vrot.slane %v1536_v20, 5  ;;  %v2869_v30 = vsel %vm1983_vm14, %v2823_v48, %v6748_v42  ;;  %v2829_v18 = vsel %vm454_vm1, %v5226_v25, %v6756_v0  ;;  %v6974_v17 = vld [vmem:[#allocation2 + $0x18] sm:$0xf] }
 0x1e8   : > { %v1523_v40 = vor.u32 %v1522_v27, %v1519_v46  ;;  %v1533_v39 = vor.u32 %v1532_v23, %v1528_v22  ;;  %5568 = vmatmul.mubr.msk.bf16.vlgmr.msra.gmra.mrb[0].mxu1 %vm2906_vm15, %v2869_v30  ;;  %v3142_v44 = vsel %vm2939_vm13, %v6866_v50, 0  ;;  %v1553_v47 = vsel %vm6310_vm12, %v1548_v26, %v1552_v60 }
 0x1e9   : > { %v1563_v45 = vsel %vm6310_vm12, %v1558_v38, %v1562_v10  ;;  %5600 = vmatpush3.bf16.msra.mxu1 %v3142_v44  ;;  %v5225_v42 = vcombine.low %v5967_v51, %v5968_v52  ;;  %v5158_v53 = vrot.slane %v6874_v32, 9  ;;  %v1722_v59 = vrot.slane %v6881_v24, 5  ;;  %v6951_v32 = vpop.permute.xlu0 %2802  ;;  %v6965_v10 = vld [vmem:[#allocation2 + $0x2c] sm:$0x1] }
 0x1ea   : > { %v5190_v7 = vcombine.low %v1553_v47, %v1563_v45  ;;  %v1524_v56 = vrot.slane %v1523_v40, 4  ;;  %v1534_v0 = vrot.slane %v1533_v39, 4  ;;  %5898 = vmatprep.subr.msk.bf16.mxu1 %vm2939_vm13, %v5930_v19  ;;  %v1725_v13 = vrot.slane %v6887_v31, 5 }
 0x1eb   : > { %v2826_v50 = vsel %vm454_vm1, %v5225_v42, %v6758_v49  ;;  %v5157_v11 = vrot.slane %v6898_v54, 9  ;;  %v1715_v48 = vrot.slane %v6907_v61, 5  ;;  %v1723_v31 = vsel %vm6231_vm9, %v5158_v53, %v1722_v59 }
 0x1ec   : > { %1853 = vrot.lane.b32.xlu1 %v5190_v7, %s6063_s20  ;;  %v1529_v24 = vsel %vm6310_vm12, %v1524_v56, %v1528_v22  ;;  %v1539_v49 = vsel %vm6310_vm12, %v1534_v0, %v1538_v58  ;;  %v1724_v54 = vrot.slane %v1722_v59, 4  ;;  %v1718_v63 = vrot.slane %v6913_v16, 5  ;;  %v6981_v22 = vld [vmem:[#allocation2 + $0x1c] sm:$0xf]  ;;  %v6992_v58 = vpop.permute.xlu1 %2728  ;;  %v5969_v56 = vld [vmem:[#allocation2 + $0x48] sm:$0xf] }
 0x1ed   : > { %v5189_v61 = vcombine.low %v1529_v24, %v1539_v49  ;;  %v1716_v60 = vsel %vm6231_vm9, %v5157_v11, %v1715_v48  ;;  %v1717_v8 = vrot.slane %v1715_v48, 4  ;;  %v2873_v14 = vsel %vm1983_vm14, %v2829_v18, %v6779_v2  ;;  %v6994_v30 = vpop.permute.xlu0 %2726  ;;  %v5970_v0 = vld [vmem:[#allocation2 + $0x4c] sm:$0xf]  ;;  %v5971_v48 = vld [vmem:[#allocation2 + $0x3c] sm:$0xf] }
 0x1ee   : > { %v1726_v12 = vsel %vm6231_vm9, %v1724_v54, %v1725_v13  ;;  %v2871_v15 = vsel %vm1983_vm14, %v2826_v50, %v6781_v28  ;;  %v3379_v6 = vshrl.u32 %v6947_v29, 16  ;;  %v3382_v20 = vshll.u32 %v6947_v29, 16  ;;  %v5972_v24 = vld [vmem:[#allocation2 + $0x40] sm:$0xf] }
 0x1ef   : > { %1851 = vrot.lane.b32.xlu0 %v5189_v61, %s6063_s20  ;;  %v5206_v46 = vcombine.low %v1723_v31, %v1726_v12  ;;  %v1719_v16 = vsel %vm6231_vm9, %v1717_v8, %v1718_v63  ;;  %v3388_v27 = vshll.u32 %v6960_v5, 16  ;;  %5571 = vmatprep.mubr.msk.bf16.mxu1 %vm2906_vm15, %v2871_v15  ;;  %v3392_v23 = vshrl.u32 %v6960_v5, 16 }
 0x1f0   : > { %v5205_v2 = vcombine.low %v1716_v60, %v1719_v16  ;;  %v3381_v28 = vrot.slane %v3379_v6, 4  ;;  %v3398_v62 = vshll.u32 %v6965_v10, 16  ;;  %5572 = vmatmul.mubr.msk.bf16.gmra.mrb[4].mxu1 %vm2906_vm15, %v2873_v14  ;;  %v3384_v25 = vrot.slane %v3382_v20, 5  ;;  %v7008_v15 = vpop.permute.xlu1 %2808  ;;  %v7016_v20 = vld [vmem:[#allocation2 + $0x3c] sm:$0xf] }
 0x1f1   : > { %1933 = vrot.lane.b32.xlu1 %v5206_v46, %s6062_s19  ;;  %v3390_v19 = vrot.slane %v3388_v27, 5  ;;  %v3355_v26 = vshrl.u32 %v6974_v17, 16  ;;  %v3358_v38 = vshll.u32 %v6974_v17, 16  ;;  %v3394_v40 = vrot.slane %v3392_v23, 4  ;;  %v7010_v6 = vpop.permute.xlu0 %2806 }
 0x1f2   : > { %v3400_v39 = vrot.slane %v3398_v62, 5  ;;  %v3364_v18 = vshll.u32 %v6981_v22, 16  ;;  %v3368_v44 = vshrl.u32 %v6981_v22, 16  ;;  %v3385_v47 = vor.u32 %v3384_v25, %v3381_v28  ;;  %v7030_v25 = vld [vmem:[#allocation2 + $0x44] sm:$0x1] }
 0x1f3   : > { %1931 = vrot.lane.b32.xlu0 %v5205_v2, %s6062_s19  ;;  %v3357_v45 = vrot.slane %v3355_v26, 4  ;;  %v3360_v51 = vrot.slane %v3358_v38, 5  ;;  %v3374_v52 = vshll.u32 %v6986_v1, 16  ;;  %v3395_v42 = vor.u32 %v3394_v40, %v3390_v19  ;;  %v7038_v40 = vld [vmem:[#allocation2 + $0x30] sm:$0xf] }
 0x1f4   : > { %v3366_v53 = vrot.slane %v3364_v18, 5  ;;  %v3370_v7 = vrot.slane %v3368_v44, 4  ;;  %v5228_v59 = vcombine.low %v5969_v56, %v5970_v0  ;;  %v3386_v50 = vrot.slane %v3385_v47, 4  ;;  %v7055_v56 = vld [vmem:[#allocation2 + $0x38] sm:$0x1] }
 0x1f5   : > { %v3361_v13 = vor.u32 %v3360_v51, %v3357_v45  ;;  %v3376_v11 = vrot.slane %v3374_v52, 5  ;;  %v5227_v49 = vcombine.low %v5971_v48, %v5972_v24  ;;  %v3396_v31 = vrot.slane %v3395_v42, 4  ;;  %v3313_v51 = vld [vmem:[#allocation2 + $0x34] sm:$0xf]  ;;  %v7049_v52 = vpop.permute.xlu1 %2732  ;;  %v7051_v42 = vpop.permute.xlu0 %2730 }
 0x1f6   : > { %v3371_v54 = vor.u32 %v3370_v7, %v3366_v53  ;;  %v2835_v61 = vsel %vm454_vm1, %v5228_v59, %v6794_v3  ;;  %v5308_v60 = vrot.slane %v6947_v29, 9  ;;  %v3391_v8 = vsel %vm6310_vm12, %v3386_v50, %v3390_v19 }
 0x1f7   : > { %v3362_v63 = vrot.slane %v3361_v13, 4  ;;  %v2832_v12 = vsel %vm454_vm1, %v5227_v49, %v6796_v4  ;;  %v3795_v14 = vrot.slane %v6960_v5, 5  ;;  %v3401_v46 = vsel %vm6310_vm12, %v3396_v31, %v3400_v39 }
 0x1f8   : > { %v3372_v16 = vrot.slane %v3371_v54, 4  ;;  %v3798_v3 = vrot.slane %v6965_v10, 5  ;;  %v5307_v29 = vrot.slane %v6974_v17, 9  ;;  %v5340_v27 = vcombine.low %v3391_v8, %v3401_v46  ;;  %v7028_v17 = vld [vmem:[#allocation2 + $0x40] sm:$0xf] }
 0x1f9   : > { %v3367_v4 = vsel %vm6310_vm12, %v3362_v63, %v3366_v53  ;;  %v3796_v5 = vsel %vm6231_vm9, %v5308_v60, %v3795_v14  ;;  %v3797_v2 = vrot.slane %v3795_v14, 4  ;;  %v3788_v23 = vrot.slane %v6981_v22, 5  ;;  %v5973_v63 = vld [vmem:[#allocation2 + $0x60] sm:$0xf] }
 0x1fa   : > { %v3377_v28 = vsel %vm6310_vm12, %v3372_v16, %v3376_v11  ;;  %v3791_v62 = vrot.slane %v6986_v1, 5  ;;  %v2877_v10 = vsel %vm1983_vm14, %v2835_v61, %v6830_v34  ;;  %3996 = vrot.lane.b32.xlu1 %v5340_v27, %s6063_s20  ;;  %v2875_v38 = vsel %vm1983_vm14, %v2832_v12, %v6832_v35  ;;  %v5974_v12 = vld [vmem:[#allocation2 + $0x64] sm:$0xf]  ;;  %v5976_v27 = vld [vmem:[#allocation2 + $0x58] sm:$0xf] }
 0x1fb   : > { %v5339_v19 = vcombine.low %v3367_v4, %v3377_v28  ;;  %v3799_v26 = vsel %vm6231_vm9, %v3797_v2, %v3798_v3  ;;  %v3427_v22 = vshrl.u32 %v7016_v20, 16  ;;  %v3789_v34 = vsel %vm6231_vm9, %v5307_v29, %v3788_v23  ;;  %5575 = vmatprep.mubr.msk.bf16.mxu1 %vm2906_vm15, %v2875_v38  ;;  %v5975_v29 = vld [vmem:[#allocation2 + $0x54] sm:$0xf] }
 0x1fc   : > { %v5356_v1 = vcombine.low %v3796_v5, %v3799_v26  ;;  %v3790_v39 = vrot.slane %v3788_v23, 4  ;;  %v3430_v18 = vshll.u32 %v7016_v20, 16  ;;  %v3436_v47 = vshll.u32 %v7028_v17, 16  ;;  %5576 = vmatmul.mubr.msk.bf16.gmra.mrb[8].mxu1 %vm2906_vm15, %v2877_v10  ;;  %v7066_v10 = vpop.permute.xlu0 %2810 }
 0x1fd   : > { %3994 = vrot.lane.b32.xlu0 %v5339_v19, %s6063_s20  ;;  %v3429_v44 = vrot.slane %v3427_v22, 4  ;;  %v3440_v35 = vshrl.u32 %v7028_v17, 16  ;;  %v3446_v45 = vshll.u32 %v7030_v25, 16  ;;  %v3403_v0 = vshrl.u32 %v7038_v40, 16 }
 0x1fe   : > { %v3792_v53 = vsel %vm6231_vm9, %v3790_v39, %v3791_v62  ;;  %v3432_v7 = vrot.slane %v3430_v18, 5  ;;  %v3406_v59 = vshll.u32 %v7038_v40, 16  ;;  %4076 = vrot.lane.b32.xlu1 %v5356_v1, %s6062_s19  ;;  %v3438_v13 = vrot.slane %v3436_v47, 5  ;;  %v7064_v62 = vpop.permute.xlu1 %2812 }
 0x1ff   : > { %v5355_v50 = vcombine.low %v3789_v34, %v3792_v53  ;;  %v3442_v11 = vrot.slane %v3440_v35, 4  ;;  %v3448_v48 = vrot.slane %v3446_v45, 5  ;;  %v3405_v49 = vrot.slane %v3403_v0, 4  ;;  %v7080_v45 = vld [vmem:[#allocation2 + $0x54] sm:$0xf] }
 0x200   : > { %v3433_v24 = vor.u32 %v3432_v7, %v3429_v44  ;;  %v3408_v31 = vrot.slane %v3406_v59, 5  ;;  %v3412_v54 = vshll.u32 %v3313_v51, 16  ;;  %v3416_v60 = vshrl.u32 %v3313_v51, 16  ;;  %v7085_v0 = vld [vmem:[#allocation2 + $0x58] sm:$0xf] }
 0x201   : > { %4074 = vrot.lane.b32.xlu0 %v5355_v50, %s6062_s19  ;;  %v3443_v61 = vor.u32 %v3442_v11, %v3438_v13  ;;  %v3422_v8 = vshll.u32 %v7055_v56, 16  ;;  %v5230_v14 = vcombine.low %v5973_v63, %v5974_v12  ;;  %v5229_v4 = vcombine.low %v5975_v29, %v5976_v27  ;;  %v7098_v50 = vld [vmem:[#allocation2 + $0x5c] sm:$0x1] }
 0x202   : > { %v3434_v46 = vrot.slane %v3433_v24, 4  ;;  %v3409_v16 = vor.u32 %v3408_v31, %v3405_v49  ;;  %v3414_v3 = vrot.slane %v3412_v54, 5  ;;  %v3418_v2 = vrot.slane %v3416_v60, 4  ;;  %v7107_v24 = vpop.permute.xlu0 %2734 }
 0x203   : > { %v3444_v5 = vrot.slane %v3443_v61, 4  ;;  %v3424_v28 = vrot.slane %v3422_v8, 5  ;;  %v2841_v23 = vsel %vm454_vm1, %v5230_v14, %v6851_v21  ;;  %v2838_v38 = vsel %vm454_vm1, %v5229_v4, %v6853_v9  ;;  %v7112_v61 = vld [vmem:[#allocation2 + $0x4c] sm:$0xf]  ;;  %v7116_v14 = vld [vmem:[#allocation2 + $0x50] sm:$0x1] }
 0x204   : > { %v3439_v19 = vsel %vm6310_vm12, %v3434_v46, %v3438_v13  ;;  %v3410_v26 = vrot.slane %v3409_v16, 4  ;;  %v5310_v22 = vrot.slane %v7016_v20, 9  ;;  %v3419_v34 = vor.u32 %v3418_v2, %v3414_v3 }
 0x205   : > { %v3449_v1 = vsel %vm6310_vm12, %v3444_v5, %v3448_v48  ;;  %v3809_v39 = vrot.slane %v7028_v17, 5  ;;  %v3812_v21 = vrot.slane %v7030_v25, 5  ;;  %v5309_v47 = vrot.slane %v7038_v40, 9  ;;  %v7102_v48 = vld [vmem:[#allocation2 + $0x48] sm:$0xf] }
 0x206   : > { %v5342_v18 = vcombine.low %v3439_v19, %v3449_v1  ;;  %v3415_v44 = vsel %vm6310_vm12, %v3410_v26, %v3414_v3  ;;  %v3802_v35 = vrot.slane %v3313_v51, 5  ;;  %v3420_v9 = vrot.slane %v3419_v34, 4 }
 0x207   : > { %v3810_v20 = vsel %vm6231_vm9, %v5310_v22, %v3809_v39  ;;  %v3811_v53 = vrot.slane %v3809_v39, 4  ;;  %v3805_v7 = vrot.slane %v7055_v56, 5  ;;  %v2881_v40 = vsel %vm1983_vm14, %v2841_v23, %v6891_v41  ;;  %v7105_v41 = vpop.permute.xlu1 %2736 }
 0x208   : > { %4000 = vrot.lane.b32.xlu1 %v5342_v18, %s6063_s20  ;;  %v3803_v17 = vsel %vm6231_vm9, %v5309_v47, %v3802_v35  ;;  %v3804_v25 = vrot.slane %v3802_v35, 4  ;;  %v2879_v51 = vsel %vm1983_vm14, %v2838_v38, %v6893_v43  ;;  %v3425_v59 = vsel %vm6310_vm12, %v3420_v9, %v3424_v28  ;;  %v5977_v47 = vld [vmem:[#allocation2 + $0x78] sm:$0xf]  ;;  %v5978_v35 = vld [vmem:[#allocation2 + $0x7c] sm:$0xf] }
 0x209   : > { %v3813_v56 = vsel %vm6231_vm9, %v3811_v53, %v3812_v21  ;;  %v3475_v13 = vshrl.u32 %v7080_v45, 16  ;;  %v3478_v11 = vshll.u32 %v7080_v45, 16  ;;  %5579 = vmatprep.mubr.msk.bf16.mxu1 %vm2906_vm15, %v2879_v51  ;;  %v5341_v43 = vcombine.low %v3415_v44, %v3425_v59  ;;  %v7128_v21 = vpop.permute.xlu0 %2814  ;;  %v5980_v53 = vld [vmem:[#allocation2 + $0x70] sm:$0xf] }
 0x20a   : > { %v5358_v49 = vcombine.low %v3810_v20, %v3813_v56  ;;  %v3806_v31 = vsel %vm6231_vm9, %v3804_v25, %v3805_v7  ;;  %v3484_v54 = vshll.u32 %v7085_v0, 16  ;;  %5580 = vmatmul.mubr.msk.bf16.gmra.mrb[12].mxu1 %vm2906_vm15, %v2881_v40  ;;  %v3488_v12 = vshrl.u32 %v7085_v0, 16  ;;  %v5979_v20 = vld [vmem:[#allocation2 + $0x6c] sm:$0xf] }
 0x20b   : > { %v5357_v60 = vcombine.low %v3803_v17, %v3806_v31  ;;  %v3477_v8 = vrot.slane %v3475_v13, 4  ;;  %v3480_v63 = vrot.slane %v3478_v11, 5  ;;  %3998 = vrot.lane.b32.xlu0 %v5341_v43, %s6063_s20  ;;  %v3494_v16 = vshll.u32 %v7098_v50, 16  ;;  %v7126_v39 = vpop.permute.xlu1 %2816 }
 0x20c   : > { %4080 = vrot.lane.b32.xlu1 %v5358_v49, %s6062_s19  ;;  %v3486_v46 = vrot.slane %v3484_v54, 5  ;;  %v3451_v3 = vshrl.u32 %v7102_v48, 16  ;;  %v3454_v29 = vshll.u32 %v7102_v48, 16  ;;  %v3490_v4 = vrot.slane %v3488_v12, 4 }
 0x20d   : > { %v3481_v27 = vor.u32 %v3480_v63, %v3477_v8  ;;  %v3460_v5 = vshll.u32 %v7112_v61, 16  ;;  %v3464_v2 = vshrl.u32 %v7112_v61, 16  ;;  %v3496_v28 = vrot.slane %v3494_v16, 5 }
 0x20e   : > { %v3453_v23 = vrot.slane %v3451_v3, 4  ;;  %v3456_v19 = vrot.slane %v3454_v29, 5  ;;  %v3470_v26 = vshll.u32 %v7116_v14, 16  ;;  %v3491_v22 = vor.u32 %v3490_v4, %v3486_v46 }
 0x20f   : > { %v3482_v38 = vrot.slane %v3481_v27, 4  ;;  %v3462_v1 = vrot.slane %v3460_v5, 5  ;;  %v3466_v34 = vrot.slane %v3464_v2, 4  ;;  %4078 = vrot.lane.b32.xlu0 %v5357_v60, %s6062_s19  ;;  %v5232_v9 = vcombine.low %v5977_v47, %v5978_v35  ;;  %v7143_v60 = vld [vmem:[#allocation2 + $0x6c] sm:$0xf]  ;;  %v7159_v16 = vpop.permute.xlu1 %1825 }
 0x210   : > { %v3457_v18 = vor.u32 %v3456_v19, %v3453_v23  ;;  %v3472_v44 = vrot.slane %v3470_v26, 5  ;;  %v5231_v7 = vcombine.low %v5979_v20, %v5980_v53  ;;  %v3492_v25 = vrot.slane %v3491_v22, 4  ;;  %7884 = vst [vmem:[#allocation3_spill] sm:$0xff] %v7143_v60 }
 0x211   : > { %v3487_v17 = vsel %vm6310_vm12, %v3482_v38, %v3486_v46  ;;  %v3467_v40 = vor.u32 %v3466_v34, %v3462_v1  ;;  %v5312_v51 = vrot.slane %v7080_v45, 9  ;;  %v2847_v56 = vsel %vm454_vm1, %v5232_v9, %v6921_v37  ;;  %v7157_v46 = vld [vmem:[#allocation2 + $0x74] sm:$0x1]  ;;  %v7179_v38 = vld [vmem:[#allocation2 + $0x64] sm:$0xf] }
 0x212   : > { %v3458_v59 = vrot.slane %v3457_v18, 4  ;;  %v2844_v13 = vsel %vm454_vm1, %v5231_v7, %v6923_v55  ;;  %v3823_v11 = vrot.slane %v7085_v0, 5  ;;  %v3497_v43 = vsel %vm6310_vm12, %v3492_v25, %v3496_v28  ;;  %v7161_v3 = vpop.permute.xlu0 %1823  ;;  %v7184_v34 = vld [vmem:[#allocation2 + $0x68] sm:$0x1] }
 0x213   : > { %v3468_v49 = vrot.slane %v3467_v40, 4  ;;  %v3826_v31 = vrot.slane %v7098_v50, 5  ;;  %v5311_v54 = vrot.slane %v7102_v48, 9  ;;  %v5344_v45 = vcombine.low %v3487_v17, %v3497_v43  ;;  %v7155_v48 = vld [vmem:[#allocation2 + $0x70] sm:$0xf]  ;;  %v7190_v40 = vpop.permute.xlu1 %1905 }
 0x214   : > { %v3463_v8 = vsel %vm6310_vm12, %v3458_v59, %v3462_v1  ;;  %v3824_v37 = vsel %vm6231_vm9, %v5312_v51, %v3823_v11  ;;  %v3825_v55 = vrot.slane %v3823_v11, 4  ;;  %v3816_v63 = vrot.slane %v7112_v61, 5  ;;  %v5981_v11 = vld [vmem:[#allocation2 + $0x90] sm:$0xf]  ;;  %v5982_v43 = vld [vmem:[#allocation2 + $0x94] sm:$0xf] }
 0x215   : > { %v3473_v0 = vsel %vm6310_vm12, %v3468_v49, %v3472_v44  ;;  %v3819_v12 = vrot.slane %v7116_v14, 5  ;;  %v2885_v50 = vsel %vm1983_vm14, %v2847_v56, %v6949_v36  ;;  %4004 = vrot.lane.b32.xlu1 %v5344_v45, %s6063_s20  ;;  %v2883_v61 = vsel %vm1983_vm14, %v2844_v13, %v6951_v32  ;;  %v7169_v36 = vld [vmem:[#allocation2 + $0x60] sm:$0xf] }
 0x216   : > { %v5343_v29 = vcombine.low %v3463_v8, %v3473_v0  ;;  %v3827_v27 = vsel %vm6231_vm9, %v3825_v55, %v3826_v31  ;;  %v3523_v14 = vshrl.u32 %v7143_v60, 16  ;;  %v3817_v5 = vsel %vm6231_vm9, %v5311_v54, %v3816_v63  ;;  %5583 = vmatprep.mubr.msk.bf16.mxu1 %vm2906_vm15, %v2883_v61  ;;  %v7192_v51 = vpop.permute.xlu0 %1903  ;;  %v5983_v8 = vld [vmem:[#allocation2 + $0x84] sm:$0xf] }
 0x217   : > { %v5360_v4 = vcombine.low %v3824_v37, %v3827_v27  ;;  %v3818_v2 = vrot.slane %v3816_v63, 4  ;;  %v3526_v28 = vshll.u32 %v7143_v60, 16  ;;  %v3532_v19 = vshll.u32 %v7155_v48, 16  ;;  %5584 = vmatmul.mubr.msk.bf16.gmra.mrb[16].mxu1 %vm2906_vm15, %v2885_v50  ;;  %v5984_v37 = vld [vmem:[#allocation2 + $0x88] sm:$0xf] }
 0x218   : > { %4002 = vrot.lane.b32.xlu0 %v5343_v29, %s6063_s20  ;;  %v3525_v23 = vrot.slane %v3523_v14, 4  ;;  %v3536_v32 = vshrl.u32 %v7155_v48, 16  ;;  %v3542_v26 = vshll.u32 %v7157_v46, 16  ;;  %v3499_v18 = vshrl.u32 %v7169_v36, 16 }
 0x219   : > { %v3820_v22 = vsel %vm6231_vm9, %v3818_v2, %v3819_v12  ;;  %v3528_v1 = vrot.slane %v3526_v28, 5  ;;  %v3502_v44 = vshll.u32 %v7169_v36, 16  ;;  %4084 = vrot.lane.b32.xlu1 %v5360_v4, %s6062_s19  ;;  %v3534_v35 = vrot.slane %v3532_v19, 5 }
 0x21a   : > { %v5359_v47 = vcombine.low %v3817_v5, %v3820_v22  ;;  %v3538_v9 = vrot.slane %v3536_v32, 4  ;;  %v3544_v20 = vrot.slane %v3542_v26, 5  ;;  %v3501_v7 = vrot.slane %v3499_v18, 4  ;;  %v7212_v26 = vld [vmem:[#allocation2 + $0x84] sm:$0xf]  ;;  %v7216_v22 = vpop.permute.xlu0 %1827 }
 0x21b   : > { %v3529_v53 = vor.u32 %v3528_v1, %v3525_v23  ;;  %v3504_v17 = vrot.slane %v3502_v44, 5  ;;  %v3508_v25 = vshll.u32 %v7179_v38, 16  ;;  %v3512_v56 = vshrl.u32 %v7179_v38, 16  ;;  %7885 = vst [vmem:[#allocation4_spill] sm:$0xff] %v7212_v26 }
 0x21c   : > { %4082 = vrot.lane.b32.xlu0 %v5359_v47, %s6062_s19  ;;  %v3539_v59 = vor.u32 %v3538_v9, %v3534_v35  ;;  %v3518_v13 = vshll.u32 %v7184_v34, 16  ;;  %v5234_v49 = vcombine.low %v5981_v11, %v5982_v43  ;;  %v5233_v55 = vcombine.low %v5983_v8, %v5984_v37  ;;  %v7221_v47 = vld [vmem:[#allocation2 + $0x88] sm:$0xf]  ;;  %v7244_v43 = vld [vmem:[#allocation2 + $0x7c] sm:$0xf] }
 0x21d   : > { %v3530_v31 = vrot.slane %v3529_v53, 4  ;;  %v3505_v54 = vor.u32 %v3504_v17, %v3501_v7  ;;  %v3510_v45 = vrot.slane %v3508_v25, 5  ;;  %v3514_v63 = vrot.slane %v3512_v56, 4  ;;  %7886 = vst [vmem:[#allocation5_spill] sm:$0xff] %v7221_v47  ;;  %v7234_v17 = vld [vmem:[#allocation2 + $0x8c] sm:$0x1] }
 0x21e   : > { %v3540_v0 = vrot.slane %v3539_v59, 4  ;;  %v3520_v12 = vrot.slane %v3518_v13, 5  ;;  %v2853_v50 = vsel %vm454_vm1, %v5234_v49, %v6992_v58  ;;  %v2850_v61 = vsel %vm454_vm1, %v5233_v55, %v6994_v30  ;;  %v7214_v30 = vpop.permute.xlu1 %1829  ;;  %v7238_v56 = vld [vmem:[#allocation2 + $0x78] sm:$0xf]  ;;  %v7248_v8 = vld [vmem:[#allocation2 + $0x80] sm:$0x1] }
 0x21f   : > { %v3535_v29 = vsel %vm6310_vm12, %v3530_v31, %v3534_v35  ;;  %v3506_v27 = vrot.slane %v3505_v54, 4  ;;  %v5314_v14 = vrot.slane %v7143_v60, 9  ;;  %v3515_v5 = vor.u32 %v3514_v63, %v3510_v45 }
 0x220   : > { %v3545_v4 = vsel %vm6310_vm12, %v3540_v0, %v3544_v20  ;;  %v3837_v2 = vrot.slane %v7155_v48, 5  ;;  %v3840_v28 = vrot.slane %v7157_v46, 5  ;;  %v5313_v19 = vrot.slane %v7169_v36, 9 }
 0x221   : > { %v5346_v23 = vcombine.low %v3535_v29, %v3545_v4  ;;  %v3511_v58 = vsel %vm6310_vm12, %v3506_v27, %v3510_v45  ;;  %v3830_v32 = vrot.slane %v7179_v38, 5  ;;  %v3516_v1 = vrot.slane %v3515_v5, 4 }
 0x222   : > { %v3838_v18 = vsel %vm6231_vm9, %v5314_v14, %v3837_v2  ;;  %v3839_v44 = vrot.slane %v3837_v2, 4  ;;  %v3833_v46 = vrot.slane %v7184_v34, 5  ;;  %v2889_v20 = vsel %vm1983_vm14, %v2853_v50, %v7008_v15  ;;  %v7257_v50 = vpop.permute.xlu0 %1907 }
 0x223   : > { %4008 = vrot.lane.b32.xlu1 %v5346_v23, %s6063_s20  ;;  %v3831_v35 = vsel %vm6231_vm9, %v5313_v19, %v3830_v32  ;;  %v3832_v9 = vrot.slane %v3830_v32, 4  ;;  %v2887_v53 = vsel %vm1983_vm14, %v2850_v61, %v7010_v6  ;;  %v3521_v7 = vsel %vm6310_vm12, %v3516_v1, %v3520_v12  ;;  %v7255_v12 = vpop.permute.xlu1 %1909 }
 0x224   : > { %v3841_v34 = vsel %vm6231_vm9, %v3839_v44, %v3840_v28  ;;  %v3571_v25 = vshrl.u32 %v7212_v26, 16  ;;  %v3574_v59 = vshll.u32 %v7212_v26, 16  ;;  %5587 = vmatprep.mubr.msk.bf16.mxu1 %vm2906_vm15, %v2887_v53  ;;  %v5345_v15 = vcombine.low %v3511_v58, %v3521_v7  ;;  %v5985_v44 = vld [vmem:[#allocation2 + $0xa8] sm:$0xf] }
 0x225   : > { %v5362_v13 = vcombine.low %v3838_v18, %v3841_v34  ;;  %v3834_v6 = vsel %vm6231_vm9, %v3832_v9, %v3833_v46  ;;  %v3580_v11 = vshll.u32 %v7221_v47, 16  ;;  %5588 = vmatmul.mubr.msk.bf16.gmra.mrb[20].mxu1 %vm2906_vm15, %v2889_v20  ;;  %v3584_v45 = vshrl.u32 %v7221_v47, 16  ;;  %v5986_v46 = vld [vmem:[#allocation2 + $0xac] sm:$0xf]  ;;  %v5987_v9 = vld [vmem:[#allocation2 + $0x9c] sm:$0xf] }
 0x226   : > { %v5361_v49 = vcombine.low %v3831_v35, %v3834_v6  ;;  %v3573_v31 = vrot.slane %v3571_v25, 4  ;;  %v3576_v54 = vrot.slane %v3574_v59, 5  ;;  %4006 = vrot.lane.b32.xlu0 %v5345_v15, %s6063_s20  ;;  %v3590_v55 = vshll.u32 %v7234_v17, 16  ;;  %v5988_v20 = vld [vmem:[#allocation2 + $0xa0] sm:$0xf] }
 0x227   : > { %4088 = vrot.lane.b32.xlu1 %v5362_v13, %s6062_s19  ;;  %v3582_v37 = vrot.slane %v3580_v11, 5  ;;  %v3547_v0 = vshrl.u32 %v7238_v56, 16  ;;  %v3550_v63 = vshll.u32 %v7238_v56, 16  ;;  %v3586_v27 = vrot.slane %v3584_v45, 4 }
 0x228   : > { %v3577_v29 = vor.u32 %v3576_v54, %v3573_v31  ;;  %v3556_v61 = vshll.u32 %v7244_v43, 16  ;;  %v3560_v14 = vshrl.u32 %v7244_v43, 16  ;;  %v3592_v4 = vrot.slane %v3590_v55, 5  ;;  %v7273_v31 = vpop.permute.xlu0 %1831 }
 0x229   : > { %v3549_v5 = vrot.slane %v3547_v0, 4  ;;  %v3552_v2 = vrot.slane %v3550_v63, 5  ;;  %v3566_v28 = vshll.u32 %v7248_v8, 16  ;;  %v3587_v58 = vor.u32 %v3586_v27, %v3582_v37  ;;  %v7279_v0 = vld [vmem:[#allocation2 + $0x9c] sm:$0xf] }
 0x22a   : > { %v3578_v23 = vrot.slane %v3577_v29, 4  ;;  %v3558_v19 = vrot.slane %v3556_v61, 5  ;;  %v3562_v32 = vrot.slane %v3560_v14, 4  ;;  %4086 = vrot.lane.b32.xlu0 %v5361_v49, %s6062_s19  ;;  %v5236_v35 = vcombine.low %v5985_v44, %v5986_v46  ;;  %v7271_v49 = vpop.permute.xlu1 %1833 }
 0x22b   : > { %v3553_v1 = vor.u32 %v3552_v2, %v3549_v5  ;;  %v3568_v18 = vrot.slane %v3566_v28, 5  ;;  %v5235_v53 = vcombine.low %v5987_v9, %v5988_v20  ;;  %v3588_v34 = vrot.slane %v3587_v58, 4  ;;  %v7293_v5 = vld [vmem:[#allocation2 + $0xa4] sm:$0x1] }
 0x22c   : > { %v3583_v7 = vsel %vm6310_vm12, %v3578_v23, %v3582_v37  ;;  %v3563_v25 = vor.u32 %v3562_v32, %v3558_v19  ;;  %v5316_v59 = vrot.slane %v7212_v26, 9  ;;  %v2859_v13 = vsel %vm454_vm1, %v5236_v35, %v7049_v52  ;;  %v7311_v35 = vld [vmem:[#allocation2 + $0x94] sm:$0xf]  ;;  %v7316_v20 = vpop.permute.xlu0 %1911  ;;  %v6001_v26 = vld [vmem:[#allocation2 + $0x1c] sm:$0xf] }
 0x22d   : > { %v3554_v15 = vrot.slane %v3553_v1, 4  ;;  %v2856_v6 = vsel %vm454_vm1, %v5235_v53, %v7051_v42  ;;  %v3851_v11 = vrot.slane %v7221_v47, 5  ;;  %v3593_v54 = vsel %vm6310_vm12, %v3588_v34, %v3592_v4  ;;  %v7291_v4 = vld [vmem:[#allocation2 + $0xa0] sm:$0xf]  ;;  %v7320_v34 = vld [vmem:[#allocation2 + $0x98] sm:$0x1] }
 0x22e   : > { %v3564_v45 = vrot.slane %v3563_v25, 4  ;;  %v3854_v37 = vrot.slane %v7234_v17, 5  ;;  %v5315_v55 = vrot.slane %v7238_v56, 9  ;;  %v5348_v52 = vcombine.low %v3583_v7, %v3593_v54  ;;  %v7314_v9 = vpop.permute.xlu1 %1913 }
 0x22f   : > { %v3559_v42 = vsel %vm6310_vm12, %v3554_v15, %v3558_v19  ;;  %v3852_v63 = vsel %vm6231_vm9, %v5316_v59, %v3851_v11  ;;  %v3853_v29 = vrot.slane %v3851_v11, 4  ;;  %v3844_v61 = vrot.slane %v7244_v43, 5  ;;  %v7301_v19 = vld [vmem:[#allocation2 + $0x90] sm:$0xf] }
 0x230   : > { %v3569_v27 = vsel %vm6310_vm12, %v3564_v45, %v3568_v18  ;;  %v3847_v14 = vrot.slane %v7248_v8, 5  ;;  %v2893_v17 = vsel %vm1983_vm14, %v2859_v13, %v7064_v62  ;;  %4012 = vrot.lane.b32.xlu1 %v5348_v52, %s6063_s20  ;;  %v2891_v23 = vsel %vm1983_vm14, %v2856_v6, %v7066_v10 }
 0x231   : > { %v5347_v2 = vcombine.low %v3559_v42, %v3569_v27  ;;  %v3855_v28 = vsel %vm6231_vm9, %v3853_v29, %v3854_v37  ;;  %v3619_v58 = vshrl.u32 %v7279_v0, 16  ;;  %v3845_v62 = vsel %vm6231_vm9, %v5315_v55, %v3844_v61  ;;  %5591 = vmatprep.mubr.msk.bf16.mxu1 %vm2906_vm15, %v2891_v23  ;;  %v5989_v29 = vld [vmem:[#allocation2 + $0xc0] sm:$0xf]  ;;  %v5990_v27 = vld [vmem:[#allocation2 + $0xc4] sm:$0xf] }
 0x232   : > { %v5364_v8 = vcombine.low %v3852_v63, %v3855_v28  ;;  %v3846_v32 = vrot.slane %v3844_v61, 4  ;;  %v3622_v1 = vshll.u32 %v7279_v0, 16  ;;  %v3628_v44 = vshll.u32 %v7291_v4, 16  ;;  %5592 = vmatmul.mubr.msk.bf16.gmra.mrb[24].mxu1 %vm2906_vm15, %v2893_v17  ;;  %v5991_v28 = vld [vmem:[#allocation2 + $0xb4] sm:$0xf] }
 0x233   : > { %4010 = vrot.lane.b32.xlu0 %v5347_v2, %s6063_s20  ;;  %v3621_v18 = vrot.slane %v3619_v58, 4  ;;  %v3632_v10 = vshrl.u32 %v7291_v4, 16  ;;  %v3638_v46 = vshll.u32 %v7293_v5, 16  ;;  %v3595_v25 = vshrl.u32 %v7301_v19, 16  ;;  %v5992_v23 = vld [vmem:[#allocation2 + $0xb8] sm:$0xf] }
 0x234   : > { %v3848_v53 = vsel %vm6231_vm9, %v3846_v32, %v3847_v14  ;;  %v3624_v7 = vrot.slane %v3622_v1, 5  ;;  %v3598_v59 = vshll.u32 %v7301_v19, 16  ;;  %4092 = vrot.lane.b32.xlu1 %v5364_v8, %s6062_s19  ;;  %v3630_v13 = vrot.slane %v3628_v44, 5  ;;  %v7333_v44 = vpop.permute.xlu0 %1835 }
 0x235   : > { %v5363_v15 = vcombine.low %v3845_v62, %v3848_v53  ;;  %v3634_v6 = vrot.slane %v3632_v10, 4  ;;  %v3640_v11 = vrot.slane %v3638_v46, 5  ;;  %v3597_v45 = vrot.slane %v3595_v25, 4 }
 0x236   : > { %v3625_v54 = vor.u32 %v3624_v7, %v3621_v18  ;;  %v3600_v37 = vrot.slane %v3598_v59, 5  ;;  %v3604_v55 = vshll.u32 %v7311_v35, 16  ;;  %v3608_v42 = vshrl.u32 %v7311_v35, 16  ;;  %v7331_v18 = vpop.permute.xlu1 %1837 }
 0x237   : > { %4090 = vrot.lane.b32.xlu0 %v5363_v15, %s6062_s19  ;;  %v3635_v52 = vor.u32 %v3634_v6, %v3630_v13  ;;  %v3614_v63 = vshll.u32 %v7320_v34, 16  ;;  %v5238_v61 = vcombine.low %v5989_v29, %v5990_v27  ;;  %v5237_v58 = vcombine.low %v5991_v28, %v5992_v23  ;;  %v7370_v28 = vld [vmem:[#allocation2 + $0xa8] sm:$0xf] }
 0x238   : > { %v3626_v14 = vrot.slane %v3625_v54, 4  ;;  %v3601_v17 = vor.u32 %v3600_v37, %v3597_v45  ;;  %v3606_v2 = vrot.slane %v3604_v55, 5  ;;  %v3610_v62 = vrot.slane %v3608_v42, 4  ;;  %v7348_v37 = vld [vmem:[#allocation2 + $0xb4] sm:$0xf]  ;;  %v7375_v23 = vpop.permute.xlu0 %1915 }
 0x239   : > { %v3636_v8 = vrot.slane %v3635_v52, 4  ;;  %v3616_v32 = vrot.slane %v3614_v63, 5  ;;  %v2865_v1 = vsel %vm454_vm1, %v5238_v61, %v7105_v41  ;;  %v2862_v53 = vsel %vm454_vm1, %v5237_v58, %v7107_v24  ;;  %v7353_v42 = vld [vmem:[#allocation2 + $0xb8] sm:$0xf] }
 0x23a   : > { %v3631_v10 = vsel %vm6310_vm12, %v3626_v14, %v3630_v13  ;;  %v3602_v46 = vrot.slane %v3601_v17, 4  ;;  %v5318_v7 = vrot.slane %v7279_v0, 9  ;;  %v3611_v59 = vor.u32 %v3610_v62, %v3606_v2  ;;  %v7366_v14 = vld [vmem:[#allocation2 + $0xbc] sm:$0x1] }
 0x23b   : > { %v3641_v25 = vsel %vm6310_vm12, %v3636_v8, %v3640_v11  ;;  %v3865_v15 = vrot.slane %v7291_v4, 5  ;;  %v3868_v41 = vrot.slane %v7293_v5, 5  ;;  %v5317_v13 = vrot.slane %v7301_v19, 9 }
 0x23c   : > { %v5350_v6 = vcombine.low %v3631_v10, %v3641_v25  ;;  %v3607_v54 = vsel %vm6310_vm12, %v3602_v46, %v3606_v2  ;;  %v3858_v45 = vrot.slane %v7311_v35, 5  ;;  %v3612_v24 = vrot.slane %v3611_v59, 4 }
 0x23d   : > { %v3866_v55 = vsel %vm6231_vm9, %v5318_v7, %v3865_v15  ;;  %v3867_v11 = vrot.slane %v3865_v15, 4  ;;  %v3861_v52 = vrot.slane %v7320_v34, 5  ;;  %v2897_v29 = vsel %vm1983_vm14, %v2865_v1, %v7126_v39  ;;  %v7373_v39 = vpop.permute.xlu1 %1917  ;;  %v7384_v7 = vld [vmem:[#allocation2 + $0xb0] sm:$0x1] }
 0x23e   : > { %4016 = vrot.lane.b32.xlu1 %v5350_v6, %s6063_s20  ;;  %v3859_v5 = vsel %vm6231_vm9, %v5317_v13, %v3858_v45  ;;  %v3860_v63 = vrot.slane %v3858_v45, 4  ;;  %v2895_v27 = vsel %vm1983_vm14, %v2862_v53, %v7128_v21  ;;  %v3617_v61 = vsel %vm6310_vm12, %v3612_v24, %v3616_v32  ;;  %v7380_v32 = vld [vmem:[#allocation2 + $0xac] sm:$0xf] }
 0x23f   : > { %v3869_v34 = vsel %vm6231_vm9, %v3867_v11, %v3868_v41  ;;  %v3667_v17 = vshrl.u32 %v7348_v37, 16  ;;  %v3670_v2 = vshll.u32 %v7348_v37, 16  ;;  %5595 = vmatprep.mubr.msk.bf16.mxu1 %vm2906_vm15, %v2895_v27  ;;  %v5349_v21 = vcombine.low %v3607_v54, %v3617_v61 }
 0x240   : > { %v5366_v58 = vcombine.low %v3866_v55, %v3869_v34  ;;  %v3862_v8 = vsel %vm6231_vm9, %v3860_v63, %v3861_v52  ;;  %v3676_v62 = vshll.u32 %v7353_v42, 16  ;;  %5596 = vmatmul.mubr.msk.bf16.gmra.mrb[28].mxu1 %vm2906_vm15, %v2897_v29  ;;  %v3680_v53 = vshrl.u32 %v7353_v42, 16  ;;  %v7396_v34 = vpop.permute.xlu0 %1839 }
 0x241   : > { %v5365_v1 = vcombine.low %v3859_v5, %v3862_v8  ;;  %v3669_v10 = vrot.slane %v3667_v17, 4  ;;  %v3672_v46 = vrot.slane %v3670_v2, 5  ;;  %4014 = vrot.lane.b32.xlu0 %v5349_v21, %s6063_s20  ;;  %v3686_v59 = vshll.u32 %v7366_v14, 16  ;;  %v7394_v61 = vpop.permute.xlu1 %1841  ;;  %v5993_v21 = vld [vmem:[#allocation2 + $0xc] sm:$0xf] }
 0x242   : > { %4096 = vrot.lane.b32.xlu1 %v5366_v58, %s6062_s19  ;;  %v3678_v25 = vrot.slane %v3676_v62, 5  ;;  %v3643_v15 = vshrl.u32 %v7370_v28, 16  ;;  %v3646_v41 = vshll.u32 %v7370_v28, 16  ;;  %v3682_v54 = vrot.slane %v3680_v53, 4  ;;  %v5994_v58 = vld [vmem:[#allocation2 + $0x10] sm:$0xf] }
 0x243   : > { %v3673_v6 = vor.u32 %v3672_v46, %v3669_v10  ;;  %v3652_v13 = vshll.u32 %v7380_v32, 16  ;;  %v3656_v45 = vshrl.u32 %v7380_v32, 16  ;;  %v3688_v24 = vrot.slane %v3686_v59, 5  ;;  %v5995_v62 = vld [vmem:[#allocation2] sm:$0xf] }
 0x244   : > { %v3645_v55 = vrot.slane %v3643_v15, 4  ;;  %v3648_v11 = vrot.slane %v3646_v41, 5  ;;  %v3662_v52 = vshll.u32 %v7384_v7, 16  ;;  %v3683_v63 = vor.u32 %v3682_v54, %v3678_v25  ;;  %v5996_v10 = vld [vmem:[#allocation2 + $0x4] sm:$0xf] }
 0x245   : > { %v3674_v5 = vrot.slane %v3673_v6, 4  ;;  %v3654_v29 = vrot.slane %v3652_v13, 5  ;;  %v3658_v27 = vrot.slane %v3656_v45, 4  ;;  %4094 = vrot.lane.b32.xlu0 %v5365_v1, %s6062_s19  ;;  %v5160_v8 = vcombine.low %v5993_v21, %v5994_v58  ;;  %v7423_v21 = vld [vmem:[#allocation2 + $0xd0] sm:$0xf] }
 0x246   : > { %v3649_v17 = vor.u32 %v3648_v11, %v3645_v55  ;;  %v3664_v2 = vrot.slane %v3662_v52, 5  ;;  %v5159_v46 = vcombine.low %v5995_v62, %v5996_v10  ;;  %v3684_v59 = vrot.slane %v3683_v63, 4  ;;  %v7411_v52 = vld [vmem:[#allocation2 + $0xcc] sm:$0xf]  ;;  %v7425_v58 = vld [vmem:[#allocation2 + $0xd4] sm:$0x1] }
 0x247   : > { %v3679_v53 = vsel %vm6310_vm12, %v3674_v5, %v3678_v25  ;;  %v3659_v15 = vor.u32 %v3658_v27, %v3654_v29  ;;  %v5320_v41 = vrot.slane %v7348_v37, 9  ;;  %v1940_v54 = vsel %vm454_vm1, %v5160_v8, %v7159_v16  ;;  %v7427_v8 = vpop.permute.xlu1 %1921 }
 0x248   : > { %v3650_v6 = vrot.slane %v3649_v17, 4  ;;  %v1937_v1 = vsel %vm454_vm1, %v5159_v46, %v7161_v3  ;;  %v3879_v13 = vrot.slane %v7353_v42, 5  ;;  %v3689_v45 = vsel %vm6310_vm12, %v3684_v59, %v3688_v24 }
 0x249   : > { %v3660_v55 = vrot.slane %v3659_v15, 4  ;;  %v3882_v11 = vrot.slane %v7366_v14, 5  ;;  %v5319_v25 = vrot.slane %v7370_v28, 9  ;;  %v5352_v5 = vcombine.low %v3679_v53, %v3689_v45 }
 0x24a   : > { %v3655_v63 = vsel %vm6310_vm12, %v3650_v6, %v3654_v29  ;;  %v3880_v16 = vsel %vm6231_vm9, %v5320_v41, %v3879_v13  ;;  %v3881_v3 = vrot.slane %v3879_v13, 4  ;;  %v3872_v24 = vrot.slane %v7380_v32, 5  ;;  %v7429_v29 = vpop.permute.xlu0 %1919 }
 0x24b   : > { %v3665_v27 = vsel %vm6310_vm12, %v3660_v55, %v3664_v2  ;;  %v3875_v17 = vrot.slane %v7384_v7, 5  ;;  %v1987_v14 = vsel %vm1983_vm14, %v1940_v54, %v7190_v40  ;;  %4020 = vrot.lane.b32.xlu1 %v5352_v5, %s6063_s20  ;;  %v1985_v7 = vsel %vm1983_vm14, %v1937_v1, %v7192_v51  ;;  %v7437_v40 = vld [vmem:[#allocation2 + $0xc0] sm:$0xf]  ;;  %v7447_v1 = vld [vmem:[#allocation2 + $0xc4] sm:$0xf] }
 0x24c   : > { %v5351_v62 = vcombine.low %v3655_v63, %v3665_v27  ;;  %v3883_v2 = vsel %vm6231_vm9, %v3881_v3, %v3882_v11  ;;  %v3715_v10 = vshrl.u32 %v7411_v52, 16  ;;  %v3873_v53 = vsel %vm6231_vm9, %v5319_v25, %v3872_v24  ;;  %5601 = vmatprep.mubr.msk.bf16.mxu1 %vm2906_vm15, %v1985_v7  ;;  %v7452_v55 = vld [vmem:[#allocation2 + $0xc8] sm:$0x1] }
 0x24d   : > { %v5368_v46 = vcombine.low %v3880_v16, %v3883_v2  ;;  %v3874_v59 = vrot.slane %v3872_v24, 4  ;;  %v3718_v15 = vshll.u32 %v7411_v52, 16  ;;  %v3724_v6 = vshll.u32 %v7423_v21, 16  ;;  %5602 = vmatmul.mubr.msk.bf16.vlgmr.msra.gmra.mrb[0].mxu1 %vm2906_vm15, %v1987_v14  ;;  %v7458_v2 = vpop.permute.xlu1 %1845 }
 0x24e   : > { %4018 = vrot.lane.b32.xlu0 %v5351_v62, %s6063_s20  ;;  %v3717_v41 = vrot.slane %v3715_v10, 4  ;;  %v3728_v51 = vshrl.u32 %v7423_v21, 16  ;;  %v3734_v54 = vshll.u32 %v7425_v58, 16  ;;  %v3691_v11 = vshrl.u32 %v7437_v40, 16 }
 0x24f   : > { %v3876_v13 = vsel %vm6231_vm9, %v3874_v59, %v3875_v17  ;;  %v3720_v45 = vrot.slane %v3718_v15, 5  ;;  %v3694_v25 = vshll.u32 %v7437_v40, 16  ;;  %4100 = vrot.lane.b32.xlu1 %v5368_v46, %s6062_s19  ;;  %v3726_v63 = vrot.slane %v3724_v6, 5  ;;  %v7460_v17 = vpop.permute.xlu0 %1843 }
 0x250   : > { %v5367_v5 = vcombine.low %v3873_v53, %v3876_v13  ;;  %v3730_v16 = vrot.slane %v3728_v51, 4  ;;  %v3736_v3 = vrot.slane %v3734_v54, 5  ;;  %v3693_v24 = vrot.slane %v3691_v11, 4  ;;  %v5997_v53 = vld [vmem:[%s7868_s3 + $0x10] sm:$0x3f]  }
 0x251   : > { %v3721_v27 = vor.u32 %v3720_v45, %v3717_v41  ;;  %v3696_v62 = vrot.slane %v3694_v25, 5  ;;  %v3700_v14 = vshll.u32 %v7447_v1, 16  ;;  %v3704_v10 = vshrl.u32 %v7447_v1, 16  ;;  %v5998_v13 = vld [vmem:[#allocation2 + $0x24] sm:$0xf] }
 0x252   : > { %4098 = vrot.lane.b32.xlu0 %v5367_v5, %s6062_s19  ;;  %v3731_v7 = vor.u32 %v3730_v16, %v3726_v63  ;;  %v3710_v46 = vshll.u32 %v7452_v55, 16  ;;  %v4227_v59 = vsel %vm2939_vm13, %v5997_v53, 0  ;;  %v5999_v45 = vld [vmem:[#allocation2 + $0x28] sm:$0xf]  ;;  %v6000_v16 = vld [vmem:[#allocation2 + $0x18] sm:$0xf] }
 0x253   : > { %v3722_v15 = vrot.slane %v3721_v27, 4  ;;  %v3697_v41 = vor.u32 %v3696_v62, %v3693_v24  ;;  %v3702_v6 = vrot.slane %v3700_v14, 5  ;;  %5634 = vmatpush3.bf16.msra.mxu1 %v4227_v59  ;;  %v3706_v54 = vrot.slane %v3704_v10, 4  ;;  %v7483_v59 = vpop.permute.xlu1 %1925 }
 0x254   : > { %v3732_v51 = vrot.slane %v3731_v7, 4  ;;  %v5162_v11 = vcombine.low %v5998_v13, %v5999_v45  ;;  %v5161_v47 = vcombine.low %v6000_v16, %v6001_v26  ;;  %v5322_v60 = vrot.slane %v7411_v52, 9  ;;  %v4509_v7 = vld [vmem:[%s7870_s5] sm:$0x3] }
 0x255   : > { %v3727_v25 = vsel %vm6310_vm12, %v3722_v15, %v3726_v63  ;;  %v3698_v5 = vrot.slane %v3697_v41, 4  ;;  %v3707_v24 = vor.u32 %v3706_v54, %v3702_v6  ;;  %v3712_v62 = vrot.slane %v3710_v46, 5  ;;  %5899 = vmatprep.subr.msk.bf16.mxu0 %vm503_vm0, %v4509_v7 }
 0x256   : > { %v3737_v27 = vsel %vm6310_vm12, %v3732_v51, %v3736_v3  ;;  %v3893_v14 = vrot.slane %v7423_v21, 5  ;;  %v1943_v26 = vsel %vm454_vm1, %v5161_v47, %v7216_v22  ;;  %v3896_v53 = vrot.slane %v7425_v58, 5  ;;  %v7485_v3 = vpop.permute.xlu0 %1923 }
 0x257   : > { %v5354_v10 = vcombine.low %v3727_v25, %v3737_v27  ;;  %v3703_v63 = vsel %vm6310_vm12, %v3698_v5, %v3702_v6  ;;  %v3708_v46 = vrot.slane %v3707_v24, 4  ;;  %v3886_v51 = vrot.slane %v7447_v1, 5  ;;  %v6003_v25 = vld [vmem:[#allocation2 + $0x34] sm:$0xf] }
 0x258   : > { %v3894_v15 = vsel %vm6231_vm9, %v5322_v60, %v3893_v14  ;;  %v3895_v41 = vrot.slane %v3893_v14, 4  ;;  %v1946_v22 = vsel %vm454_vm1, %v5162_v11, %v7214_v30  ;;  %v5321_v47 = vrot.slane %v7437_v40, 9  ;;  %v6004_v14 = vld [vmem:[#allocation2 + $0x48] sm:$0xf] }
 0x259   : > { %4024 = vrot.lane.b32.xlu1 %v5354_v10, %s6063_s20  ;;  %v3889_v58 = vrot.slane %v7452_v55, 5  ;;  %v1989_v6 = vsel %vm1983_vm14, %v1943_v26, %v7257_v50  ;;  %v3713_v54 = vsel %vm6310_vm12, %v3708_v46, %v3712_v62  ;;  %v3888_v13 = vrot.slane %v3886_v51, 4  ;;  %v6002_v55 = vld [vmem:[#allocation2 + $0x30] sm:$0xf]  ;;  %v6005_v10 = vld [vmem:[#allocation2 + $0x4c] sm:$0xf] }
 0x25a   : > { %v3897_v60 = vsel %vm6231_vm9, %v3895_v41, %v3896_v53  ;;  %v1991_v45 = vsel %vm1983_vm14, %v1946_v22, %v7255_v12  ;;  %5605 = vmatprep.mubr.msk.bf16.mxu1 %vm2906_vm15, %v1989_v6  ;;  %v5353_v30 = vcombine.low %v3703_v63, %v3713_v54  ;;  %v5163_v5 = vcombine.low %v6002_v55, %v6003_v25  ;;  %v7512_v12 = vpop.permute.xlu1 %1849  ;;  %v7514_v16 = vpop.permute.xlu0 %1847  ;;  %v6006_v53 = vld [vmem:[#allocation2 + $0x3c] sm:$0xf]  ;;  %v6007_v46 = vld [vmem:[#allocation2 + $0x40] sm:$0xf]  ;;  %v6011_v6 = vld [vmem:[#allocation2 + $0x58] sm:$0xf] }
 0x25b   : > { %v5370_v11 = vcombine.low %v3894_v15, %v3897_v60  ;;  %5606 = vmatmul.mubr.msk.bf16.gmra.mrb[4].mxu1 %vm2906_vm15, %v1991_v45  ;;  %v3890_v33 = vsel %vm6231_vm9, %v3888_v13, %v3889_v58  ;;  %v4566_v27 = vsel %vm503_vm0, %v4509_v7, 0  ;;  %v3887_v24 = vsel %vm6231_vm9, %v5321_v47, %v3886_v51  ;;  %v6008_v22 = vld [vmem:[#allocation2 + $0x60] sm:$0xf]  ;;  %v6010_v58 = vld [vmem:[#allocation2 + $0x54] sm:$0xf] }
 0x25c   : > { %4022 = vrot.lane.b32.xlu0 %v5353_v30, %s6063_s20  ;;  %v1949_v50 = vsel %vm454_vm1, %v5163_v5, %v7273_v31  ;;  %v5165_v63 = vcombine.low %v6004_v14, %v6005_v10  ;;  %5668 = vmatpush3.bf16.msra.mxu0 %v4566_v27  ;;  %v5369_v26 = vcombine.low %v3887_v24, %v3890_v33  ;;  %v6013_v27 = vld [vmem:[#allocation2 + $0x7c] sm:$0xf]  ;;  %v6015_v14 = vld [vmem:[#allocation2 + $0x70] sm:$0xf] }
 0x25d   : > { %4104 = vrot.lane.b32.xlu1 %v5370_v11, %s6062_s19  ;;  %v1993_v62 = vsel %vm1983_vm14, %v1949_v50, %v7316_v20  ;;  %v5164_v31 = vcombine.low %v6006_v53, %v6007_v46  ;;  %v5166_v54 = vcombine.low %v6010_v58, %v6011_v6  ;;  %v5333_v60 = vcombine.low %v7301_v19, %v7311_v35  ;;  %v6012_v50 = vld [vmem:[#allocation2 + $0x78] sm:$0xf]  ;;  %v6020_v6 = vld [vmem:[#allocation2 + $0xa8] sm:$0xf] }
 0x25e   : > { %5609 = vmatprep.mubr.msk.bf16.mxu1 %vm2906_vm15, %v1993_v62  ;;  %v1955_v15 = vsel %vm454_vm1, %v5165_v63, %v7333_v44  ;;  %v7532_v41 = vpop.permute.xlu1 %1929  ;;  %v1928_v51 = vpop.permute.xlu0 %1927  ;;  %v6009_v44 = vld [vmem:[#allocation2 + $0x64] sm:$0xf]  ;;  %v5336_v13 = vcombine.low %v7348_v37, %v7353_v42  ;;  %v5335_v45 = vcombine.low %v7370_v28, %v7380_v32  ;;  %v5338_v30 = vcombine.low %v7411_v52, %v7423_v21  ;;  %v6014_v62 = vld [vmem:[#allocation2 + $0x6c] sm:$0xf]  ;;  %v4729_v52 = vld [vmem:[%s7872_s7] sm:$0x3] }
 0x25f   : > { %v1952_v57 = vsel %vm454_vm1, %v5164_v31, %v7271_v49  ;;  %v1997_v20 = vsel %vm1983_vm14, %v1955_v15, %v7375_v23  ;;  %v5167_v47 = vcombine.low %v6008_v22, %v6009_v44  ;;  %v5331_v23 = vcombine.low %v7238_v56, %v7244_v43  ;;  %v6016_v15 = vld [vmem:[#allocation2 + $0x90] sm:$0xf]  ;;  %5900 = vmatprep.subr.msk.bf16.mxu0 %vm503_vm0, %v4729_v52  ;;  %v7671_v21 = vld [vmem:[%s7869_s4] ss:$0 sm:$0xff] }
 0x260   : > { %4102 = vrot.lane.b32.xlu0 %v5369_v26, %s6062_s19  ;;  %v1995_v7 = vsel %vm1983_vm14, %v1952_v57, %v7314_v9  ;;  %v5334_v9 = vcombine.low %v7279_v0, %v7291_v4  ;;  %v1958_v11 = vsel %vm454_vm1, %v5166_v54, %v7331_v18  ;;  %v5169_v24 = vcombine.low %v6012_v50, %v6013_v27  ;;  %v6017_v57 = vld [vmem:[#allocation2 + $0x94] sm:$0xf]  ;;  %v6021_v54 = vld [vmem:[#allocation2 + $0xac] sm:$0xf] }
 0x261   : > { %v1961_v49 = vsel %vm454_vm1, %v5167_v47, %v7396_v34  ;;  %v5337_v34 = vcombine.low %v7437_v40, %v7447_v1  ;;  %v1999_v33 = vsel %vm1983_vm14, %v1958_v11, %v7373_v39  ;;  %v5168_v10 = vcombine.low %v6014_v62, %v6015_v14  ;;  %v6022_v11 = vld [vmem:[#allocation2 + $0x9c] sm:$0xf] }
 0x262   : > { %v2001_v55 = vsel %vm1983_vm14, %v1961_v49, %v7429_v29  ;;  %v1854_v25 = vpop.permute.xlu1 %1853  ;;  %v1852_v5 = vpop.permute.xlu0 %1851  ;;  %v1967_v29 = vsel %vm454_vm1, %v5169_v24, %v7460_v17  ;;  %v6019_v17 = vld [vmem:[#allocation2 + $0x88] sm:$0xf]  ;;  %v5173_v49 = vcombine.low %v6020_v6, %v6021_v54  ;;  %v6024_v24 = vld [vmem:[#allocation2 + $0x18] sm:$0xf]  ;;  %v6025_v62 = vld [vmem:[#allocation2 + $0x1c] sm:$0xf] }
 0x263   : > { %5610 = vmatmul.mubr.msk.bf16.gmra.mrb[8].mxu1 %vm2906_vm15, %v1995_v7  ;;  %v1964_v26 = vsel %vm454_vm1, %v5168_v10, %v7394_v61  ;;  %v2005_v39 = vsel %vm1983_vm14, %v1967_v29, %v7485_v3  ;;  %v6018_v7 = vld [vmem:[#allocation2 + $0x84] sm:$0xf]  ;;  %v5323_v14 = vcombine.low %v6024_v24, %v6025_v62  ;;  %v6026_v10 = vld [vmem:[#allocation2 + $0xb4] sm:$0xf]  ;;  %v6027_v29 = vld [vmem:[#allocation2 + $0xb8] sm:$0xf] }
 0x264   : > { %5613 = vmatprep.mubr.msk.bf16.mxu1 %vm2906_vm15, %v1997_v20  ;;  %v2003_v53 = vsel %vm1983_vm14, %v1964_v26, %v7427_v8  ;;  %v5171_v20 = vcombine.low %v6016_v15, %v6017_v57  ;;  %v5170_v22 = vcombine.low %v6018_v7, %v6019_v17  ;;  %v6029_v7 = vld [vmem:[#allocation2 + $0x34] sm:$0xf]  ;;  %v6032_v6 = vld [vmem:[#allocation2 + $0x48] sm:$0xf]  ;;  %v6033_v54 = vld [vmem:[#allocation2 + $0x4c] sm:$0xf] }
 0x265   : > { %v6036_v62 = vld [vmem:[#allocation2 + $0x54] sm:$0xf] }
 0x266   : > { %v1934_v63 = vpop.permute.xlu1 %1933  ;;  %v1932_v18 = vpop.permute.xlu0 %1931  ;;  %v1973_v61 = vsel %vm454_vm1, %v5171_v20, %v7514_v16  ;;  %v1970_v3 = vsel %vm454_vm1, %v5170_v22, %v7458_v2  ;;  %v6028_v20 = vld [vmem:[#allocation2 + $0x30] sm:$0xf]  ;;  %v6030_v22 = vld [vmem:[#allocation2 + $0x24] sm:$0xf] }
 0x267   : > { %v2009_v8 = vsel %vm1983_vm14, %v1973_v61, %v1928_v51  ;;  %v2007_v44 = vsel %vm1983_vm14, %v1970_v3, %v7483_v59  ;;  %v5325_v17 = vcombine.low %v6028_v20, %v6029_v7  ;;  %v6031_v61 = vld [vmem:[#allocation2 + $0x28] sm:$0xf] }
 0x268   : > { %v5324_v3 = vcombine.low %v6030_v22, %v6031_v61  ;;  %v7889_v22 = vld [vmem:[#allocation4_spill] sm:$0xff] }
 0x26b   : > { %5614 = vmatmul.mubr.msk.bf16.gmra.mrb[12].mxu1 %vm2906_vm15, %v1999_v33  ;;  %v1979_v33 = vsel %vm454_vm1, %v5173_v49, %v1852_v5  ;;  %v5174_v5 = vcombine.low %v6026_v10, %v6027_v29  ;;  %v5327_v49 = vcombine.low %v6032_v6, %v6033_v54 }
 0x26c   : > { %5617 = vmatprep.mubr.msk.bf16.mxu1 %vm2906_vm15, %v2001_v55  ;;  %v3997_v46 = vpop.permute.xlu1 %3996  ;;  %v6023_v55 = vld [vmem:[#allocation2 + $0xa0] sm:$0xf]  ;;  %v2013_v51 = vsel %vm1983_vm14, %v1979_v33, %v1932_v18 }
 0x26d   : > { %v5172_v16 = vcombine.low %v6022_v11, %v6023_v55  ;;  %v1982_v18 = vsel %vm454_vm1, %v5174_v5, %v1854_v25  ;;  %v4111_v25 = vsel %vm454_vm1, %v5324_v3, %v3997_v46  ;;  %v6034_v11 = vld [vmem:[#allocation2 + $0x3c] sm:$0xf]  ;;  %v6035_v55 = vld [vmem:[#allocation2 + $0x40] sm:$0xf] }
 0x26f   : > { %v3995_v31 = vpop.permute.xlu0 %3994  ;;  %v1976_v2 = vsel %vm454_vm1, %v5172_v16, %v7512_v12  ;;  %v5326_v16 = vcombine.low %v6034_v11, %v6035_v55 }
 0x270   : > { %v4077_v47 = vpop.permute.xlu1 %4076  ;;  %v2011_v27 = vsel %vm1983_vm14, %v1976_v2, %v7532_v41  ;;  %v4108_v12 = vsel %vm454_vm1, %v5323_v14, %v3995_v31  ;;  %v2015_v41 = vsel %vm1983_vm14, %v1982_v18, %v1934_v63  ;;  %v6037_v14 = vld [vmem:[#allocation2 + $0x58] sm:$0xf] }
 0x271   : > { %v4157_v63 = vsel %vm1983_vm14, %v4111_v25, %v4077_v47  ;;  %v5328_v10 = vcombine.low %v6036_v62, %v6037_v14 }
 0x273   : > { %5618 = vmatmul.mubr.msk.bf16.gmra.mrb[16].mxu1 %vm2906_vm15, %v2003_v53  ;;  %v4075_v58 = vpop.permute.xlu0 %4074 }
 0x274   : > { %5621 = vmatprep.mubr.msk.bf16.mxu1 %vm2906_vm15, %v2005_v39  ;;  %v4155_v53 = vsel %vm1983_vm14, %v4108_v12, %v4075_v58 }
 0x27a   : > { %v4001_v59 = vpop.permute.xlu1 %4000 }
 0x27b   : > { %5622 = vmatmul.mubr.msk.bf16.gmra.mrb[20].mxu1 %vm2906_vm15, %v2007_v44  ;;  %v4117_v46 = vsel %vm454_vm1, %v5326_v16, %v4001_v59 }
 0x27c   : > { %5625 = vmatprep.mubr.msk.bf16.mxu1 %vm2906_vm15, %v2009_v8 }
 0x27d   : > { %v3999_v50 = vpop.permute.xlu0 %3998 }
 0x27e   : > { %v4081_v26 = vpop.permute.xlu1 %4080  ;;  %v4114_v31 = vsel %vm454_vm1, %v5325_v17, %v3999_v50  ;;  %v7888_v17 = vld [vmem:[#allocation5_spill] sm:$0xff] }
 0x27f   : > { %v4161_v50 = vsel %vm1983_vm14, %v4117_v46, %v4081_v26 }
 0x281   : > { %v4079_v39 = vpop.permute.xlu0 %4078 }
 0x282   : > { %v4159_v8 = vsel %vm1983_vm14, %v4114_v31, %v4079_v39 }
 0x283   : > { %5626 = vmatmul.mubr.msk.bf16.gmra.mrb[24].mxu1 %vm2906_vm15, %v2011_v27  ;;  %v5329_v27 = vcombine.low %v7169_v36, %v7179_v38  ;;  %v7887_v36 = vld [vmem:[#allocation3_spill] sm:$0xff] }
 0x284   : > { %5629 = vmatprep.mubr.msk.bf16.mxu1 %vm2906_vm15, %v2013_v51  ;;  %v5330_v38 = vcombine.low %v7887_v36, %v7155_v48  ;;  %v5332_v48 = vcombine.low %v7889_v22, %v7888_v17 }
 0x287   : > { %v4005_v15 = vpop.permute.xlu1 %4004 }
 0x288   : > { %v4123_v5 = vsel %vm454_vm1, %v5328_v10, %v4005_v15  ;;  %v4738_v10 = vsel %vm503_vm0, %v4729_v52, 0  ;;  %vm4965_vm0 = vcmask 130048  }
 0x28a   : > { %v4003_v57 = vpop.permute.xlu0 %4002 }
 0x28b   : > { %5630 = vmatmul.mubr.msk.bf16.gmra.mrb[28].mxu1 %vm2906_vm15, %v2015_v41  ;;  %v4085_v44 = vpop.permute.xlu1 %4084  ;;  %v4120_v33 = vsel %vm454_vm1, %v5327_v49, %v4003_v57 }
 0x28c   : > { %5635 = vmatprep.mubr.msk.bf16.mxu1 %vm2906_vm15, %v4155_v53  ;;  %v4165_v26 = vsel %vm1983_vm14, %v4123_v5, %v4085_v44 }
 0x28e   : > { %v4083_v58 = vpop.permute.xlu0 %4082 }
 0x28f   : > { %v4163_v2 = vsel %vm1983_vm14, %v4120_v33, %v4083_v58 }
 0x293   : > { %5636 = vmatmul.mubr.msk.bf16.vlgmr.msra.gmra.mrb[0].mxu1 %vm2906_vm15, %v4157_v63 }
 0x294   : > { %5639 = vmatprep.mubr.msk.bf16.mxu1 %vm2906_vm15, %v4159_v8 }
 0x295   : > { %v4009_v51 = vpop.permute.xlu1 %4008 }
 0x296   : > { %v4129_v53 = vsel %vm454_vm1, %v5330_v38, %v4009_v51 }
 0x298   : > { %v4007_v47 = vpop.permute.xlu0 %4006 }
 0x299   : > { %v4089_v29 = vpop.permute.xlu1 %4088  ;;  %v4126_v59 = vsel %vm454_vm1, %v5329_v27, %v4007_v47 }
 0x29a   : > { %v4169_v57 = vsel %vm1983_vm14, %v4129_v53, %v4089_v29 }
 0x29b   : > { %5640 = vmatmul.mubr.msk.bf16.gmra.mrb[4].mxu1 %vm2906_vm15, %v4161_v50 }
 0x29c   : > { %5643 = vmatprep.mubr.msk.bf16.mxu1 %vm2906_vm15, %v4163_v2  ;;  %v4087_v24 = vpop.permute.xlu0 %4086 }
 0x29d   : > { %v4167_v39 = vsel %vm1983_vm14, %v4126_v59, %v4087_v24 }
 0x2a2   : > { %v4013_v12 = vpop.permute.xlu1 %4012 }
 0x2a3   : > { %5644 = vmatmul.mubr.msk.bf16.gmra.mrb[8].mxu1 %vm2906_vm15, %v4165_v26  ;;  %v4135_v61 = vsel %vm454_vm1, %v5332_v48, %v4013_v12 }
 0x2a4   : > { %5647 = vmatprep.mubr.msk.bf16.mxu1 %vm2906_vm15, %v4167_v39 }
 0x2a5   : > { %v4011_v18 = vpop.permute.xlu0 %4010 }
 0x2a6   : > { %v4132_v41 = vsel %vm454_vm1, %v5331_v23, %v4011_v18  ;;  %v4093_v7 = vpop.permute.xlu1 %4092 }
 0x2a7   : > { %v4173_v56 = vsel %vm1983_vm14, %v4135_v61, %v4093_v7 }
 0x2a9   : > { %v4091_v15 = vpop.permute.xlu0 %4090 }
 0x2aa   : > { %v4171_v20 = vsel %vm1983_vm14, %v4132_v41, %v4091_v15 }
 0x2ab   : > { %5648 = vmatmul.mubr.msk.bf16.gmra.mrb[12].mxu1 %vm2906_vm15, %v4169_v57 }
 0x2ac   : > { %5651 = vmatprep.mubr.msk.bf16.mxu1 %vm2906_vm15, %v4171_v20 }
 0x2b0   : > { %v4017_v3 = vpop.permute.xlu1 %4016 }
 0x2b1   : > { %v4141_v8 = vsel %vm454_vm1, %v5334_v9, %v4017_v3 }
 0x2b3   : > { %5652 = vmatmul.mubr.msk.bf16.gmra.mrb[16].mxu1 %vm2906_vm15, %v4173_v56  ;;  %v4015_v43 = vpop.permute.xlu0 %4014 }
 0x2b4   : > { %v4097_v23 = vpop.permute.xlu1 %4096  ;;  %v4138_v31 = vsel %vm454_vm1, %v5333_v60, %v4015_v43 }
 0x2b5   : > { %v4177_v44 = vsel %vm1983_vm14, %v4141_v8, %v4097_v23 }
 0x2b7   : > { %v4095_v25 = vpop.permute.xlu0 %4094 }
 0x2b8   : > { %v4175_v63 = vsel %vm1983_vm14, %v4138_v31, %v4095_v25 }
 0x2b9   : > { %5655 = vmatprep.mubr.msk.bf16.mxu1 %vm2906_vm15, %v4175_v63 }
 0x2bb   : > { %5656 = vmatmul.mubr.msk.bf16.gmra.mrb[20].mxu1 %vm2906_vm15, %v4177_v44 }
 0x2bd   : > { %v4021_v58 = vpop.permute.xlu1 %4020 }
 0x2be   : > { %v4147_v0 = vsel %vm454_vm1, %v5336_v13, %v4021_v58 }
 0x2c0   : > { %v4019_v6 = vpop.permute.xlu0 %4018 }
 0x2c1   : > { %v4101_v54 = vpop.permute.xlu1 %4100  ;;  %v4144_v19 = vsel %vm454_vm1, %v5335_v45, %v4019_v6 }
 0x2c2   : > { %v4181_v9 = vsel %vm1983_vm14, %v4147_v0, %v4101_v54 }
 0x2c4   : > { %v4099_v35 = vpop.permute.xlu0 %4098 }
 0x2c5   : > { %v4179_v4 = vsel %vm1983_vm14, %v4144_v19, %v4099_v35 }
 0x2c6   : > { %5659 = vmatprep.mubr.msk.bf16.mxu1 %vm2906_vm15, %v4179_v4 }
 0x2c7   : > { %5660 = vmatmul.mubr.msk.bf16.gmra.mrb[24].mxu1 %vm2906_vm15, %v4181_v9 }
 0x2cb   : > { %v4025_v60 = vpop.permute.xlu1 %4024 }
 0x2cc   : > { %v4153_v28 = vsel %vm454_vm1, %v5338_v30, %v4025_v60 }
 0x2ce   : > { %v4023_v49 = vpop.permute.xlu0 %4022 }
 0x2cf   : > { %v4105_v32 = vpop.permute.xlu1 %4104  ;;  %v4150_v37 = vsel %vm454_vm1, %v5337_v34, %v4023_v49 }
 0x2d0   : > { %v4185_v45 = vsel %vm1983_vm14, %v4153_v28, %v4105_v32 }
 0x2d2   : > { %v4103_v42 = vpop.permute.xlu0 %4102 }
 0x2d3   : > { %v4183_v13 = vsel %vm1983_vm14, %v4150_v37, %v4103_v42 }
 0x2d4   : > { %5663 = vmatprep.mubr.msk.bf16.mxu1 %vm2906_vm15, %v4183_v13 }
 0x2d5   : > { %5664 = vmatmul.mubr.msk.bf16.gmra.mrb[28].mxu1 %vm2906_vm15, %v4185_v45 }
 0x366   : > { %v5637_v40 = vpop.f32.mrb[0].mxu1 }
 0x367   : > { %v4431_v1 = vadd.f32 %v5637_v40, %v7671_v21  ;;  %v4263_v30 = vpop.f32.mrb[1].mxu1 }
 0x368   : > { %v4429_v34 = vadd.f32 %v7671_v21, %v4263_v30  ;;  %v5638_v11 = vpop.f32.mrb[2].mxu1 }
 0x369   : > { %v4432_v55 = vadd.f32 %v5638_v11, %v7671_v21  ;;  %v4266_v16 = vpop.f32.mrb[3].mxu1  ;;  %v4463_v46 = vmax.f32 %v4431_v1, 0.0 }
 0x36a   : > { %v4430_v33 = vadd.f32 %v7671_v21, %v4266_v16  ;;  %v4461_v51 = vmax.f32 %v4429_v34, 0.0 }
 0x36b   : > { %v4464_v2 = vmax.f32 %v4432_v55, 0.0 }
 0x36c   : > { %v4462_v47 = vmax.f32 %v4430_v33, 0.0 }
 0x36d   : > { %v4494_v50 = vpack.c.bf16 %v4464_v2, %v4463_v46 }
 0x36e   : > { %v4493_v27 = vpack.c.bf16 %v4462_v47, %v4461_v51  ;;  %v5641_v24 = vpop.f32.mrb[4].mxu1 }
 0x36f   : > { %v4435_v62 = vadd.f32 %v5641_v24, %v7671_v21  ;;  %v4279_v14 = vpop.f32.mrb[5].mxu1 }
 0x370   : > { %v4433_v29 = vadd.f32 %v7671_v21, %v4279_v14  ;;  %v5642_v59 = vpop.f32.mrb[6].mxu1  ;;  %5669 = vmatprep.mubr.msk.bf16.mxu0 %vm454_vm1, %v4493_v27 }
 0x371   : > { %v4436_v5 = vadd.f32 %v5642_v59, %v7671_v21  ;;  %v4282_v39 = vpop.f32.mrb[7].mxu1  ;;  %5670 = vmatmul.mubr.msk.bf16.vlgmr.msra.gmra.mrb[32].mxu0 %vm454_vm1, %v4494_v50  ;;  %v4467_v12 = vmax.f32 %v4435_v62, 0.0 }
 0x372   : > { %v4434_v26 = vadd.f32 %v7671_v21, %v4282_v39  ;;  %5702 = vmatpush3.bf16.msra.mxu0 %v4738_v10  ;;  %v4465_v36 = vmax.f32 %v4433_v29, 0.0 }
 0x373   : > { %v4468_v18 = vmax.f32 %v4436_v5, 0.0 }
 0x374   : > { %v4466_v38 = vmax.f32 %v4434_v26, 0.0 }
 0x375   : > { %v4496_v53 = vpack.c.bf16 %v4468_v18, %v4467_v12 }
 0x376   : > { %v4495_v41 = vpack.c.bf16 %v4466_v38, %v4465_v36  ;;  %v5645_v15 = vpop.f32.mrb[8].mxu1 }
 0x377   : > { %v4439_v57 = vadd.f32 %v5645_v15, %v7671_v21  ;;  %v4295_v20 = vpop.f32.mrb[9].mxu1 }
 0x378   : > { %v4437_v7 = vadd.f32 %v7671_v21, %v4295_v20  ;;  %v5646_v17 = vpop.f32.mrb[10].mxu1  ;;  %5673 = vmatprep.mubr.msk.bf16.mxu0 %vm454_vm1, %v4495_v41 }
 0x379   : > { %v4440_v22 = vadd.f32 %v5646_v17, %v7671_v21  ;;  %v4298_v48 = vpop.f32.mrb[11].mxu1  ;;  %5674 = vmatmul.mubr.msk.bf16.gmra.mrb[36].mxu0 %vm454_vm1, %v4496_v53  ;;  %v4471_v3 = vmax.f32 %v4439_v57, 0.0 }
 0x37a   : > { %v4438_v61 = vadd.f32 %v7671_v21, %v4298_v48  ;;  %v4469_v43 = vmax.f32 %v4437_v7, 0.0 }
 0x37b   : > { %v4472_v56 = vmax.f32 %v4440_v22, 0.0 }
 0x37c   : > { %v4470_v23 = vmax.f32 %v4438_v61, 0.0 }
 0x37d   : > { %v4498_v31 = vpack.c.bf16 %v4472_v56, %v4471_v3 }
 0x37e   : > { %v4497_v25 = vpack.c.bf16 %v4470_v23, %v4469_v43  ;;  %v5649_v8 = vpop.f32.mrb[12].mxu1 }
 0x37f   : > { %v4443_v63 = vadd.f32 %v5649_v8, %v7671_v21  ;;  %v4311_v44 = vpop.f32.mrb[13].mxu1 }
 0x380   : > { %v4441_v58 = vadd.f32 %v7671_v21, %v4311_v44  ;;  %v5650_v6 = vpop.f32.mrb[14].mxu1  ;;  %5677 = vmatprep.mubr.msk.bf16.mxu0 %vm454_vm1, %v4497_v25 }
 0x381   : > { %v4444_v54 = vadd.f32 %v5650_v6, %v7671_v21  ;;  %v4314_v19 = vpop.f32.mrb[15].mxu1  ;;  %5678 = vmatmul.mubr.msk.bf16.gmra.mrb[40].mxu0 %vm454_vm1, %v4498_v31  ;;  %v4475_v0 = vmax.f32 %v4443_v63, 0.0 }
 0x382   : > { %v4442_v35 = vadd.f32 %v7671_v21, %v4314_v19  ;;  %v4473_v9 = vmax.f32 %v4441_v58, 0.0 }
 0x383   : > { %v4476_v4 = vmax.f32 %v4444_v54, 0.0 }
 0x384   : > { %v4474_v60 = vmax.f32 %v4442_v35, 0.0  ;;  %v6038_v35 = vld [vmem:[%s6134_s16] sm:$0xff]  }
 0x385   : > { %v4500_v49 = vpack.c.bf16 %v4476_v4, %v4475_v0  ;;  %v6039_v0 = vld [vmem:[%s6134_s16 + $0x8] sm:$0xff]   ;;  %v6041_v4 = vld [vmem:[%s6134_s16 + $0x18] sm:$0xff]  }
 0x386   : > { %v4499_v28 = vpack.c.bf16 %v4474_v60, %v4473_v9  ;;  %v5653_v32 = vpop.f32.mrb[16].mxu1  ;;  %v6042_v9 = vld [vmem:[%s6134_s16 + $0x20] sm:$0xff]   ;;  %v6043_v60 = vld [vmem:[%s6134_s16 + $0x28] sm:$0xff]  }
 0x387   : > { %v4447_v37 = vadd.f32 %v5653_v32, %v7671_v21  ;;  %v4327_v42 = vpop.f32.mrb[17].mxu1  ;;  %v6046_v32 = vld [vmem:[%s6134_s16 + $0x40] sm:$0xff]  }
 0x388   : > { %v4445_v13 = vadd.f32 %v7671_v21, %v4327_v42  ;;  %v5654_v45 = vpop.f32.mrb[18].mxu1  ;;  %5681 = vmatprep.mubr.msk.bf16.mxu0 %vm454_vm1, %v4499_v28  ;;  %v6045_v28 = vld [vmem:[%s6134_s16 + $0x38] sm:$0xff]   ;;  %v6048_v42 = vld [vmem:[%s6134_s16 + $0x50] sm:$0xff]  }
 0x389   : > { %v4448_v52 = vadd.f32 %v5654_v45, %v7671_v21  ;;  %v4330_v40 = vpop.f32.mrb[19].mxu1  ;;  %5682 = vmatmul.mubr.msk.bf16.gmra.mrb[44].mxu0 %vm454_vm1, %v4500_v49  ;;  %v4479_v30 = vmax.f32 %v4447_v37, 0.0  ;;  %v6044_v49 = vld [vmem:[%s6134_s16 + $0x30] sm:$0xff]   ;;  %v6047_v37 = vld [vmem:[%s6134_s16 + $0x48] sm:$0xff]   ;;  %v6050_v45 = vld [vmem:[%s6134_s16 + $0x60] sm:$0xff]  }
 0x38a   : > { %v4446_v1 = vadd.f32 %v7671_v21, %v4330_v40  ;;  %v4477_v11 = vmax.f32 %v4445_v13, 0.0  ;;  %v6049_v13 = vld [vmem:[%s6134_s16 + $0x58] sm:$0xff]   ;;  %v6052_v40 = vld [vmem:[%s6134_s16 + $0x70] sm:$0xff]  }
 0x38b   : > { %v4480_v34 = vmax.f32 %v4448_v52, 0.0  ;;  %v6051_v52 = vld [vmem:[%s6134_s16 + $0x68] sm:$0xff]  }
 0x38c   : > { %v4478_v55 = vmax.f32 %v4446_v1, 0.0  ;;  %v6053_v1 = vld [vmem:[%s6134_s16 + $0x78] sm:$0xff]  }
 0x38d   : > { %v4502_v16 = vpack.c.bf16 %v4480_v34, %v4479_v30  ;;  %v5391_v30 = vld [vmem:[%s7871_s6] ss:$0 sm:$0xff] }
 0x38e   : > { %v4501_v33 = vpack.c.bf16 %v4478_v55, %v4477_v11  ;;  %v5657_v46 = vpop.f32.mrb[20].mxu1  ;;  %v5408_v34 = vld [vmem:[%s7873_s8] ss:$0 sm:$0xff] }
 0x38f   : > { %v4451_v2 = vadd.f32 %v5657_v46, %v7671_v21  ;;  %v4343_v51 = vpop.f32.mrb[21].mxu1  ;;  %v7760_v11 = vadd.f32 %v5408_v34, %v5391_v30 }
 0x390   : > { %v4449_v47 = vadd.f32 %v7671_v21, %v4343_v51  ;;  %v5658_v50 = vpop.f32.mrb[22].mxu1  ;;  %5685 = vmatprep.mubr.msk.bf16.mxu0 %vm454_vm1, %v4501_v33 }
 0x391   : > { %v4452_v27 = vadd.f32 %v5658_v50, %v7671_v21  ;;  %v4346_v24 = vpop.f32.mrb[23].mxu1  ;;  %5686 = vmatmul.mubr.msk.bf16.gmra.mrb[48].mxu0 %vm454_vm1, %v4502_v16  ;;  %v4483_v14 = vmax.f32 %v4451_v2, 0.0 }
 0x392   : > { %v4450_v62 = vadd.f32 %v7671_v21, %v4346_v24  ;;  %v4481_v29 = vmax.f32 %v4449_v47, 0.0 }
 0x393   : > { %v4484_v10 = vmax.f32 %v4452_v27, 0.0 }
 0x394   : > { %v4482_v59 = vmax.f32 %v4450_v62, 0.0 }
 0x395   : > { %v4504_v5 = vpack.c.bf16 %v4484_v10, %v4483_v14 }
 0x396   : > { %v4503_v39 = vpack.c.bf16 %v4482_v59, %v4481_v29 }
 0x398   : > { %5689 = vmatprep.mubr.msk.bf16.mxu0 %vm454_vm1, %v4503_v39 }
 0x399   : > { %5690 = vmatmul.mubr.msk.bf16.gmra.mrb[52].mxu0 %vm454_vm1, %v4504_v5 }
 0x39a   : > { %v5661_v26 = vpop.f32.mrb[24].mxu1 }
 0x39b   : > { %v4455_v12 = vadd.f32 %v5661_v26, %v7671_v21  ;;  %v4359_v18 = vpop.f32.mrb[25].mxu1 }
 0x39c   : > { %v4453_v36 = vadd.f32 %v7671_v21, %v4359_v18  ;;  %v5662_v38 = vpop.f32.mrb[26].mxu1 }
 0x39d   : > { %v4456_v53 = vadd.f32 %v5662_v38, %v7671_v21  ;;  %v4362_v41 = vpop.f32.mrb[27].mxu1  ;;  %v4487_v57 = vmax.f32 %v4455_v12, 0.0 }
 0x39e   : > { %v4454_v15 = vadd.f32 %v7671_v21, %v4362_v41  ;;  %v4485_v7 = vmax.f32 %v4453_v36, 0.0 }
 0x39f   : > { %v4488_v20 = vmax.f32 %v4456_v53, 0.0 }
 0x3a0   : > { %v4486_v17 = vmax.f32 %v4454_v15, 0.0 }
 0x3a1   : > { %v4506_v22 = vpack.c.bf16 %v4488_v20, %v4487_v57 }
 0x3a2   : > { %v4505_v48 = vpack.c.bf16 %v4486_v17, %v4485_v7 }
 0x3a4   : > { %5693 = vmatprep.mubr.msk.bf16.mxu0 %vm454_vm1, %v4505_v48 }
 0x3a5   : > { %5694 = vmatmul.mubr.msk.bf16.gmra.mrb[56].mxu0 %vm454_vm1, %v4506_v22 }
 0x3a8   : > { %v5665_v61 = vpop.f32.mrb[28].mxu1 }
 0x3a9   : > { %v4459_v3 = vadd.f32 %v5665_v61, %v7671_v21  ;;  %v4375_v56 = vpop.f32.mrb[29].mxu1 }
 0x3aa   : > { %v4457_v43 = vadd.f32 %v7671_v21, %v4375_v56  ;;  %v5666_v23 = vpop.f32.mrb[30].mxu1 }
 0x3ab   : > { %v4460_v31 = vadd.f32 %v5666_v23, %v7671_v21  ;;  %v4378_v25 = vpop.f32.mrb[31].mxu1  ;;  %v4491_v63 = vmax.f32 %v4459_v3, 0.0 }
 0x3ac   : > { %v4458_v8 = vadd.f32 %v7671_v21, %v4378_v25  ;;  %v4489_v58 = vmax.f32 %v4457_v43, 0.0  ;;  %v6040_v21 = vld [vmem:[%s6134_s16 + $0x10] sm:$0xff]  }
 0x3ad   : > { %v4492_v44 = vmax.f32 %v4460_v31, 0.0 }
 0x3ae   : > { %v4490_v6 = vmax.f32 %v4458_v8, 0.0 }
 0x3af   : > { %v4508_v54 = vpack.c.bf16 %v4492_v44, %v4491_v63 }
 0x3b0   : > { %v4507_v19 = vpack.c.bf16 %v4490_v6, %v4489_v58 }
 0x3b2   : > { %5697 = vmatprep.mubr.msk.bf16.mxu0 %vm454_vm1, %v4507_v19 }
 0x3b3   : > { %5698 = vmatmul.mubr.msk.bf16.gmra.mrb[60].mxu0 %vm454_vm1, %v4508_v54 }
 0x3b4   : > { %5703 = vmatprep.mubr.msk.bf16.mxu0 %vm454_vm1, %v6038_v35 }
 0x3bb   : > { %5704 = vmatmul.mubr.msk.bf16.vlgmr.msra.gmra.mrb[32].mxu0 %vm454_vm1, %v6039_v0 }
 0x3bc   : > { %5707 = vmatprep.mubr.msk.bf16.mxu0 %vm454_vm1, %v6040_v21 }
 0x3c3   : > { %5708 = vmatmul.mubr.msk.bf16.gmra.mrb[36].mxu0 %vm454_vm1, %v6041_v4 }
 0x3c4   : > { %5711 = vmatprep.mubr.msk.bf16.mxu0 %vm454_vm1, %v6042_v9 }
 0x3cb   : > { %5712 = vmatmul.mubr.msk.bf16.gmra.mrb[40].mxu0 %vm454_vm1, %v6043_v60 }
 0x3cc   : > { %5715 = vmatprep.mubr.msk.bf16.mxu0 %vm454_vm1, %v6044_v49 }
 0x3d3   : > { %5716 = vmatmul.mubr.msk.bf16.gmra.mrb[44].mxu0 %vm454_vm1, %v6045_v28 }
 0x3d4   : > { %5719 = vmatprep.mubr.msk.bf16.mxu0 %vm454_vm1, %v6046_v32 }
 0x3db   : > { %5720 = vmatmul.mubr.msk.bf16.gmra.mrb[48].mxu0 %vm454_vm1, %v6047_v37 }
 0x3dc   : > { %5723 = vmatprep.mubr.msk.bf16.mxu0 %vm454_vm1, %v6048_v42 }
 0x3e3   : > { %5724 = vmatmul.mubr.msk.bf16.gmra.mrb[52].mxu0 %vm454_vm1, %v6049_v13 }
 0x3e4   : > { %5727 = vmatprep.mubr.msk.bf16.mxu0 %vm454_vm1, %v6050_v45 }
 0x3eb   : > { %5728 = vmatmul.mubr.msk.bf16.gmra.mrb[56].mxu0 %vm454_vm1, %v6051_v52 }
 0x3ec   : > { %5731 = vmatprep.mubr.msk.bf16.mxu0 %vm454_vm1, %v6052_v40 }
 0x3f3   : > { %5732 = vmatmul.mubr.msk.bf16.gmra.mrb[60].mxu0 %vm454_vm1, %v6053_v1 }
 0x48e   : > { %v5705_v55 = vpop.f32.mrb[32].mxu0 }
 0x48f   : > { %v5735_v16 = vadd.f32 %v5705_v55, %v5391_v30  ;;  %v4774_v33 = vpop.f32.mrb[33].mxu0 }
 0x490   : > { %v5737_v46 = vadd.f32 %v5391_v30, %v4774_v33  ;;  %v5706_v2 = vpop.f32.mrb[34].mxu0 }
 0x491   : > { %v5736_v51 = vadd.f32 %v5735_v16, %v5408_v34  ;;  %v5740_v47 = vadd.f32 %v7760_v11, %v5706_v2  ;;  %v4777_v50 = vpop.f32.mrb[35].mxu0 }
 0x492   : > { %v5738_v27 = vadd.f32 %v5737_v46, %v5408_v34  ;;  %v5742_v24 = vadd.f32 %v7760_v11, %v4777_v50 }
 0x493   : > { %v4935_v62 = vmax.f32 %v5736_v51, 0.0  ;;  %v4936_v14 = vmax.f32 %v5740_v47, 0.0 }
 0x494   : > { %v4933_v10 = vmax.f32 %v5738_v27, 0.0  ;;  %v4934_v29 = vmax.f32 %v5742_v24, 0.0 }
 0x495   : > { %4968 = vst.msk [vmem:[%s7767_s23 + $0x10] sm:$0xff] %vm4965_vm0, %v4935_v62  ;;  %4969 = vst.msk [vmem:[%s7767_s23 + $0x18] sm:$0xff] %vm4965_vm0, %v4936_v14 }
 0x496   : > { %4966 = vst.msk [vmem:[%s7767_s23] sm:$0xff] %vm4965_vm0, %v4933_v10  ;;  %4967 = vst.msk [vmem:[%s7767_s23 + $0x8] sm:$0xff] %vm4965_vm0, %v4934_v29  ;;  %v5709_v59 = vpop.f32.mrb[36].mxu0 }
 0x497   : > { %v5744_v5 = vadd.f32 %v7760_v11, %v5709_v59  ;;  %v4790_v39 = vpop.f32.mrb[37].mxu0 }
 0x498   : > { %v5746_v26 = vadd.f32 %v7760_v11, %v4790_v39  ;;  %v5710_v12 = vpop.f32.mrb[38].mxu0 }
 0x499   : > { %v4939_v18 = vmax.f32 %v5744_v5, 0.0  ;;  %v5748_v36 = vadd.f32 %v7760_v11, %v5710_v12  ;;  %v4793_v38 = vpop.f32.mrb[39].mxu0 }
 0x49a   : > { %v4937_v53 = vmax.f32 %v5746_v26, 0.0  ;;  %v5750_v41 = vadd.f32 %v7760_v11, %v4793_v38 }
 0x49b   : > { %4972 = vst.msk [vmem:[%s7767_s23 + $0x30] sm:$0xff] %vm4965_vm0, %v4939_v18  ;;  %v4940_v15 = vmax.f32 %v5748_v36, 0.0 }
 0x49c   : > { %4970 = vst.msk [vmem:[%s7767_s23 + $0x20] sm:$0xff] %vm4965_vm0, %v4937_v53  ;;  %v4938_v57 = vmax.f32 %v5750_v41, 0.0 }
 0x49d   : > { %4973 = vst.msk [vmem:[%s7767_s23 + $0x38] sm:$0xff] %vm4965_vm0, %v4940_v15 }
 0x49e   : > { %4971 = vst.msk [vmem:[%s7767_s23 + $0x28] sm:$0xff] %vm4965_vm0, %v4938_v57  ;;  %v5713_v20 = vpop.f32.mrb[40].mxu0 }
 0x49f   : > { %v5752_v7 = vadd.f32 %v7760_v11, %v5713_v20  ;;  %v4806_v17 = vpop.f32.mrb[41].mxu0 }
 0x4a0   : > { %v5754_v22 = vadd.f32 %v7760_v11, %v4806_v17  ;;  %v5714_v48 = vpop.f32.mrb[42].mxu0 }
 0x4a1   : > { %v4943_v61 = vmax.f32 %v5752_v7, 0.0  ;;  %v5756_v3 = vadd.f32 %v7760_v11, %v5714_v48  ;;  %v4809_v56 = vpop.f32.mrb[43].mxu0 }
 0x4a2   : > { %v4941_v43 = vmax.f32 %v5754_v22, 0.0  ;;  %v5758_v23 = vadd.f32 %v7760_v11, %v4809_v56 }
 0x4a3   : > { %4976 = vst.msk [vmem:[%s7767_s23 + $0x50] sm:$0xff] %vm4965_vm0, %v4943_v61  ;;  %v4944_v31 = vmax.f32 %v5756_v3, 0.0 }
 0x4a4   : > { %4974 = vst.msk [vmem:[%s7767_s23 + $0x40] sm:$0xff] %vm4965_vm0, %v4941_v43  ;;  %v4942_v25 = vmax.f32 %v5758_v23, 0.0 }
 0x4a5   : > { %4977 = vst.msk [vmem:[%s7767_s23 + $0x58] sm:$0xff] %vm4965_vm0, %v4944_v31 }
 0x4a6   : > { %4975 = vst.msk [vmem:[%s7767_s23 + $0x48] sm:$0xff] %vm4965_vm0, %v4942_v25  ;;  %v5717_v8 = vpop.f32.mrb[44].mxu0 }
 0x4a7   : > { %v5760_v63 = vadd.f32 %v7760_v11, %v5717_v8  ;;  %v4822_v44 = vpop.f32.mrb[45].mxu0 }
 0x4a8   : > { %v5762_v58 = vadd.f32 %v7760_v11, %v4822_v44  ;;  %v5718_v6 = vpop.f32.mrb[46].mxu0 }
 0x4a9   : > { %v4947_v54 = vmax.f32 %v5760_v63, 0.0  ;;  %v5764_v19 = vadd.f32 %v7760_v11, %v5718_v6  ;;  %v4825_v35 = vpop.f32.mrb[47].mxu0 }
 0x4aa   : > { %v4945_v0 = vmax.f32 %v5762_v58, 0.0  ;;  %v5766_v21 = vadd.f32 %v7760_v11, %v4825_v35 }
 0x4ab   : > { %4980 = vst.msk [vmem:[%s7767_s23 + $0x70] sm:$0xff] %vm4965_vm0, %v4947_v54  ;;  %v4948_v4 = vmax.f32 %v5764_v19, 0.0 }
 0x4ac   : > { %4978 = vst.msk [vmem:[%s7767_s23 + $0x60] sm:$0xff] %vm4965_vm0, %v4945_v0  ;;  %v4946_v9 = vmax.f32 %v5766_v21, 0.0 }
 0x4ad   : > { %4981 = vst.msk [vmem:[%s7767_s23 + $0x78] sm:$0xff] %vm4965_vm0, %v4948_v4 }
 0x4ae   : > { %4979 = vst.msk [vmem:[%s7767_s23 + $0x68] sm:$0xff] %vm4965_vm0, %v4946_v9  ;;  %v5721_v60 = vpop.f32.mrb[48].mxu0 }
 0x4af   : > { %v5768_v49 = vadd.f32 %v7760_v11, %v5721_v60  ;;  %v4838_v28 = vpop.f32.mrb[49].mxu0 }
 0x4b0   : > { %v5770_v32 = vadd.f32 %v7760_v11, %v4838_v28  ;;  %v5722_v37 = vpop.f32.mrb[50].mxu0 }
 0x4b1   : > { %v4951_v42 = vmax.f32 %v5768_v49, 0.0  ;;  %v5772_v13 = vadd.f32 %v7760_v11, %v5722_v37  ;;  %v4841_v45 = vpop.f32.mrb[51].mxu0 }
 0x4b2   : > { %v4949_v52 = vmax.f32 %v5770_v32, 0.0  ;;  %v5774_v40 = vadd.f32 %v7760_v11, %v4841_v45 }
 0x4b3   : > { %4984 = vst.msk [vmem:[%s7767_s23 + $0x90] sm:$0xff] %vm4965_vm0, %v4951_v42  ;;  %v4952_v1 = vmax.f32 %v5772_v13, 0.0 }
 0x4b4   : > { %4982 = vst.msk [vmem:[%s7767_s23 + $0x80] sm:$0xff] %vm4965_vm0, %v4949_v52  ;;  %v4950_v30 = vmax.f32 %v5774_v40, 0.0 }
 0x4b5   : > { %4985 = vst.msk [vmem:[%s7767_s23 + $0x98] sm:$0xff] %vm4965_vm0, %v4952_v1 }
 0x4b6   : > { %4983 = vst.msk [vmem:[%s7767_s23 + $0x88] sm:$0xff] %vm4965_vm0, %v4950_v30  ;;  %v5725_v34 = vpop.f32.mrb[52].mxu0 }
 0x4b7   : > { %v5776_v55 = vadd.f32 %v7760_v11, %v5725_v34  ;;  %v4854_v16 = vpop.f32.mrb[53].mxu0 }
 0x4b8   : > { %v5778_v33 = vadd.f32 %v7760_v11, %v4854_v16  ;;  %v5726_v46 = vpop.f32.mrb[54].mxu0 }
 0x4b9   : > { %v4955_v2 = vmax.f32 %v5776_v55, 0.0  ;;  %v5780_v51 = vadd.f32 %v7760_v11, %v5726_v46  ;;  %v4857_v47 = vpop.f32.mrb[55].mxu0 }
 0x4ba   : > { %v4953_v50 = vmax.f32 %v5778_v33, 0.0  ;;  %v5782_v27 = vadd.f32 %v7760_v11, %v4857_v47 }
 0x4bb   : > { %4988 = vst.msk [vmem:[%s7767_s23 + $0xb0] sm:$0xff] %vm4965_vm0, %v4955_v2  ;;  %v4956_v24 = vmax.f32 %v5780_v51, 0.0 }
 0x4bc   : > { %4986 = vst.msk [vmem:[%s7767_s23 + $0xa0] sm:$0xff] %vm4965_vm0, %v4953_v50  ;;  %v4954_v62 = vmax.f32 %v5782_v27, 0.0 }
 0x4bd   : > { %4989 = vst.msk [vmem:[%s7767_s23 + $0xb8] sm:$0xff] %vm4965_vm0, %v4956_v24 }
 0x4be   : > { %4987 = vst.msk [vmem:[%s7767_s23 + $0xa8] sm:$0xff] %vm4965_vm0, %v4954_v62  ;;  %v5729_v14 = vpop.f32.mrb[56].mxu0 }
 0x4bf   : > { %v5784_v10 = vadd.f32 %v7760_v11, %v5729_v14  ;;  %v4870_v29 = vpop.f32.mrb[57].mxu0 }
 0x4c0   : > { %v5786_v59 = vadd.f32 %v7760_v11, %v4870_v29  ;;  %v5730_v5 = vpop.f32.mrb[58].mxu0 }
 0x4c1   : > { %v4959_v39 = vmax.f32 %v5784_v10, 0.0  ;;  %v5788_v26 = vadd.f32 %v7760_v11, %v5730_v5  ;;  %v4873_v12 = vpop.f32.mrb[59].mxu0 }
 0x4c2   : > { %v4957_v18 = vmax.f32 %v5786_v59, 0.0  ;;  %v5790_v36 = vadd.f32 %v7760_v11, %v4873_v12 }
 0x4c3   : > { %4992 = vst.msk [vmem:[%s7767_s23 + $0xd0] sm:$0xff] %vm4965_vm0, %v4959_v39  ;;  %v4960_v38 = vmax.f32 %v5788_v26, 0.0 }
 0x4c4   : > { %4990 = vst.msk [vmem:[%s7767_s23 + $0xc0] sm:$0xff] %vm4965_vm0, %v4957_v18  ;;  %v4958_v53 = vmax.f32 %v5790_v36, 0.0 }
 0x4c5   : > { %4993 = vst.msk [vmem:[%s7767_s23 + $0xd8] sm:$0xff] %vm4965_vm0, %v4960_v38 }
 0x4c6   : > { %4991 = vst.msk [vmem:[%s7767_s23 + $0xc8] sm:$0xff] %vm4965_vm0, %v4958_v53  ;;  %v5733_v41 = vpop.f32.mrb[60].mxu0 }
 0x4c7   : > { %v5792_v15 = vadd.f32 %v7760_v11, %v5733_v41  ;;  %v4886_v57 = vpop.f32.mrb[61].mxu0 }
 0x4c8   : > { %v5794_v20 = vadd.f32 %v7760_v11, %v4886_v57  ;;  %v5734_v7 = vpop.f32.mrb[62].mxu0 }
 0x4c9   : > { %v4963_v17 = vmax.f32 %v5792_v15, 0.0  ;;  %v5796_v22 = vadd.f32 %v7760_v11, %v5734_v7  ;;  %v4889_v48 = vpop.f32.mrb[63].mxu0 }
 0x4ca   : > { %v4961_v61 = vmax.f32 %v5794_v20, 0.0  ;;  %v5798_v3 = vadd.f32 %v7760_v11, %v4889_v48 }
 0x4cb   : > { %4996 = vst.msk [vmem:[%s7767_s23 + $0xf0] sm:$0xff] %vm4965_vm0, %v4963_v17  ;;  %v4964_v56 = vmax.f32 %v5796_v22, 0.0 }
 0x4cc   : > { %4994 = vst.msk [vmem:[%s7767_s23 + $0xe0] sm:$0xff] %vm4965_vm0, %v4961_v61  ;;  %v4962_v43 = vmax.f32 %v5798_v3, 0.0 }
 0x4cd   : > { %4997 = vst.msk [vmem:[%s7767_s23 + $0xf8] sm:$0xff] %vm4965_vm0, %v4964_v56 }
 0x4ce   : > { %4995 = vst.msk [vmem:[%s7767_s23 + $0xe8] sm:$0xff] %vm4965_vm0, %v4962_v43 }
 0x4cf PF: > { %s19_s30 = sadd.s32 1, %s6060_s30  }
 0x4d0   : > { %p16_p4 = scmp.ge.s32.totalorder %s19_s30, 4  }
 0x4d2   :  { %18 = sbr.rel (!%p16_p4) target bundleno = 1 (0x1), region = 91 }

</bundles_post_ra>
